<compile_context>
chip_gen: v6e
topology: v6e:2x2x1
jax: 0.10.0
libtpu: 0.0.40
codegen_flags: <defaults>
</compile_context>

<pallas_src>
import functools

import jax
import jax.numpy as jnp
import numpy as np
from jax import lax
from jax.experimental import pallas as pl
from jax.experimental.pallas import tpu as pltpu


# ----------------------------------------------------------------------------
# Fused kernel: all 5 convs + LeakyReLU + residual for one batch element.
# ----------------------------------------------------------------------------
def _rdb_kernel(x_ref, mask_ref,
                w1_ref, b1_ref, w2_ref, b2_ref, w3_ref, b3_ref,
                w4_ref, b4_ref, w5m_ref, w5x4_ref, b5_ref,
                out_ref, feat_ref, patch_ref, *, nf, gc, H, W):
    """Layouts (channels on sublanes, flattened pixels on lanes):
       feat_ref  : (Ctot, (H+2)*(W+2)+2)  zero-ringed padded feature maps (bf16),
                   rows [0:nf)=x, [nf:nf+gc)=x1, ... (concat order)
       patch_ref : (9*(nf+3*gc), H*(W+2)) shared im2col patches (bf16) for the
                   chunks x,x1,x2,x3; rows grouped chunk-major, within a chunk
                   ordered (k = kh*3+kw, ci).  x4 is consumed straight from
                   feat_ref in layer 5 and never gets patch rows.
       conv out  : (Cout, H*(W+2)) f32    columns with w in {W, W+1} are garbage
                   and are masked to zero before being written back.
    """
    Hp, Wp = H + 2, W + 2
    npix = H * Wp            # lane width of conv outputs / patches
    npad = Hp * Wp           # lane width of (valid part of) padded maps
    inner = Wp + 1           # flat offset of padded coord (1, 1)
    ctot = nf + 4 * gc
    c4 = nf + 3 * gc

    # Load the f32 padded input block once: a bf16 copy feeds the convs, the
    # f32 values are reused for the full-precision residual add at the end.
    xb = x_ref[0]
    feat_ref[0:nf, 0:npad] = xb.astype(feat_ref.dtype)

    # Zero ONLY the slivers of the padded buffer that no step ever writes:
    #   * the 2 guard lanes of the x rows,
    #   * the leading (row 0 + position (1,0)) and trailing (tail of row H+1
    #     + guard lanes) pad regions of the growth rows.
    # Every other pad-ring position falls inside the per-layer store range and
    # is re-zeroed there via the `valid` mask, so this per-step cost is tiny
    # and the kernel does not rely on scratch persistence across grid steps
    # (megacore-safe for a "parallel" batch/tile axis).
    feat_ref[0:nf, npad:npad + 2] = jnp.zeros((nf, 2), feat_ref.dtype)
    feat_ref[nf:ctot, 0:inner] = jnp.zeros((ctot - nf, inner), feat_ref.dtype)
    feat_ref[nf:ctot, inner + npix:npad + 2] = jnp.zeros(
        (ctot - nf, Wp + 1), feat_ref.dtype)

    valid = mask_ref[...]    # (1, npix) f32: 1.0 on real pixels, 0.0 on pad cols

    def build_patch(c0, cc):
        # Append the 9 shifted slabs of chunk [c0, c0+cc) to the im2col buffer.
        for k in range(9):
            dy, dx = divmod(k, 3)
            off = dy * Wp + dx
            patch_ref[9 * c0 + k * cc: 9 * c0 + (k + 1) * cc, :] = (
                feat_ref[c0:c0 + cc, off:off + npix])

    def conv(w_ref, b_ref, cin):
        # Single MXU matmul over the fused 9*cin contraction (implicit concat),
        # bf16 operands, f32 accumulation.
        acc = jnp.dot(w_ref[...], patch_ref[0:9 * cin, :],
                      preferred_element_type=jnp.float32)
        return acc + b_ref[...]                          # (cout,1) f32 bias

    build_patch(0, nf)

    layers = ((w1_ref, b1_ref), (w2_ref, b2_ref),
              (w3_ref, b3_ref), (w4_ref, b4_ref))
    for i, (w_ref, b_ref) in enumerate(layers):
        acc = conv(w_ref, b_ref, nf + i * gc)
        acc = jnp.where(acc >= 0.0, acc, 0.2 * acc)      # LeakyReLU(0.2)
        acc = acc * valid                                # keep pad ring zero
        c0 = nf + i * gc
        feat_ref[c0:c0 + gc, inner:inner + npix] = acc.astype(feat_ref.dtype)
        if i < 3:
            build_patch(c0, gc)    # x4's patches are consumed in-place below

    # Layer 5 (0.2 residual scale already folded into w5/b5 on the host):
    # x/x1/x2/x3 come from the shared patch buffer; x4's nine shifted
    # contributions are accumulated directly from feat_ref slices.
    acc5 = jnp.dot(w5m_ref[...], patch_ref[0:9 * c4, :],
                   preferred_element_type=jnp.float32)
    for k in range(9):
        dy, dx = divmod(k, 3)
        off = dy * Wp + dx
        acc5 = acc5 + jnp.dot(w5x4_ref[k],
                              feat_ref[c4:c4 + gc, off:off + npix],
                              preferred_element_type=jnp.float32)
    acc5 = acc5 + b5_ref[...]

    # Residual add in full f32 precision straight from the input block.
    out_ref[0] = (acc5 + xb[:, inner:inner + npix]).astype(out_ref.dtype)


# ----------------------------------------------------------------------------
# Host wrapper (NCHW in / NCHW out, PyTorch semantics)
# ----------------------------------------------------------------------------
def _pack_weight(w_hwio, chunk_sizes, dtype):
    """(3,3,Cin,Cout) HWIO -> (Cout, 9*Cin), columns grouped chunk-major
    [x | x1 | ...], within a chunk ordered (k = kh*3+kw, ci) to match the
    im2col patch row layout."""
    cout = w_hwio.shape[-1]
    parts, c0 = [], 0
    for cc in chunk_sizes:
        blk = w_hwio[:, :, c0:c0 + cc, :]                 # (3, 3, cc, cout)
        blk = jnp.transpose(blk, (3, 0, 1, 2))            # (cout, 3, 3, cc)
        parts.append(blk.reshape(cout, 9 * cc))
        c0 += cc
    return jnp.concatenate(parts, axis=1).astype(dtype)


def residual_dense_block(x_nchw, params, *, compute_dtype=jnp.bfloat16):
    """Forward pass. x: (B, num_feat, H, W) NCHW."""
    B, nf, H, W = x_nchw.shape
    gc = params["w1"].shape[-1]                           # num_grow_ch
    Hp, Wp = H + 2, W + 2
    npix = H * Wp
    npad = Hp * Wp
    ctot = nf + 4 * gc
    c4 = nf + 3 * gc
    dtype = x_nchw.dtype
    cdt = compute_dtype

    # Pad once (both spatial dims) and flatten to the lane-dense padded layout.
    xpad = jnp.pad(x_nchw, ((0, 0), (0, 0), (1, 1), (1, 1))).reshape(B, nf, npad)

    # Lane mask for the 2 garbage columns per padded row (f32, tiny DMA).
    mask = ((jnp.arange(npix, dtype=jnp.int32) % Wp) < W)
    mask = mask.astype(jnp.float32).reshape(1, npix)

    # Pack weights (bf16) / biases (f32).  Layer 5: fold the 0.2 residual scale
    # and keep x4's slice separate so its im2col patches never materialize.
    chunk = [nf, gc, gc, gc]
    ws, bs = [], []
    for i in range(1, 5):
        ws.append(_pack_weight(params[f"w{i}"], chunk[:i], cdt))
        bs.append(params[f"b{i}"].astype(jnp.float32).reshape(-1, 1))
    w5 = params["w5"] * jnp.float32(0.2)
    w5_main = _pack_weight(w5[:, :, :c4, :], chunk, cdt)            # (nf, 9*c4)
    w5_x4 = jnp.transpose(w5[:, :, c4:, :], (0, 1, 3, 2))           # (3,3,nf,gc)
    w5_x4 = w5_x4.reshape(9, nf, gc).astype(cdt)
    b5 = (params["b5"] * jnp.float32(0.2)).astype(jnp.float32).reshape(-1, 1)

    args = [xpad, mask]
    in_specs = [pl.BlockSpec((1, nf, npad), lambda b: (b, 0, 0)),
                pl.BlockSpec((1, npix), lambda b: (0, 0))]
    for w, bias in zip(ws, bs):
        args += [w, bias]
        in_specs += [pl.BlockSpec(w.shape, lambda b: (0, 0)),
                     pl.BlockSpec(bias.shape, lambda b: (0, 0))]
    args += [w5_main, w5_x4, b5]
    in_specs += [pl.BlockSpec(w5_main.shape, lambda b: (0, 0)),
                 pl.BlockSpec(w5_x4.shape, lambda b: (0, 0, 0)),
                 pl.BlockSpec(b5.shape, lambda b: (0, 0))]

    out_flat = pl.pallas_call(
        functools.partial(_rdb_kernel, nf=nf, gc=gc, H=H, W=W),
        out_shape=jax.ShapeDtypeStruct((B, nf, npix), dtype),
        grid_spec=pltpu.PrefetchScalarGridSpec(
            num_scalar_prefetch=0,
            grid=(B,),
            in_specs=in_specs,
            out_specs=pl.BlockSpec((1, nf, npix), lambda b: (b, 0, 0)),
            scratch_shapes=[
                pltpu.VMEM((ctot, npad + 2), cdt),        # padded feature maps
                pltpu.VMEM((9 * c4, npix), cdt),          # shared im2col patch
            ]),
        compiler_params=pltpu.CompilerParams(
            dimension_semantics=("parallel",)),
    )(*args)

    # (B, nf, H*(W+2)) -> drop the 2 pad columns per row -> NCHW.
    return out_flat.reshape(B, nf, H, Wp)[:, :, :, :W]


# ----------------------------------------------------------------------------
# Pure-JAX reference (lax.conv, f32) for correctness check
# ----------------------------------------------------------------------------
def _ref_conv(x, w, b):
    y = lax.conv_general_dilated(
        x, w, window_strides=(1, 1), padding="SAME",
        dimension_numbers=("NCHW", "HWIO", "NCHW"),
        precision=lax.Precision.HIGHEST)
    return y + b[None, :, None, None]


def residual_dense_block_ref(x, params):
    lrelu = lambda v: jnp.where(v >= 0.0, v, 0.2 * v)
    x1 = lrelu(_ref_conv(x, params["w1"], params["b1"]))
    x2 = lrelu(_ref_conv(jnp.concatenate([x, x1], 1), params["w2"], params["b2"]))
    x3 = lrelu(_ref_conv(jnp.concatenate([x, x1, x2], 1), params["w3"], params["b3"]))
    x4 = lrelu(_ref_conv(jnp.concatenate([x, x1, x2, x3], 1),
                         params["w4"], params["b4"]))
    x5 = _ref_conv(jnp.concatenate([x, x1, x2, x3, x4], 1),
                   params["w5"], params["b5"])
    return x5 * 0.2 + x


# ----------------------------------------------------------------------------
# Deterministic parameter init + demo run
# ----------------------------------------------------------------------------
def init_params(key, num_feat, num_grow_ch):
    in_chs = [num_feat,
              num_feat + num_grow_ch,
              num_feat + 2 * num_grow_ch,
              num_feat + 3 * num_grow_ch,
              num_feat + 4 * num_grow_ch]
    out_chs = [num_grow_ch] * 4 + [num_feat]
    params = {}
    for i, (ci, co) in enumerate(zip(in_chs, out_chs), start=1):
        key, kw, kb = jax.random.split(key, 3)
        params[f"w{i}"] = jax.random.normal(kw, (3, 3, ci, co), jnp.float32) * 0.1
        params[f"b{i}"] = jax.random.normal(kb, (co,), jnp.float32) * 0.01
    return params


if __name__ == "__main__":
    # 16-channel chunks keep every bf16 sublane slice aligned to the packed
    # (16, 128) tile (avoids relayouts flagged in the review).
    B, C, H, W = 2, 16, 16, 16          # num_feat = 16
    num_grow_ch = 16

    key = jax.random.PRNGKey(0)
    key, kx = jax.random.split(key)
    x = jax.random.normal(kx, (B, C, H, W), jnp.float32)
    params = init_params(key, num_feat=C, num_grow_ch=num_grow_ch)

    out = jax.block_until_ready(jax.jit(residual_dense_block)(x, params))
    ref = jax.block_until_ready(residual_dense_block_ref(x, params))

    assert out.shape == (B, C, H, W)
    # Tolerance covers bf16 storage of activations/weights (f32 accumulation).
    np.testing.assert_allclose(np.asarray(out), np.asarray(ref),
                               rtol=4e-2, atol=4e-2)
    print("KERNEL_OK")
</pallas_src>

<mosaic_0001>
module attributes {stable_mosaic.version = 11 : i64} {
  func.func @_rdb_kernel(%arg0: i32, %arg1: memref<1x16x324xf32, #tpu.memory_space<vmem>>, %arg2: memref<1x288xf32, #tpu.memory_space<vmem>>, %arg3: memref<16x144xbf16, #tpu.memory_space<vmem>>, %arg4: memref<16x1xf32, #tpu.memory_space<vmem>>, %arg5: memref<16x288xbf16, #tpu.memory_space<vmem>>, %arg6: memref<16x1xf32, #tpu.memory_space<vmem>>, %arg7: memref<16x432xbf16, #tpu.memory_space<vmem>>, %arg8: memref<16x1xf32, #tpu.memory_space<vmem>>, %arg9: memref<16x576xbf16, #tpu.memory_space<vmem>>, %arg10: memref<16x1xf32, #tpu.memory_space<vmem>>, %arg11: memref<16x576xbf16, #tpu.memory_space<vmem>>, %arg12: memref<9x16x16xbf16, #tpu.memory_space<vmem>>, %arg13: memref<16x1xf32, #tpu.memory_space<vmem>>, %arg14: memref<1x16x288xf32, #tpu.memory_space<vmem>>, %arg15: memref<80x326xbf16, #tpu.memory_space<vmem>>, %arg16: memref<576x288xbf16, #tpu.memory_space<vmem>>) attributes {dimension_semantics = [#tpu.dimension_semantics<parallel>], iteration_bounds = array<i64: 2>, scalar_prefetch = 0 : i64, scratch_operands = 2 : i64, tpu.core_type = #tpu.core_type<tc>, window_params = [{transform_indices = @transform_0, window_bounds = array<i64: 1, 16, 324>}, {pipeline_mode = #tpu.pipeline_mode<synchronous>, transform_indices = @transform_1, window_bounds = array<i64: 1, 288>}, {pipeline_mode = #tpu.pipeline_mode<synchronous>, transform_indices = @transform_2, window_bounds = array<i64: 16, 144>}, {pipeline_mode = #tpu.pipeline_mode<synchronous>, transform_indices = @transform_3, window_bounds = array<i64: 16, 1>}, {pipeline_mode = #tpu.pipeline_mode<synchronous>, transform_indices = @transform_4, window_bounds = array<i64: 16, 288>}, {pipeline_mode = #tpu.pipeline_mode<synchronous>, transform_indices = @transform_5, window_bounds = array<i64: 16, 1>}, {pipeline_mode = #tpu.pipeline_mode<synchronous>, transform_indices = @transform_6, window_bounds = array<i64: 16, 432>}, {pipeline_mode = #tpu.pipeline_mode<synchronous>, transform_indices = @transform_7, window_bounds = array<i64: 16, 1>}, {pipeline_mode = #tpu.pipeline_mode<synchronous>, transform_indices = @transform_8, window_bounds = array<i64: 16, 576>}, {pipeline_mode = #tpu.pipeline_mode<synchronous>, transform_indices = @transform_9, window_bounds = array<i64: 16, 1>}, {pipeline_mode = #tpu.pipeline_mode<synchronous>, transform_indices = @transform_10, window_bounds = array<i64: 16, 576>}, {pipeline_mode = #tpu.pipeline_mode<synchronous>, transform_indices = @transform_11, window_bounds = array<i64: 9, 16, 16>}, {pipeline_mode = #tpu.pipeline_mode<synchronous>, transform_indices = @transform_12, window_bounds = array<i64: 16, 1>}, {transform_indices = @transform_13, window_bounds = array<i64: 1, 16, 288>}]} {
    %c0 = arith.constant 0 : index
    %c0_0 = arith.constant 0 : index
    %c0_1 = arith.constant 0 : index
    %0 = vector.load %arg1[%c0, %c0_0, %c0_1] : memref<1x16x324xf32, #tpu.memory_space<vmem>>, vector<1x16x324xf32>
    %1 = vector.shape_cast %0 : vector<1x16x324xf32> to vector<16x324xf32>
    %2 = arith.truncf %1 : vector<16x324xf32> to vector<16x324xbf16>
    %c0_2 = arith.constant 0 : index
    %c0_3 = arith.constant 0 : index
    %3 = vector.load %arg15[%c0_2, %c0_3] : memref<80x326xbf16, #tpu.memory_space<vmem>>, vector<16x324xbf16>
    tpu.vector_store %arg15[%c0_2, %c0_3], %2 {strides = array<i32>} : memref<80x326xbf16, #tpu.memory_space<vmem>>, vector<16x324xbf16>,
    %cst = arith.constant 0.000000e+00 : bf16
    %4 = vector.broadcast %cst : bf16 to vector<16x2xbf16>
    %c0_4 = arith.constant 0 : index
    %c324 = arith.constant 324 : index
    %5 = vector.load %arg15[%c0_4, %c324] : memref<80x326xbf16, #tpu.memory_space<vmem>>, vector<16x2xbf16>
    tpu.vector_store %arg15[%c0_4, %c324], %4 {strides = array<i32>} : memref<80x326xbf16, #tpu.memory_space<vmem>>, vector<16x2xbf16>,
    %cst_5 = arith.constant 0.000000e+00 : bf16
    %6 = vector.broadcast %cst_5 : bf16 to vector<64x19xbf16>
    %c16 = arith.constant 16 : index
    %c0_6 = arith.constant 0 : index
    %7 = vector.load %arg15[%c16, %c0_6] : memref<80x326xbf16, #tpu.memory_space<vmem>>, vector<64x19xbf16>
    tpu.vector_store %arg15[%c16, %c0_6], %6 {strides = array<i32>} : memref<80x326xbf16, #tpu.memory_space<vmem>>, vector<64x19xbf16>,
    %cst_7 = arith.constant 0.000000e+00 : bf16
    %8 = vector.broadcast %cst_7 : bf16 to vector<64x19xbf16>
    %c16_8 = arith.constant 16 : index
    %c307 = arith.constant 307 : index
    %9 = vector.load %arg15[%c16_8, %c307] : memref<80x326xbf16, #tpu.memory_space<vmem>>, vector<64x19xbf16>
    tpu.vector_store %arg15[%c16_8, %c307], %8 {strides = array<i32>} : memref<80x326xbf16, #tpu.memory_space<vmem>>, vector<64x19xbf16>,
    %c0_9 = arith.constant 0 : index
    %c0_10 = arith.constant 0 : index
    %10 = vector.load %arg2[%c0_9, %c0_10] : memref<1x288xf32, #tpu.memory_space<vmem>>, vector<1x288xf32>
    %c0_11 = arith.constant 0 : index
    %c0_12 = arith.constant 0 : index
    %11 = vector.load %arg15[%c0_11, %c0_12] : memref<80x326xbf16, #tpu.memory_space<vmem>>, vector<16x288xbf16>
    %c0_13 = arith.constant 0 : index
    %c0_14 = arith.constant 0 : index
    %12 = vector.load %arg16[%c0_13, %c0_14] : memref<576x288xbf16, #tpu.memory_space<vmem>>, vector<16x288xbf16>
    tpu.vector_store %arg16[%c0_13, %c0_14], %11 {strides = array<i32>} : memref<576x288xbf16, #tpu.memory_space<vmem>>, vector<16x288xbf16>,
    %c0_15 = arith.constant 0 : index
    %c1 = arith.constant 1 : index
    %13 = vector.load %arg15[%c0_15, %c1] : memref<80x326xbf16, #tpu.memory_space<vmem>>, vector<16x288xbf16>
    %c16_16 = arith.constant 16 : index
    %c0_17 = arith.constant 0 : index
    %14 = vector.load %arg16[%c16_16, %c0_17] : memref<576x288xbf16, #tpu.memory_space<vmem>>, vector<16x288xbf16>
    tpu.vector_store %arg16[%c16_16, %c0_17], %13 {strides = array<i32>} : memref<576x288xbf16, #tpu.memory_space<vmem>>, vector<16x288xbf16>,
    %c0_18 = arith.constant 0 : index
    %c2 = arith.constant 2 : index
    %15 = vector.load %arg15[%c0_18, %c2] : memref<80x326xbf16, #tpu.memory_space<vmem>>, vector<16x288xbf16>
    %c32 = arith.constant 32 : index
    %c0_19 = arith.constant 0 : index
    %16 = vector.load %arg16[%c32, %c0_19] : memref<576x288xbf16, #tpu.memory_space<vmem>>, vector<16x288xbf16>
    tpu.vector_store %arg16[%c32, %c0_19], %15 {strides = array<i32>} : memref<576x288xbf16, #tpu.memory_space<vmem>>, vector<16x288xbf16>,
    %c0_20 = arith.constant 0 : index
    %c18 = arith.constant 18 : index
    %17 = vector.load %arg15[%c0_20, %c18] : memref<80x326xbf16, #tpu.memory_space<vmem>>, vector<16x288xbf16>
    %c48 = arith.constant 48 : index
    %c0_21 = arith.constant 0 : index
    %18 = vector.load %arg16[%c48, %c0_21] : memref<576x288xbf16, #tpu.memory_space<vmem>>, vector<16x288xbf16>
    tpu.vector_store %arg16[%c48, %c0_21], %17 {strides = array<i32>} : memref<576x288xbf16, #tpu.memory_space<vmem>>, vector<16x288xbf16>,
    %c0_22 = arith.constant 0 : index
    %c19 = arith.constant 19 : index
    %19 = vector.load %arg15[%c0_22, %c19] : memref<80x326xbf16, #tpu.memory_space<vmem>>, vector<16x288xbf16>
    %c64 = arith.constant 64 : index
    %c0_23 = arith.constant 0 : index
    %20 = vector.load %arg16[%c64, %c0_23] : memref<576x288xbf16, #tpu.memory_space<vmem>>, vector<16x288xbf16>
    tpu.vector_store %arg16[%c64, %c0_23], %19 {strides = array<i32>} : memref<576x288xbf16, #tpu.memory_space<vmem>>, vector<16x288xbf16>,
    %c0_24 = arith.constant 0 : index
    %c20 = arith.constant 20 : index
    %21 = vector.load %arg15[%c0_24, %c20] : memref<80x326xbf16, #tpu.memory_space<vmem>>, vector<16x288xbf16>
    %c80 = arith.constant 80 : index
    %c0_25 = arith.constant 0 : index
    %22 = vector.load %arg16[%c80, %c0_25] : memref<576x288xbf16, #tpu.memory_space<vmem>>, vector<16x288xbf16>
    tpu.vector_store %arg16[%c80, %c0_25], %21 {strides = array<i32>} : memref<576x288xbf16, #tpu.memory_space<vmem>>, vector<16x288xbf16>,
    %c0_26 = arith.constant 0 : index
    %c36 = arith.constant 36 : index
    %23 = vector.load %arg15[%c0_26, %c36] : memref<80x326xbf16, #tpu.memory_space<vmem>>, vector<16x288xbf16>
    %c96 = arith.constant 96 : index
    %c0_27 = arith.constant 0 : index
    %24 = vector.load %arg16[%c96, %c0_27] : memref<576x288xbf16, #tpu.memory_space<vmem>>, vector<16x288xbf16>
    tpu.vector_store %arg16[%c96, %c0_27], %23 {strides = array<i32>} : memref<576x288xbf16, #tpu.memory_space<vmem>>, vector<16x288xbf16>,
    %c0_28 = arith.constant 0 : index
    %c37 = arith.constant 37 : index
    %25 = vector.load %arg15[%c0_28, %c37] : memref<80x326xbf16, #tpu.memory_space<vmem>>, vector<16x288xbf16>
    %c112 = arith.constant 112 : index
    %c0_29 = arith.constant 0 : index
    %26 = vector.load %arg16[%c112, %c0_29] : memref<576x288xbf16, #tpu.memory_space<vmem>>, vector<16x288xbf16>
    tpu.vector_store %arg16[%c112, %c0_29], %25 {strides = array<i32>} : memref<576x288xbf16, #tpu.memory_space<vmem>>, vector<16x288xbf16>,
    %c0_30 = arith.constant 0 : index
    %c38 = arith.constant 38 : index
    %27 = vector.load %arg15[%c0_30, %c38] : memref<80x326xbf16, #tpu.memory_space<vmem>>, vector<16x288xbf16>
    %c128 = arith.constant 128 : index
    %c0_31 = arith.constant 0 : index
    %28 = vector.load %arg16[%c128, %c0_31] : memref<576x288xbf16, #tpu.memory_space<vmem>>, vector<16x288xbf16>
    tpu.vector_store %arg16[%c128, %c0_31], %27 {strides = array<i32>} : memref<576x288xbf16, #tpu.memory_space<vmem>>, vector<16x288xbf16>,
    %c0_32 = arith.constant 0 : index
    %c0_33 = arith.constant 0 : index
    %29 = vector.load %arg3[%c0_32, %c0_33] : memref<16x144xbf16, #tpu.memory_space<vmem>>, vector<16x144xbf16>
    %c0_34 = arith.constant 0 : index
    %c0_35 = arith.constant 0 : index
    %30 = vector.load %arg16[%c0_34, %c0_35] : memref<576x288xbf16, #tpu.memory_space<vmem>>, vector<144x288xbf16>
    %cst_36 = arith.constant dense<0.000000e+00> : vector<16x288xf32>
    %31 = tpu.matmul %29, %30, %cst_36 {dimension_numbers = #tpu.dot_dimension_numbers<[1], [0], [0], [1], [0, 0, 1, 1], [], []>} : vector<16x144xbf16>, vector<144x288xbf16>, vector<16x288xf32> -> vector<16x288xf32>
    %c0_37 = arith.constant 0 : index
    %c0_38 = arith.constant 0 : index
    %32 = vector.load %arg4[%c0_37, %c0_38] : memref<16x1xf32, #tpu.memory_space<vmem>>, vector<16x1xf32>
    %33 = vector.broadcast %32 : vector<16x1xf32> to vector<16x288xf32>
    %34 = arith.addf %31, %33 : vector<16x288xf32>
    %cst_39 = arith.constant 0.000000e+00 : f32
    %35 = vector.broadcast %cst_39 : f32 to vector<16x288xf32>
    %36 = arith.cmpf oge, %34, %35 : vector<16x288xf32>
    %cst_40 = arith.constant 2.000000e-01 : f32
    %37 = vector.broadcast %cst_40 : f32 to vector<16x288xf32>
    %38 = arith.mulf %37, %34 : vector<16x288xf32>
    %39 = arith.select %36, %34, %38 : vector<16x288xi1>, vector<16x288xf32>
    %40 = vector.broadcast %10 : vector<1x288xf32> to vector<16x288xf32>
    %41 = arith.mulf %39, %40 : vector<16x288xf32>
    %42 = arith.truncf %41 : vector<16x288xf32> to vector<16x288xbf16>
    %c16_41 = arith.constant 16 : index
    %c19_42 = arith.constant 19 : index
    %43 = vector.load %arg15[%c16_41, %c19_42] : memref<80x326xbf16, #tpu.memory_space<vmem>>, vector<16x288xbf16>
    tpu.vector_store %arg15[%c16_41, %c19_42], %42 {strides = array<i32>} : memref<80x326xbf16, #tpu.memory_space<vmem>>, vector<16x288xbf16>,
    %c16_43 = arith.constant 16 : index
    %c0_44 = arith.constant 0 : index
    %44 = vector.load %arg15[%c16_43, %c0_44] : memref<80x326xbf16, #tpu.memory_space<vmem>>, vector<16x288xbf16>
    %c144 = arith.constant 144 : index
    %c0_45 = arith.constant 0 : index
    %45 = vector.load %arg16[%c144, %c0_45] : memref<576x288xbf16, #tpu.memory_space<vmem>>, vector<16x288xbf16>
    tpu.vector_store %arg16[%c144, %c0_45], %44 {strides = array<i32>} : memref<576x288xbf16, #tpu.memory_space<vmem>>, vector<16x288xbf16>,
    %c16_46 = arith.constant 16 : index
    %c1_47 = arith.constant 1 : index
    %46 = vector.load %arg15[%c16_46, %c1_47] : memref<80x326xbf16, #tpu.memory_space<vmem>>, vector<16x288xbf16>
    %c160 = arith.constant 160 : index
    %c0_48 = arith.constant 0 : index
    %47 = vector.load %arg16[%c160, %c0_48] : memref<576x288xbf16, #tpu.memory_space<vmem>>, vector<16x288xbf16>
    tpu.vector_store %arg16[%c160, %c0_48], %46 {strides = array<i32>} : memref<576x288xbf16, #tpu.memory_space<vmem>>, vector<16x288xbf16>,
    %c16_49 = arith.constant 16 : index
    %c2_50 = arith.constant 2 : index
    %48 = vector.load %arg15[%c16_49, %c2_50] : memref<80x326xbf16, #tpu.memory_space<vmem>>, vector<16x288xbf16>
    %c176 = arith.constant 176 : index
    %c0_51 = arith.constant 0 : index
    %49 = vector.load %arg16[%c176, %c0_51] : memref<576x288xbf16, #tpu.memory_space<vmem>>, vector<16x288xbf16>
    tpu.vector_store %arg16[%c176, %c0_51], %48 {strides = array<i32>} : memref<576x288xbf16, #tpu.memory_space<vmem>>, vector<16x288xbf16>,
    %c16_52 = arith.constant 16 : index
    %c18_53 = arith.constant 18 : index
    %50 = vector.load %arg15[%c16_52, %c18_53] : memref<80x326xbf16, #tpu.memory_space<vmem>>, vector<16x288xbf16>
    %c192 = arith.constant 192 : index
    %c0_54 = arith.constant 0 : index
    %51 = vector.load %arg16[%c192, %c0_54] : memref<576x288xbf16, #tpu.memory_space<vmem>>, vector<16x288xbf16>
    tpu.vector_store %arg16[%c192, %c0_54], %50 {strides = array<i32>} : memref<576x288xbf16, #tpu.memory_space<vmem>>, vector<16x288xbf16>,
    %c16_55 = arith.constant 16 : index
    %c19_56 = arith.constant 19 : index
    %52 = vector.load %arg15[%c16_55, %c19_56] : memref<80x326xbf16, #tpu.memory_space<vmem>>, vector<16x288xbf16>
    %c208 = arith.constant 208 : index
    %c0_57 = arith.constant 0 : index
    %53 = vector.load %arg16[%c208, %c0_57] : memref<576x288xbf16, #tpu.memory_space<vmem>>, vector<16x288xbf16>
    tpu.vector_store %arg16[%c208, %c0_57], %52 {strides = array<i32>} : memref<576x288xbf16, #tpu.memory_space<vmem>>, vector<16x288xbf16>,
    %c16_58 = arith.constant 16 : index
    %c20_59 = arith.constant 20 : index
    %54 = vector.load %arg15[%c16_58, %c20_59] : memref<80x326xbf16, #tpu.memory_space<vmem>>, vector<16x288xbf16>
    %c224 = arith.constant 224 : index
    %c0_60 = arith.constant 0 : index
    %55 = vector.load %arg16[%c224, %c0_60] : memref<576x288xbf16, #tpu.memory_space<vmem>>, vector<16x288xbf16>
    tpu.vector_store %arg16[%c224, %c0_60], %54 {strides = array<i32>} : memref<576x288xbf16, #tpu.memory_space<vmem>>, vector<16x288xbf16>,
    %c16_61 = arith.constant 16 : index
    %c36_62 = arith.constant 36 : index
    %56 = vector.load %arg15[%c16_61, %c36_62] : memref<80x326xbf16, #tpu.memory_space<vmem>>, vector<16x288xbf16>
    %c240 = arith.constant 240 : index
    %c0_63 = arith.constant 0 : index
    %57 = vector.load %arg16[%c240, %c0_63] : memref<576x288xbf16, #tpu.memory_space<vmem>>, vector<16x288xbf16>
    tpu.vector_store %arg16[%c240, %c0_63], %56 {strides = array<i32>} : memref<576x288xbf16, #tpu.memory_space<vmem>>, vector<16x288xbf16>,
    %c16_64 = arith.constant 16 : index
    %c37_65 = arith.constant 37 : index
    %58 = vector.load %arg15[%c16_64, %c37_65] : memref<80x326xbf16, #tpu.memory_space<vmem>>, vector<16x288xbf16>
    %c256 = arith.constant 256 : index
    %c0_66 = arith.constant 0 : index
    %59 = vector.load %arg16[%c256, %c0_66] : memref<576x288xbf16, #tpu.memory_space<vmem>>, vector<16x288xbf16>
    tpu.vector_store %arg16[%c256, %c0_66], %58 {strides = array<i32>} : memref<576x288xbf16, #tpu.memory_space<vmem>>, vector<16x288xbf16>,
    %c16_67 = arith.constant 16 : index
    %c38_68 = arith.constant 38 : index
    %60 = vector.load %arg15[%c16_67, %c38_68] : memref<80x326xbf16, #tpu.memory_space<vmem>>, vector<16x288xbf16>
    %c272 = arith.constant 272 : index
    %c0_69 = arith.constant 0 : index
    %61 = vector.load %arg16[%c272, %c0_69] : memref<576x288xbf16, #tpu.memory_space<vmem>>, vector<16x288xbf16>
    tpu.vector_store %arg16[%c272, %c0_69], %60 {strides = array<i32>} : memref<576x288xbf16, #tpu.memory_space<vmem>>, vector<16x288xbf16>,
    %c0_70 = arith.constant 0 : index
    %c0_71 = arith.constant 0 : index
    %62 = vector.load %arg5[%c0_70, %c0_71] : memref<16x288xbf16, #tpu.memory_space<vmem>>, vector<16x288xbf16>
    %c0_72 = arith.constant 0 : index
    %c0_73 = arith.constant 0 : index
    %63 = vector.load %arg16[%c0_72, %c0_73] : memref<576x288xbf16, #tpu.memory_space<vmem>>, vector<288x288xbf16>
    %cst_74 = arith.constant dense<0.000000e+00> : vector<16x288xf32>
    %64 = tpu.matmul %62, %63, %cst_74 {dimension_numbers = #tpu.dot_dimension_numbers<[1], [0], [0], [1], [0, 0, 1, 1], [], []>} : vector<16x288xbf16>, vector<288x288xbf16>, vector<16x288xf32> -> vector<16x288xf32>
    %c0_75 = arith.constant 0 : index
    %c0_76 = arith.constant 0 : index
    %65 = vector.load %arg6[%c0_75, %c0_76] : memref<16x1xf32, #tpu.memory_space<vmem>>, vector<16x1xf32>
    %66 = vector.broadcast %65 : vector<16x1xf32> to vector<16x288xf32>
    %67 = arith.addf %64, %66 : vector<16x288xf32>
    %cst_77 = arith.constant 0.000000e+00 : f32
    %68 = vector.broadcast %cst_77 : f32 to vector<16x288xf32>
    %69 = arith.cmpf oge, %67, %68 : vector<16x288xf32>
    %cst_78 = arith.constant 2.000000e-01 : f32
    %70 = vector.broadcast %cst_78 : f32 to vector<16x288xf32>
    %71 = arith.mulf %70, %67 : vector<16x288xf32>
    %72 = arith.select %69, %67, %71 : vector<16x288xi1>, vector<16x288xf32>
    %73 = vector.broadcast %10 : vector<1x288xf32> to vector<16x288xf32>
    %74 = arith.mulf %72, %73 : vector<16x288xf32>
    %75 = arith.truncf %74 : vector<16x288xf32> to vector<16x288xbf16>
    %c32_79 = arith.constant 32 : index
    %c19_80 = arith.constant 19 : index
    %76 = vector.load %arg15[%c32_79, %c19_80] : memref<80x326xbf16, #tpu.memory_space<vmem>>, vector<16x288xbf16>
    tpu.vector_store %arg15[%c32_79, %c19_80], %75 {strides = array<i32>} : memref<80x326xbf16, #tpu.memory_space<vmem>>, vector<16x288xbf16>,
    %c32_81 = arith.constant 32 : index
    %c0_82 = arith.constant 0 : index
    %77 = vector.load %arg15[%c32_81, %c0_82] : memref<80x326xbf16, #tpu.memory_space<vmem>>, vector<16x288xbf16>
    %c288 = arith.constant 288 : index
    %c0_83 = arith.constant 0 : index
    %78 = vector.load %arg16[%c288, %c0_83] : memref<576x288xbf16, #tpu.memory_space<vmem>>, vector<16x288xbf16>
    tpu.vector_store %arg16[%c288, %c0_83], %77 {strides = array<i32>} : memref<576x288xbf16, #tpu.memory_space<vmem>>, vector<16x288xbf16>,
    %c32_84 = arith.constant 32 : index
    %c1_85 = arith.constant 1 : index
    %79 = vector.load %arg15[%c32_84, %c1_85] : memref<80x326xbf16, #tpu.memory_space<vmem>>, vector<16x288xbf16>
    %c304 = arith.constant 304 : index
    %c0_86 = arith.constant 0 : index
    %80 = vector.load %arg16[%c304, %c0_86] : memref<576x288xbf16, #tpu.memory_space<vmem>>, vector<16x288xbf16>
    tpu.vector_store %arg16[%c304, %c0_86], %79 {strides = array<i32>} : memref<576x288xbf16, #tpu.memory_space<vmem>>, vector<16x288xbf16>,
    %c32_87 = arith.constant 32 : index
    %c2_88 = arith.constant 2 : index
    %81 = vector.load %arg15[%c32_87, %c2_88] : memref<80x326xbf16, #tpu.memory_space<vmem>>, vector<16x288xbf16>
    %c320 = arith.constant 320 : index
    %c0_89 = arith.constant 0 : index
    %82 = vector.load %arg16[%c320, %c0_89] : memref<576x288xbf16, #tpu.memory_space<vmem>>, vector<16x288xbf16>
    tpu.vector_store %arg16[%c320, %c0_89], %81 {strides = array<i32>} : memref<576x288xbf16, #tpu.memory_space<vmem>>, vector<16x288xbf16>,
    %c32_90 = arith.constant 32 : index
    %c18_91 = arith.constant 18 : index
    %83 = vector.load %arg15[%c32_90, %c18_91] : memref<80x326xbf16, #tpu.memory_space<vmem>>, vector<16x288xbf16>
    %c336 = arith.constant 336 : index
    %c0_92 = arith.constant 0 : index
    %84 = vector.load %arg16[%c336, %c0_92] : memref<576x288xbf16, #tpu.memory_space<vmem>>, vector<16x288xbf16>
    tpu.vector_store %arg16[%c336, %c0_92], %83 {strides = array<i32>} : memref<576x288xbf16, #tpu.memory_space<vmem>>, vector<16x288xbf16>,
    %c32_93 = arith.constant 32 : index
    %c19_94 = arith.constant 19 : index
    %85 = vector.load %arg15[%c32_93, %c19_94] : memref<80x326xbf16, #tpu.memory_space<vmem>>, vector<16x288xbf16>
    %c352 = arith.constant 352 : index
    %c0_95 = arith.constant 0 : index
    %86 = vector.load %arg16[%c352, %c0_95] : memref<576x288xbf16, #tpu.memory_space<vmem>>, vector<16x288xbf16>
    tpu.vector_store %arg16[%c352, %c0_95], %85 {strides = array<i32>} : memref<576x288xbf16, #tpu.memory_space<vmem>>, vector<16x288xbf16>,
    %c32_96 = arith.constant 32 : index
    %c20_97 = arith.constant 20 : index
    %87 = vector.load %arg15[%c32_96, %c20_97] : memref<80x326xbf16, #tpu.memory_space<vmem>>, vector<16x288xbf16>
    %c368 = arith.constant 368 : index
    %c0_98 = arith.constant 0 : index
    %88 = vector.load %arg16[%c368, %c0_98] : memref<576x288xbf16, #tpu.memory_space<vmem>>, vector<16x288xbf16>
    tpu.vector_store %arg16[%c368, %c0_98], %87 {strides = array<i32>} : memref<576x288xbf16, #tpu.memory_space<vmem>>, vector<16x288xbf16>,
    %c32_99 = arith.constant 32 : index
    %c36_100 = arith.constant 36 : index
    %89 = vector.load %arg15[%c32_99, %c36_100] : memref<80x326xbf16, #tpu.memory_space<vmem>>, vector<16x288xbf16>
    %c384 = arith.constant 384 : index
    %c0_101 = arith.constant 0 : index
    %90 = vector.load %arg16[%c384, %c0_101] : memref<576x288xbf16, #tpu.memory_space<vmem>>, vector<16x288xbf16>
    tpu.vector_store %arg16[%c384, %c0_101], %89 {strides = array<i32>} : memref<576x288xbf16, #tpu.memory_space<vmem>>, vector<16x288xbf16>,
    %c32_102 = arith.constant 32 : index
    %c37_103 = arith.constant 37 : index
    %91 = vector.load %arg15[%c32_102, %c37_103] : memref<80x326xbf16, #tpu.memory_space<vmem>>, vector<16x288xbf16>
    %c400 = arith.constant 400 : index
    %c0_104 = arith.constant 0 : index
    %92 = vector.load %arg16[%c400, %c0_104] : memref<576x288xbf16, #tpu.memory_space<vmem>>, vector<16x288xbf16>
    tpu.vector_store %arg16[%c400, %c0_104], %91 {strides = array<i32>} : memref<576x288xbf16, #tpu.memory_space<vmem>>, vector<16x288xbf16>,
    %c32_105 = arith.constant 32 : index
    %c38_106 = arith.constant 38 : index
    %93 = vector.load %arg15[%c32_105, %c38_106] : memref<80x326xbf16, #tpu.memory_space<vmem>>, vector<16x288xbf16>
    %c416 = arith.constant 416 : index
    %c0_107 = arith.constant 0 : index
    %94 = vector.load %arg16[%c416, %c0_107] : memref<576x288xbf16, #tpu.memory_space<vmem>>, vector<16x288xbf16>
    tpu.vector_store %arg16[%c416, %c0_107], %93 {strides = array<i32>} : memref<576x288xbf16, #tpu.memory_space<vmem>>, vector<16x288xbf16>,
    %c0_108 = arith.constant 0 : index
    %c0_109 = arith.constant 0 : index
    %95 = vector.load %arg7[%c0_108, %c0_109] : memref<16x432xbf16, #tpu.memory_space<vmem>>, vector<16x432xbf16>
    %c0_110 = arith.constant 0 : index
    %c0_111 = arith.constant 0 : index
    %96 = vector.load %arg16[%c0_110, %c0_111] : memref<576x288xbf16, #tpu.memory_space<vmem>>, vector<432x288xbf16>
    %cst_112 = arith.constant dense<0.000000e+00> : vector<16x288xf32>
    %97 = tpu.matmul %95, %96, %cst_112 {dimension_numbers = #tpu.dot_dimension_numbers<[1], [0], [0], [1], [0, 0, 1, 1], [], []>} : vector<16x432xbf16>, vector<432x288xbf16>, vector<16x288xf32> -> vector<16x288xf32>
    %c0_113 = arith.constant 0 : index
    %c0_114 = arith.constant 0 : index
    %98 = vector.load %arg8[%c0_113, %c0_114] : memref<16x1xf32, #tpu.memory_space<vmem>>, vector<16x1xf32>
    %99 = vector.broadcast %98 : vector<16x1xf32> to vector<16x288xf32>
    %100 = arith.addf %97, %99 : vector<16x288xf32>
    %cst_115 = arith.constant 0.000000e+00 : f32
    %101 = vector.broadcast %cst_115 : f32 to vector<16x288xf32>
    %102 = arith.cmpf oge, %100, %101 : vector<16x288xf32>
    %cst_116 = arith.constant 2.000000e-01 : f32
    %103 = vector.broadcast %cst_116 : f32 to vector<16x288xf32>
    %104 = arith.mulf %103, %100 : vector<16x288xf32>
    %105 = arith.select %102, %100, %104 : vector<16x288xi1>, vector<16x288xf32>
    %106 = vector.broadcast %10 : vector<1x288xf32> to vector<16x288xf32>
    %107 = arith.mulf %105, %106 : vector<16x288xf32>
    %108 = arith.truncf %107 : vector<16x288xf32> to vector<16x288xbf16>
    %c48_117 = arith.constant 48 : index
    %c19_118 = arith.constant 19 : index
    %109 = vector.load %arg15[%c48_117, %c19_118] : memref<80x326xbf16, #tpu.memory_space<vmem>>, vector<16x288xbf16>
    tpu.vector_store %arg15[%c48_117, %c19_118], %108 {strides = array<i32>} : memref<80x326xbf16, #tpu.memory_space<vmem>>, vector<16x288xbf16>,
    %c48_119 = arith.constant 48 : index
    %c0_120 = arith.constant 0 : index
    %110 = vector.load %arg15[%c48_119, %c0_120] : memref<80x326xbf16, #tpu.memory_space<vmem>>, vector<16x288xbf16>
    %c432 = arith.constant 432 : index
    %c0_121 = arith.constant 0 : index
    %111 = vector.load %arg16[%c432, %c0_121] : memref<576x288xbf16, #tpu.memory_space<vmem>>, vector<16x288xbf16>
    tpu.vector_store %arg16[%c432, %c0_121], %110 {strides = array<i32>} : memref<576x288xbf16, #tpu.memory_space<vmem>>, vector<16x288xbf16>,
    %c48_122 = arith.constant 48 : index
    %c1_123 = arith.constant 1 : index
    %112 = vector.load %arg15[%c48_122, %c1_123] : memref<80x326xbf16, #tpu.memory_space<vmem>>, vector<16x288xbf16>
    %c448 = arith.constant 448 : index
    %c0_124 = arith.constant 0 : index
    %113 = vector.load %arg16[%c448, %c0_124] : memref<576x288xbf16, #tpu.memory_space<vmem>>, vector<16x288xbf16>
    tpu.vector_store %arg16[%c448, %c0_124], %112 {strides = array<i32>} : memref<576x288xbf16, #tpu.memory_space<vmem>>, vector<16x288xbf16>,
    %c48_125 = arith.constant 48 : index
    %c2_126 = arith.constant 2 : index
    %114 = vector.load %arg15[%c48_125, %c2_126] : memref<80x326xbf16, #tpu.memory_space<vmem>>, vector<16x288xbf16>
    %c464 = arith.constant 464 : index
    %c0_127 = arith.constant 0 : index
    %115 = vector.load %arg16[%c464, %c0_127] : memref<576x288xbf16, #tpu.memory_space<vmem>>, vector<16x288xbf16>
    tpu.vector_store %arg16[%c464, %c0_127], %114 {strides = array<i32>} : memref<576x288xbf16, #tpu.memory_space<vmem>>, vector<16x288xbf16>,
    %c48_128 = arith.constant 48 : index
    %c18_129 = arith.constant 18 : index
    %116 = vector.load %arg15[%c48_128, %c18_129] : memref<80x326xbf16, #tpu.memory_space<vmem>>, vector<16x288xbf16>
    %c480 = arith.constant 480 : index
    %c0_130 = arith.constant 0 : index
    %117 = vector.load %arg16[%c480, %c0_130] : memref<576x288xbf16, #tpu.memory_space<vmem>>, vector<16x288xbf16>
    tpu.vector_store %arg16[%c480, %c0_130], %116 {strides = array<i32>} : memref<576x288xbf16, #tpu.memory_space<vmem>>, vector<16x288xbf16>,
    %c48_131 = arith.constant 48 : index
    %c19_132 = arith.constant 19 : index
    %118 = vector.load %arg15[%c48_131, %c19_132] : memref<80x326xbf16, #tpu.memory_space<vmem>>, vector<16x288xbf16>
    %c496 = arith.constant 496 : index
    %c0_133 = arith.constant 0 : index
    %119 = vector.load %arg16[%c496, %c0_133] : memref<576x288xbf16, #tpu.memory_space<vmem>>, vector<16x288xbf16>
    tpu.vector_store %arg16[%c496, %c0_133], %118 {strides = array<i32>} : memref<576x288xbf16, #tpu.memory_space<vmem>>, vector<16x288xbf16>,
    %c48_134 = arith.constant 48 : index
    %c20_135 = arith.constant 20 : index
    %120 = vector.load %arg15[%c48_134, %c20_135] : memref<80x326xbf16, #tpu.memory_space<vmem>>, vector<16x288xbf16>
    %c512 = arith.constant 512 : index
    %c0_136 = arith.constant 0 : index
    %121 = vector.load %arg16[%c512, %c0_136] : memref<576x288xbf16, #tpu.memory_space<vmem>>, vector<16x288xbf16>
    tpu.vector_store %arg16[%c512, %c0_136], %120 {strides = array<i32>} : memref<576x288xbf16, #tpu.memory_space<vmem>>, vector<16x288xbf16>,
    %c48_137 = arith.constant 48 : index
    %c36_138 = arith.constant 36 : index
    %122 = vector.load %arg15[%c48_137, %c36_138] : memref<80x326xbf16, #tpu.memory_space<vmem>>, vector<16x288xbf16>
    %c528 = arith.constant 528 : index
    %c0_139 = arith.constant 0 : index
    %123 = vector.load %arg16[%c528, %c0_139] : memref<576x288xbf16, #tpu.memory_space<vmem>>, vector<16x288xbf16>
    tpu.vector_store %arg16[%c528, %c0_139], %122 {strides = array<i32>} : memref<576x288xbf16, #tpu.memory_space<vmem>>, vector<16x288xbf16>,
    %c48_140 = arith.constant 48 : index
    %c37_141 = arith.constant 37 : index
    %124 = vector.load %arg15[%c48_140, %c37_141] : memref<80x326xbf16, #tpu.memory_space<vmem>>, vector<16x288xbf16>
    %c544 = arith.constant 544 : index
    %c0_142 = arith.constant 0 : index
    %125 = vector.load %arg16[%c544, %c0_142] : memref<576x288xbf16, #tpu.memory_space<vmem>>, vector<16x288xbf16>
    tpu.vector_store %arg16[%c544, %c0_142], %124 {strides = array<i32>} : memref<576x288xbf16, #tpu.memory_space<vmem>>, vector<16x288xbf16>,
    %c48_143 = arith.constant 48 : index
    %c38_144 = arith.constant 38 : index
    %126 = vector.load %arg15[%c48_143, %c38_144] : memref<80x326xbf16, #tpu.memory_space<vmem>>, vector<16x288xbf16>
    %c560 = arith.constant 560 : index
    %c0_145 = arith.constant 0 : index
    %127 = vector.load %arg16[%c560, %c0_145] : memref<576x288xbf16, #tpu.memory_space<vmem>>, vector<16x288xbf16>
    tpu.vector_store %arg16[%c560, %c0_145], %126 {strides = array<i32>} : memref<576x288xbf16, #tpu.memory_space<vmem>>, vector<16x288xbf16>,
    %c0_146 = arith.constant 0 : index
    %c0_147 = arith.constant 0 : index
    %128 = vector.load %arg9[%c0_146, %c0_147] : memref<16x576xbf16, #tpu.memory_space<vmem>>, vector<16x576xbf16>
    %c0_148 = arith.constant 0 : index
    %c0_149 = arith.constant 0 : index
    %129 = vector.load %arg16[%c0_148, %c0_149] : memref<576x288xbf16, #tpu.memory_space<vmem>>, vector<576x288xbf16>
    %cst_150 = arith.constant dense<0.000000e+00> : vector<16x288xf32>
    %130 = tpu.matmul %128, %129, %cst_150 {dimension_numbers = #tpu.dot_dimension_numbers<[1], [0], [0], [1], [0, 0, 1, 1], [], []>} : vector<16x576xbf16>, vector<576x288xbf16>, vector<16x288xf32> -> vector<16x288xf32>
    %c0_151 = arith.constant 0 : index
    %c0_152 = arith.constant 0 : index
    %131 = vector.load %arg10[%c0_151, %c0_152] : memref<16x1xf32, #tpu.memory_space<vmem>>, vector<16x1xf32>
    %132 = vector.broadcast %131 : vector<16x1xf32> to vector<16x288xf32>
    %133 = arith.addf %130, %132 : vector<16x288xf32>
    %cst_153 = arith.constant 0.000000e+00 : f32
    %134 = vector.broadcast %cst_153 : f32 to vector<16x288xf32>
    %135 = arith.cmpf oge, %133, %134 : vector<16x288xf32>
    %cst_154 = arith.constant 2.000000e-01 : f32
    %136 = vector.broadcast %cst_154 : f32 to vector<16x288xf32>
    %137 = arith.mulf %136, %133 : vector<16x288xf32>
    %138 = arith.select %135, %133, %137 : vector<16x288xi1>, vector<16x288xf32>
    %139 = vector.broadcast %10 : vector<1x288xf32> to vector<16x288xf32>
    %140 = arith.mulf %138, %139 : vector<16x288xf32>
    %141 = arith.truncf %140 : vector<16x288xf32> to vector<16x288xbf16>
    %c64_155 = arith.constant 64 : index
    %c19_156 = arith.constant 19 : index
    %142 = vector.load %arg15[%c64_155, %c19_156] : memref<80x326xbf16, #tpu.memory_space<vmem>>, vector<16x288xbf16>
    tpu.vector_store %arg15[%c64_155, %c19_156], %141 {strides = array<i32>} : memref<80x326xbf16, #tpu.memory_space<vmem>>, vector<16x288xbf16>,
    %c0_157 = arith.constant 0 : index
    %c0_158 = arith.constant 0 : index
    %143 = vector.load %arg11[%c0_157, %c0_158] : memref<16x576xbf16, #tpu.memory_space<vmem>>, vector<16x576xbf16>
    %c0_159 = arith.constant 0 : index
    %c0_160 = arith.constant 0 : index
    %144 = vector.load %arg16[%c0_159, %c0_160] : memref<576x288xbf16, #tpu.memory_space<vmem>>, vector<576x288xbf16>
    %cst_161 = arith.constant dense<0.000000e+00> : vector<16x288xf32>
    %145 = tpu.matmul %143, %144, %cst_161 {dimension_numbers = #tpu.dot_dimension_numbers<[1], [0], [0], [1], [0, 0, 1, 1], [], []>} : vector<16x576xbf16>, vector<576x288xbf16>, vector<16x288xf32> -> vector<16x288xf32>
    %c0_162 = arith.constant 0 : index
    %c0_163 = arith.constant 0 : index
    %c0_164 = arith.constant 0 : index
    %146 = vector.load %arg12[%c0_162, %c0_163, %c0_164] : memref<9x16x16xbf16, #tpu.memory_space<vmem>>, vector<1x16x16xbf16>
    %147 = vector.shape_cast %146 : vector<1x16x16xbf16> to vector<16x16xbf16>
    %c64_165 = arith.constant 64 : index
    %c0_166 = arith.constant 0 : index
    %148 = vector.load %arg15[%c64_165, %c0_166] : memref<80x326xbf16, #tpu.memory_space<vmem>>, vector<16x288xbf16>
    %cst_167 = arith.constant dense<0.000000e+00> : vector<16x288xf32>
    %149 = tpu.matmul %147, %148, %cst_167 {dimension_numbers = #tpu.dot_dimension_numbers<[1], [0], [0], [1], [0, 0, 1, 1], [], []>} : vector<16x16xbf16>, vector<16x288xbf16>, vector<16x288xf32> -> vector<16x288xf32>
    %150 = arith.addf %145, %149 : vector<16x288xf32>
    %c1_168 = arith.constant 1 : index
    %c0_169 = arith.constant 0 : index
    %c0_170 = arith.constant 0 : index
    %151 = vector.load %arg12[%c1_168, %c0_169, %c0_170] : memref<9x16x16xbf16, #tpu.memory_space<vmem>>, vector<1x16x16xbf16>
    %152 = vector.shape_cast %151 : vector<1x16x16xbf16> to vector<16x16xbf16>
    %c64_171 = arith.constant 64 : index
    %c1_172 = arith.constant 1 : index
    %153 = vector.load %arg15[%c64_171, %c1_172] : memref<80x326xbf16, #tpu.memory_space<vmem>>, vector<16x288xbf16>
    %cst_173 = arith.constant dense<0.000000e+00> : vector<16x288xf32>
    %154 = tpu.matmul %152, %153, %cst_173 {dimension_numbers = #tpu.dot_dimension_numbers<[1], [0], [0], [1], [0, 0, 1, 1], [], []>} : vector<16x16xbf16>, vector<16x288xbf16>, vector<16x288xf32> -> vector<16x288xf32>
    %155 = arith.addf %150, %154 : vector<16x288xf32>
    %c2_174 = arith.constant 2 : index
    %c0_175 = arith.constant 0 : index
    %c0_176 = arith.constant 0 : index
    %156 = vector.load %arg12[%c2_174, %c0_175, %c0_176] : memref<9x16x16xbf16, #tpu.memory_space<vmem>>, vector<1x16x16xbf16>
    %157 = vector.shape_cast %156 : vector<1x16x16xbf16> to vector<16x16xbf16>
    %c64_177 = arith.constant 64 : index
    %c2_178 = arith.constant 2 : index
    %158 = vector.load %arg15[%c64_177, %c2_178] : memref<80x326xbf16, #tpu.memory_space<vmem>>, vector<16x288xbf16>
    %cst_179 = arith.constant dense<0.000000e+00> : vector<16x288xf32>
    %159 = tpu.matmul %157, %158, %cst_179 {dimension_numbers = #tpu.dot_dimension_numbers<[1], [0], [0], [1], [0, 0, 1, 1], [], []>} : vector<16x16xbf16>, vector<16x288xbf16>, vector<16x288xf32> -> vector<16x288xf32>
    %160 = arith.addf %155, %159 : vector<16x288xf32>
    %c3 = arith.constant 3 : index
    %c0_180 = arith.constant 0 : index
    %c0_181 = arith.constant 0 : index
    %161 = vector.load %arg12[%c3, %c0_180, %c0_181] : memref<9x16x16xbf16, #tpu.memory_space<vmem>>, vector<1x16x16xbf16>
    %162 = vector.shape_cast %161 : vector<1x16x16xbf16> to vector<16x16xbf16>
    %c64_182 = arith.constant 64 : index
    %c18_183 = arith.constant 18 : index
    %163 = vector.load %arg15[%c64_182, %c18_183] : memref<80x326xbf16, #tpu.memory_space<vmem>>, vector<16x288xbf16>
    %cst_184 = arith.constant dense<0.000000e+00> : vector<16x288xf32>
    %164 = tpu.matmul %162, %163, %cst_184 {dimension_numbers = #tpu.dot_dimension_numbers<[1], [0], [0], [1], [0, 0, 1, 1], [], []>} : vector<16x16xbf16>, vector<16x288xbf16>, vector<16x288xf32> -> vector<16x288xf32>
    %165 = arith.addf %160, %164 : vector<16x288xf32>
    %c4 = arith.constant 4 : index
    %c0_185 = arith.constant 0 : index
    %c0_186 = arith.constant 0 : index
    %166 = vector.load %arg12[%c4, %c0_185, %c0_186] : memref<9x16x16xbf16, #tpu.memory_space<vmem>>, vector<1x16x16xbf16>
    %167 = vector.shape_cast %166 : vector<1x16x16xbf16> to vector<16x16xbf16>
    %c64_187 = arith.constant 64 : index
    %c19_188 = arith.constant 19 : index
    %168 = vector.load %arg15[%c64_187, %c19_188] : memref<80x326xbf16, #tpu.memory_space<vmem>>, vector<16x288xbf16>
    %cst_189 = arith.constant dense<0.000000e+00> : vector<16x288xf32>
    %169 = tpu.matmul %167, %168, %cst_189 {dimension_numbers = #tpu.dot_dimension_numbers<[1], [0], [0], [1], [0, 0, 1, 1], [], []>} : vector<16x16xbf16>, vector<16x288xbf16>, vector<16x288xf32> -> vector<16x288xf32>
    %170 = arith.addf %165, %169 : vector<16x288xf32>
    %c5 = arith.constant 5 : index
    %c0_190 = arith.constant 0 : index
    %c0_191 = arith.constant 0 : index
    %171 = vector.load %arg12[%c5, %c0_190, %c0_191] : memref<9x16x16xbf16, #tpu.memory_space<vmem>>, vector<1x16x16xbf16>
    %172 = vector.shape_cast %171 : vector<1x16x16xbf16> to vector<16x16xbf16>
    %c64_192 = arith.constant 64 : index
    %c20_193 = arith.constant 20 : index
    %173 = vector.load %arg15[%c64_192, %c20_193] : memref<80x326xbf16, #tpu.memory_space<vmem>>, vector<16x288xbf16>
    %cst_194 = arith.constant dense<0.000000e+00> : vector<16x288xf32>
    %174 = tpu.matmul %172, %173, %cst_194 {dimension_numbers = #tpu.dot_dimension_numbers<[1], [0], [0], [1], [0, 0, 1, 1], [], []>} : vector<16x16xbf16>, vector<16x288xbf16>, vector<16x288xf32> -> vector<16x288xf32>
    %175 = arith.addf %170, %174 : vector<16x288xf32>
    %c6 = arith.constant 6 : index
    %c0_195 = arith.constant 0 : index
    %c0_196 = arith.constant 0 : index
    %176 = vector.load %arg12[%c6, %c0_195, %c0_196] : memref<9x16x16xbf16, #tpu.memory_space<vmem>>, vector<1x16x16xbf16>
    %177 = vector.shape_cast %176 : vector<1x16x16xbf16> to vector<16x16xbf16>
    %c64_197 = arith.constant 64 : index
    %c36_198 = arith.constant 36 : index
    %178 = vector.load %arg15[%c64_197, %c36_198] : memref<80x326xbf16, #tpu.memory_space<vmem>>, vector<16x288xbf16>
    %cst_199 = arith.constant dense<0.000000e+00> : vector<16x288xf32>
    %179 = tpu.matmul %177, %178, %cst_199 {dimension_numbers = #tpu.dot_dimension_numbers<[1], [0], [0], [1], [0, 0, 1, 1], [], []>} : vector<16x16xbf16>, vector<16x288xbf16>, vector<16x288xf32> -> vector<16x288xf32>
    %180 = arith.addf %175, %179 : vector<16x288xf32>
    %c7 = arith.constant 7 : index
    %c0_200 = arith.constant 0 : index
    %c0_201 = arith.constant 0 : index
    %181 = vector.load %arg12[%c7, %c0_200, %c0_201] : memref<9x16x16xbf16, #tpu.memory_space<vmem>>, vector<1x16x16xbf16>
    %182 = vector.shape_cast %181 : vector<1x16x16xbf16> to vector<16x16xbf16>
    %c64_202 = arith.constant 64 : index
    %c37_203 = arith.constant 37 : index
    %183 = vector.load %arg15[%c64_202, %c37_203] : memref<80x326xbf16, #tpu.memory_space<vmem>>, vector<16x288xbf16>
    %cst_204 = arith.constant dense<0.000000e+00> : vector<16x288xf32>
    %184 = tpu.matmul %182, %183, %cst_204 {dimension_numbers = #tpu.dot_dimension_numbers<[1], [0], [0], [1], [0, 0, 1, 1], [], []>} : vector<16x16xbf16>, vector<16x288xbf16>, vector<16x288xf32> -> vector<16x288xf32>
    %185 = arith.addf %180, %184 : vector<16x288xf32>
    %c8 = arith.constant 8 : index
    %c0_205 = arith.constant 0 : index
    %c0_206 = arith.constant 0 : index
    %186 = vector.load %arg12[%c8, %c0_205, %c0_206] : memref<9x16x16xbf16, #tpu.memory_space<vmem>>, vector<1x16x16xbf16>
    %187 = vector.shape_cast %186 : vector<1x16x16xbf16> to vector<16x16xbf16>
    %c64_207 = arith.constant 64 : index
    %c38_208 = arith.constant 38 : index
    %188 = vector.load %arg15[%c64_207, %c38_208] : memref<80x326xbf16, #tpu.memory_space<vmem>>, vector<16x288xbf16>
    %cst_209 = arith.constant dense<0.000000e+00> : vector<16x288xf32>
    %189 = tpu.matmul %187, %188, %cst_209 {dimension_numbers = #tpu.dot_dimension_numbers<[1], [0], [0], [1], [0, 0, 1, 1], [], []>} : vector<16x16xbf16>, vector<16x288xbf16>, vector<16x288xf32> -> vector<16x288xf32>
    %190 = arith.addf %185, %189 : vector<16x288xf32>
    %c0_210 = arith.constant 0 : index
    %c0_211 = arith.constant 0 : index
    %191 = vector.load %arg13[%c0_210, %c0_211] : memref<16x1xf32, #tpu.memory_space<vmem>>, vector<16x1xf32>
    %192 = vector.broadcast %191 : vector<16x1xf32> to vector<16x288xf32>
    %193 = arith.addf %190, %192 : vector<16x288xf32>
    %194 = vector.extract_strided_slice %1 {offsets = [0, 19], sizes = [16, 288], strides = [1, 1]} : vector<16x324xf32> to vector<16x288xf32>
    %195 = arith.addf %193, %194 : vector<16x288xf32>
    %c0_212 = arith.constant 0 : index
    %c0_213 = arith.constant 0 : index
    %c0_214 = arith.constant 0 : index
    %196 = vector.load %arg14[%c0_212, %c0_213, %c0_214] : memref<1x16x288xf32, #tpu.memory_space<vmem>>, vector<1x16x288xf32>
    %197 = vector.shape_cast %196 : vector<1x16x288xf32> to vector<16x288xf32>
    %198 = vector.shape_cast %195 : vector<16x288xf32> to vector<1x16x288xf32>
    tpu.vector_store %arg14[%c0_212, %c0_213, %c0_214], %198 {strides = array<i32>} : memref<1x16x288xf32, #tpu.memory_space<vmem>>, vector<1x16x288xf32>,
    return
  }
  func.func @transform_0(%arg0: i32) -> (i32, i32, i32) {
    %c0_i32 = arith.constant 0 : i32
    %c0_i32_0 = arith.constant 0 : i32
    %c0_i32_1 = arith.constant 0 : i32
    return %arg0, %c0_i32, %c0_i32_0 : i32, i32, i32
  }
  func.func @transform_1(%arg0: i32) -> (i32, i32) {
    %c0_i32 = arith.constant 0 : i32
    %c0_i32_0 = arith.constant 0 : i32
    %c0_i32_1 = arith.constant 0 : i32
    return %c0_i32, %c0_i32_0 : i32, i32
  }
  func.func @transform_2(%arg0: i32) -> (i32, i32) {
    %c0_i32 = arith.constant 0 : i32
    %c0_i32_0 = arith.constant 0 : i32
    %c0_i32_1 = arith.constant 0 : i32
    return %c0_i32, %c0_i32_0 : i32, i32
  }
  func.func @transform_3(%arg0: i32) -> (i32, i32) {
    %c0_i32 = arith.constant 0 : i32
    %c0_i32_0 = arith.constant 0 : i32
    %c0_i32_1 = arith.constant 0 : i32
    return %c0_i32, %c0_i32_0 : i32, i32
  }
  func.func @transform_4(%arg0: i32) -> (i32, i32) {
    %c0_i32 = arith.constant 0 : i32
    %c0_i32_0 = arith.constant 0 : i32
    %c0_i32_1 = arith.constant 0 : i32
    return %c0_i32, %c0_i32_0 : i32, i32
  }
  func.func @transform_5(%arg0: i32) -> (i32, i32) {
    %c0_i32 = arith.constant 0 : i32
    %c0_i32_0 = arith.constant 0 : i32
    %c0_i32_1 = arith.constant 0 : i32
    return %c0_i32, %c0_i32_0 : i32, i32
  }
  func.func @transform_6(%arg0: i32) -> (i32, i32) {
    %c0_i32 = arith.constant 0 : i32
    %c0_i32_0 = arith.constant 0 : i32
    %c0_i32_1 = arith.constant 0 : i32
    return %c0_i32, %c0_i32_0 : i32, i32
  }
  func.func @transform_7(%arg0: i32) -> (i32, i32) {
    %c0_i32 = arith.constant 0 : i32
    %c0_i32_0 = arith.constant 0 : i32
    %c0_i32_1 = arith.constant 0 : i32
    return %c0_i32, %c0_i32_0 : i32, i32
  }
  func.func @transform_8(%arg0: i32) -> (i32, i32) {
    %c0_i32 = arith.constant 0 : i32
    %c0_i32_0 = arith.constant 0 : i32
    %c0_i32_1 = arith.constant 0 : i32
    return %c0_i32, %c0_i32_0 : i32, i32
  }
  func.func @transform_9(%arg0: i32) -> (i32, i32) {
    %c0_i32 = arith.constant 0 : i32
    %c0_i32_0 = arith.constant 0 : i32
    %c0_i32_1 = arith.constant 0 : i32
    return %c0_i32, %c0_i32_0 : i32, i32
  }
  func.func @transform_10(%arg0: i32) -> (i32, i32) {
    %c0_i32 = arith.constant 0 : i32
    %c0_i32_0 = arith.constant 0 : i32
    %c0_i32_1 = arith.constant 0 : i32
    return %c0_i32, %c0_i32_0 : i32, i32
  }
  func.func @transform_11(%arg0: i32) -> (i32, i32, i32) {
    %c0_i32 = arith.constant 0 : i32
    %c0_i32_0 = arith.constant 0 : i32
    %c0_i32_1 = arith.constant 0 : i32
    %c0_i32_2 = arith.constant 0 : i32
    return %c0_i32, %c0_i32_0, %c0_i32_1 : i32, i32, i32
  }
  func.func @transform_12(%arg0: i32) -> (i32, i32) {
    %c0_i32 = arith.constant 0 : i32
    %c0_i32_0 = arith.constant 0 : i32
    %c0_i32_1 = arith.constant 0 : i32
    return %c0_i32, %c0_i32_0 : i32, i32
  }
  func.func @transform_13(%arg0: i32) -> (i32, i32, i32) {
    %c0_i32 = arith.constant 0 : i32
    %c0_i32_0 = arith.constant 0 : i32
    %c0_i32_1 = arith.constant 0 : i32
    return %arg0, %c0_i32, %c0_i32_0 : i32, i32, i32
  }
}

</mosaic_0001>

<bundles_post_ra>
// kernel: residual_dense_block.1
= control target key start
LH: loop header
LB: loop body
LE: loop exit
PB: predicated region body
PF: predicated region fallthrough
CT: control target
= control target key end

     0   :  { %s7800_s25 = smov 0   ;;  %s9134_s0 = inlined_call_operand.vmem [shape: f32[2,16,324], index: 0, kind: input, shape index: {}]   ;;  %s9135_s1 = inlined_call_operand.vmem [shape: f32[1,288], index: 1, kind: input, shape index: {}]   ;;  %s9136_s2 = inlined_call_operand.vmem [shape: bf16[16,144], index: 2, kind: input, shape index: {}]   ;;  %s9137_s3 = inlined_call_operand.vmem [shape: f32[16,1], index: 3, kind: input, shape index: {}]   ;;  %s9138_s4 = inlined_call_operand.vmem [shape: bf16[16,288], index: 4, kind: input, shape index: {}]   ;;  %s9139_s5 = inlined_call_operand.vmem [shape: f32[16,1], index: 5, kind: input, shape index: {}]   ;;  %s9140_s6 = inlined_call_operand.vmem [shape: bf16[16,432], index: 6, kind: input, shape index: {}]   ;;  %s9141_s7 = inlined_call_operand.vmem [shape: f32[16,1], index: 7, kind: input, shape index: {}]   ;;  %s9142_s8 = inlined_call_operand.vmem [shape: bf16[16,576], index: 8, kind: input, shape index: {}]   ;;  %s9143_s9 = inlined_call_operand.vmem [shape: f32[16,1], index: 9, kind: input, shape index: {}]   ;;  %s9144_s10 = inlined_call_operand.vmem [shape: bf16[16,576], index: 10, kind: input, shape index: {}]   ;;  %s9145_s11 = inlined_call_operand.vmem [shape: bf16[9,16,16], index: 11, kind: input, shape index: {}]   ;;  %s9146_s12 = inlined_call_operand.vmem [shape: f32[16,1], index: 12, kind: input, shape index: {}]   ;;  %s9147_s13 = inlined_call_operand.vmem [shape: f32[2,16,288], index: 13, kind: output, shape index: {}]  }
   0x1 LB: > { %s6580_s26 = sadd.s32 4294967295, %s7716_s25   ;;  %p6584_p0 = scmp.ge.s32.totalorder %s7716_s25, 1  ;;  %s7716_s25 = sphi %s7800_s25, %s23_s25  }
   0x2   : > { %p387_p1 = scmp.lt.s32.totalorder %s7716_s25, 3 }
   0x4   : > { %p388_p2 = pnand %p6584_p0, %p387_p1 }
   0x6   : > { %391 = sbr.rel (%p388_p2) target bundleno = 2574 (0xa0e), region = 72 }
   0xb   : > { %p431_p3 = scmp.lt.s32.totalorder %s6580_s26, 1  ;;  %v7718_v0 = vmov 0   ;;  %vm469_vm0 = vcmask 551936   ;;  %vm473_vm1 = vcmask 568864   ;;  %s7719_s14 = smov 91   ;;  %vm500_vm2 = vcmask 257024  }
   0xc   : > { %1019 = vmatprep.subr.bf16.mxu1 %v7718_v0  ;;  %7352 = vset.pattern.permute.xlu0 %v7718_v0  ;;  %s9149_s15 = smov 92   ;;  %s9156_s16 = smov 108   ;;  %v7365_v30 = vld [vmem:[%s9136_s2 + $0x4] ss:$8 sps:$4 sm:$0xff]   ;;  %vm9152_vm3 = vcmask 130048   ;;  %vm524_vm4 = vcmask 1043456  }
   0xd   : > { %s9197_s26 = smov (!%p431_p3, %s6580_s26), 1  ;;  %7353 = vset.pattern.permute.xlu1 %v7718_v0  ;;  %s7722_s17 = smov 109   ;;  %6620 = vmatprep.mubr.msk.bf16.mxu0 %vm9152_vm3, %v7365_v30  ;;  %v807_v32 = vld [vmem:[%s9137_s3] sm:$0xff]  ;;  %v808_v33 = vld [vmem:[%s9137_s3 + $0x8] sm:$0xff]  ;;  %vm724_vm5 = vcmask 744448   ;;  %vm9155_vm6 = vcmask 752640  }
   0xe   : > { %s9148_s27 = smul.u32 48, %s9197_s26  ;;  %s7723_s18 = smov 110   ;;  %6621 = vmatprep.mubr.msk.bf16.mxu1 %vm9152_vm3, %v7365_v30  ;;  %vm658_vm7 = vcmask 883712   ;;  %vm625_vm8 = vcmask 891904   ;;  %vm592_vm9 = vcmask 900096   ;;  %vm559_vm10 = vcmask 1031168  }
   0xf   : > { %s7724_s19 = smov 126   ;;  %s7725_s20 = smov 127   ;;  %vm526_vm11 = vcmask 1039360   ;;  %vm757_vm12 = vcmask 736256   ;;  %vm476_vm13 = vcmask 150528   ;;  %vm485_vm15 = vcmask 568728  }
  0x10   : > { %s7819_s30 = scalar_lea.vmem %s9134_s0, %s9148_s27  ;;  %s7726_s21 = smov 90   ;;  %477 = vst.msk [vmem:[#allocation2 + $0x18] sm:$0xf] %vm476_vm13, %v7718_v0  ;;  %478 = vst.msk [vmem:[#allocation2 + $0x24] sm:$0xf] %vm476_vm13, %v7718_v0 }
  0x11   : > { %v7822_v1 = vld [vmem:[%s7819_s30 + $0x18] sm:$0xff]  ;;  %v7825_v2 = vld [vmem:[%s7819_s30 + $0x20] sm:$0xff]  ;;  %v7835_v5 = vld [vmem:[%s7819_s30 + $0x8] sm:$0xff]  ;;  %479 = vst.msk [vmem:[#allocation2 + $0x30] sm:$0xf] %vm476_vm13, %v7718_v0  ;;  %s7727_s22 = smov 19  }
  0x12   : > { %v7828_v3 = vld [vmem:[%s7819_s30] sm:$0xff]  ;;  %v7832_v4 = vpack.c.bf16 %v7825_v2, %v7822_v1  ;;  %v447_v6 = vld [vmem:[%s7819_s30 + $0x28] sm:$0xff]  ;;  %v444_v7 = vld [vmem:[%s7819_s30 + $0x10] sm:$0xff]  ;;  %v7891_v26 = vpack.c.bf16 %v7825_v2, %v7835_v5  ;;  %480 = vst.msk [vmem:[#allocation2 + $0x3c] sm:$0xf] %vm476_vm13, %v7718_v0  ;;  %s9160_s23 = smov 92  }
  0x13   : > { %v7841_v8 = vpack.c.bf16 %v7835_v5, %v7828_v3  ;;  %v7065_v9 = vpack.c.bf16 %v447_v6, %v447_v6  ;;  %v7063_v10 = vpack.c.bf16 %v444_v7, %v444_v7  ;;  %v7896_v27 = vpack.c.bf16 %v7822_v1, %v7828_v3  ;;  %481 = vst.msk [vmem:[#allocation2 + $0x48] sm:$0xf] %vm476_vm13, %v7718_v0 }
  0x14   : > { %715 = vrot.lane.b32.xlu1 %v7832_v4, %s7719_s14  ;;  %502 = vst [vmem:[#allocation3 + $0xc] sm:$0xff] %v7832_v4  ;;  %482 = vst.msk [vmem:[#allocation2 + $0x54] sm:$0xf] %vm476_vm13, %v7718_v0 }
  0x15   : > { %711 = vrot.lane.b32.xlu0 %v7841_v8, %s7719_s14  ;;  %472 = vst.msk [vmem:[#allocation2 + $0x14] sm:$0xf] %vm469_vm0, %v7065_v9  ;;  %470 = vst.msk [vmem:[#allocation2 + $0x8] sm:$0xf] %vm469_vm0, %v7063_v10 }
  0x16   : > { %499 = vst [vmem:[#allocation3] sm:$0xff] %v7841_v8  ;;  %475 = vst.msk [vmem:[#allocation2 + $0x14] sm:$0xf] %vm473_vm1, %v7718_v0 }
  0x17   : > { %474 = vst.msk [vmem:[#allocation2 + $0x8] sm:$0xf] %vm473_vm1, %v7718_v0 }
  0x18   : > { %483 = vst.msk [vmem:[#allocation2 + $0x60] sm:$0xf] %vm476_vm13, %v7718_v0  ;;  %484 = vst.msk [vmem:[#allocation2 + $0x6c] sm:$0xf] %vm476_vm13, %v7718_v0 }
  0x19   : > { %678 = vrot.lane.b32.xlu0 %v7841_v8, %s9149_s15  ;;  %486 = vst.msk [vmem:[#allocation2 + $0x20] sm:$0xf] %vm485_vm15, %v7718_v0  ;;  %487 = vst.msk [vmem:[#allocation2 + $0x2c] sm:$0xf] %vm485_vm15, %v7718_v0 }
  0x1a   : > { %488 = vst.msk [vmem:[#allocation2 + $0x38] sm:$0xf] %vm485_vm15, %v7718_v0  ;;  %489 = vst.msk [vmem:[#allocation2 + $0x44] sm:$0xf] %vm485_vm15, %v7718_v0 }
  0x1b   : > { %490 = vst.msk [vmem:[#allocation2 + $0x50] sm:$0xf] %vm485_vm15, %v7718_v0  ;;  %491 = vst.msk [vmem:[#allocation2 + $0x5c] sm:$0xf] %vm485_vm15, %v7718_v0 }
  0x1c   : > { %492 = vst.msk [vmem:[#allocation2 + $0x68] sm:$0xf] %vm485_vm15, %v7718_v0  ;;  %493 = vst.msk [vmem:[#allocation2 + $0x74] sm:$0xf] %vm485_vm15, %v7718_v0 }
  0x1d   : > { %v706_v11 = vld [vmem:[#allocation2 + $0x14] sm:$0xf]  ;;  %682 = vrot.lane.b32.xlu0 %v7832_v4, %s9149_s15 }
  0x1e   : > { %717 = vrot.lane.b32.xlu1 %v706_v11, %s7719_s14  ;;  %v671_v12 = vld [vmem:[#allocation2 + $0x8] sm:$0xf]  ;;  %v673_v14 = vld [vmem:[#allocation2 + $0x14] sm:$0xf] }
  0x1f   : > { %v704_v13 = vld [vmem:[#allocation2 + $0x8] sm:$0xf]  ;;  %v640_v16 = vld [vmem:[#allocation2 + $0x14] sm:$0xf] }
  0x20   : > { %v638_v15 = vld [vmem:[#allocation2 + $0x8] sm:$0xf]  ;;  %v607_v18 = vld [vmem:[#allocation2 + $0x14] sm:$0xf] }
  0x21   : > { %645 = vrot.lane.b32.xlu0 %v7841_v8, %s9156_s16  ;;  %v605_v17 = vld [vmem:[#allocation2 + $0x8] sm:$0xf]  ;;  %v574_v20 = vld [vmem:[#allocation2 + $0x14] sm:$0xf] }
  0x22   : > { %680 = vrot.lane.b32.xlu1 %v671_v12, %s9149_s15  ;;  %v572_v19 = vld [vmem:[#allocation2 + $0x8] sm:$0xf]  ;;  %v541_v22 = vld [vmem:[#allocation2 + $0x14] sm:$0xf] }
  0x23   : > { %v539_v21 = vld [vmem:[#allocation2 + $0x8] sm:$0xf]  ;;  %v498_v24 = vld [vmem:[#allocation2 + $0x14] sm:$0xf] }
  0x24   : > { %v496_v23 = vld [vmem:[#allocation2 + $0x8] sm:$0xf]  ;;  %503 = vst.msk [vmem:[#allocation3 + $0x14] sm:$0xf] %vm500_vm2, %v498_v24  ;;  %v507_v28 = vld [vmem:[#allocation2 + $0x14] sm:$0xf] }
  0x25   : > { %713 = vrot.lane.b32.xlu0 %v704_v13, %s7719_s14  ;;  %501 = vst.msk [vmem:[#allocation3 + $0x8] sm:$0xf] %vm500_vm2, %v496_v23  ;;  %v505_v25 = vld [vmem:[#allocation2 + $0x8] sm:$0xf]  ;;  %v739_v31 = vld [vmem:[#allocation2 + $0x14] sm:$0xf] }
  0x26   : > { %684 = vrot.lane.b32.xlu1 %v673_v14, %s9149_s15  ;;  %v737_v29 = vld [vmem:[#allocation2 + $0x8] sm:$0xf] }
  0x29   : > { %649 = vrot.lane.b32.xlu0 %v7832_v4, %s9156_s16 }
  0x2a   : > { %647 = vrot.lane.b32.xlu1 %v638_v15, %s9156_s16 }
  0x2d   : > { %612 = vrot.lane.b32.xlu0 %v7841_v8, %s7722_s17 }
  0x2e   : > { %651 = vrot.lane.b32.xlu1 %v640_v16, %s9156_s16 }
  0x31   : > { %616 = vrot.lane.b32.xlu0 %v7832_v4, %s7722_s17 }
  0x32   : > { %614 = vrot.lane.b32.xlu1 %v605_v17, %s7722_s17 }
  0x35   : > { %579 = vrot.lane.b32.xlu0 %v7841_v8, %s7723_s18 }
  0x36   : > { %618 = vrot.lane.b32.xlu1 %v607_v18, %s7722_s17 }
  0x39   : > { %583 = vrot.lane.b32.xlu0 %v7832_v4, %s7723_s18 }
  0x3a   : > { %581 = vrot.lane.b32.xlu1 %v572_v19, %s7723_s18 }
  0x3d   : > { %546 = vrot.lane.b32.xlu0 %v7841_v8, %s7724_s19 }
  0x3e   : > { %585 = vrot.lane.b32.xlu1 %v574_v20, %s7723_s18 }
  0x41   : > { %550 = vrot.lane.b32.xlu0 %v7832_v4, %s7724_s19 }
  0x42   : > { %548 = vrot.lane.b32.xlu1 %v539_v21, %s7724_s19 }
  0x45   : > { %512 = vrot.lane.b32.xlu0 %v7841_v8, %s7725_s20 }
  0x46   : > { %552 = vrot.lane.b32.xlu1 %v541_v22, %s7724_s19 }
  0x49   : > { %516 = vrot.lane.b32.xlu0 %v7832_v4, %s7725_s20 }
  0x4a   : > { %514 = vrot.lane.b32.xlu1 %v505_v25, %s7725_s20 }
  0x4d   : > { %744 = vrot.lane.b32.xlu0 %v7841_v8, %s7726_s21 }
  0x4e   : > { %518 = vrot.lane.b32.xlu1 %v507_v28, %s7725_s20 }
  0x51   : > { %748 = vrot.lane.b32.xlu0 %v7832_v4, %s7726_s21 }
  0x52   : > { %746 = vrot.lane.b32.xlu1 %v737_v29, %s7726_s21 }
  0x55   : > { %811 = vperm.xlu0 %7352, %v807_v32  }
  0x56   : > { %750 = vrot.lane.b32.xlu1 %v739_v31, %s7726_s21 }
  0x5a   : > { %816 = vperm.xlu1 %7353, %v808_v33  }
  0x86   : > { %v716_v35 = vpop.permute.xlu1 %715 }
  0x87   : > { %v712_v34 = vpop.permute.xlu0 %711  ;;  %v721_v39 = vrot.slane %v716_v35, 4 }
  0x88   : > { %v719_v49 = vrot.slane %v712_v34, 4 }
  0x8b   : > { %v679_v36 = vpop.permute.xlu0 %678 }
  0x8c   : > { %v686_v45 = vrot.slane %v679_v36, 4 }
  0x8f   : > { %v683_v37 = vpop.permute.xlu0 %682 }
  0x90   : > { %v718_v38 = vpop.permute.xlu1 %717  ;;  %v688_v53 = vrot.slane %v683_v37, 4 }
  0x91   : > { %v722_v40 = vrot.slane %v718_v38, 4  ;;  %735 = vst.msk [vmem:[#allocation3 + $0xbc] sm:$0xf] %vm500_vm2, %v718_v38 }
  0x93   : > { %v726_v41 = vsel %vm524_vm4, %v721_v39, %v722_v40  ;;  %v646_v42 = vpop.permute.xlu0 %645 }
  0x94   : > { %v727_v43 = vsel %vm724_vm5, %v716_v35, %v726_v41  ;;  %v681_v44 = vpop.permute.xlu1 %680  ;;  %v653_v60 = vrot.slane %v646_v42, 4 }
  0x95   : > { %734 = vst [vmem:[#allocation3 + $0xb4] sm:$0xff] %v727_v43  ;;  %v687_v46 = vrot.slane %v681_v44, 4  ;;  %700 = vst.msk [vmem:[#allocation3 + $0x98] sm:$0xf] %vm500_vm2, %v681_v44 }
  0x97   : > { %v690_v47 = vsel %vm524_vm4, %v686_v45, %v687_v46  ;;  %v714_v48 = vpop.permute.xlu0 %713 }
  0x98   : > { %v692_v50 = vsel %vm9155_vm6, %v679_v36, %v690_v47  ;;  %v685_v51 = vpop.permute.xlu1 %684  ;;  %v720_v52 = vrot.slane %v714_v48, 4  ;;  %733 = vst.msk [vmem:[#allocation3 + $0xb0] sm:$0xf] %vm500_vm2, %v714_v48 }
  0x99   : > { %699 = vst [vmem:[#allocation3 + $0x90] sm:$0xff] %v692_v50  ;;  %v689_v54 = vrot.slane %v685_v51, 4  ;;  %702 = vst.msk [vmem:[#allocation3 + $0xa4] sm:$0xf] %vm500_vm2, %v685_v51 }
  0x9a   : > { %v723_v55 = vsel %vm524_vm4, %v719_v49, %v720_v52 }
  0x9b   : > { %v693_v56 = vsel %vm524_vm4, %v688_v53, %v689_v54  ;;  %v725_v57 = vsel %vm724_vm5, %v712_v34, %v723_v55  ;;  %v650_v58 = vpop.permute.xlu0 %649 }
  0x9c   : > { %v694_v59 = vsel %vm9155_vm6, %v683_v37, %v693_v56  ;;  %v648_v61 = vpop.permute.xlu1 %647  ;;  %732 = vst [vmem:[#allocation3 + $0xa8] sm:$0xff] %v725_v57  ;;  %v7928_v62 = vcombine.high %v725_v57, %v727_v43  ;;  %v7930_v63 = vcombine.low %v725_v57, %v727_v43  ;;  %v655_v3 = vrot.slane %v650_v58, 4 }
  0x9d   : > { %701 = vst [vmem:[#allocation3 + $0x9c] sm:$0xff] %v694_v59  ;;  %v654_v1 = vrot.slane %v648_v61, 4  ;;  %667 = vst.msk [vmem:[#allocation3 + $0x80] sm:$0xf] %vm500_vm2, %v648_v61  ;;  %v7933_v2 = vcombine.high %v692_v50, %v694_v59  ;;  %v7941_v10 = vcombine.low %v692_v50, %v694_v59 }
  0x9e   : > { %976 = vmatprep.subr.bf16.mxu0 %v7928_v62 }
  0x9f   : > { %v657_v4 = vsel %vm524_vm4, %v653_v60, %v654_v1  ;;  %v613_v5 = vpop.permute.xlu0 %612  ;;  %v7354_v6 = vld [vmem:[#allocation3 + $0xb0] ss:$12 sps:$4 sm:$0xff]   ;;  %977 = vmatpush1.bf16.msra.mxu0 %v7930_v63 }
  0xa0   : > { %v659_v7 = vsel %vm658_vm7, %v646_v42, %v657_v4  ;;  %v652_v8 = vpop.permute.xlu1 %651  ;;  %978 = vmatprep.subr.bf16.mxu0 %v7933_v2  ;;  %1020 = vmatpush1.bf16.msra.mxu1 %v7354_v6  ;;  %v620_v12 = vrot.slane %v613_v5, 4  ;;  %v7355_v14 = vld [vmem:[#allocation3 + $0x98] ss:$12 sps:$4 sm:$0xff]  }
  0xa1   : > { %666 = vst [vmem:[#allocation3 + $0x78] sm:$0xff] %v659_v7  ;;  %v656_v9 = vrot.slane %v652_v8, 4  ;;  %669 = vst.msk [vmem:[#allocation3 + $0x8c] sm:$0xf] %vm500_vm2, %v652_v8  ;;  %1021 = vmatprep.subr.bf16.mxu1 %v7718_v0 }
  0xa3   : > { %v660_v11 = vsel %vm524_vm4, %v655_v3, %v656_v9  ;;  %v617_v13 = vpop.permute.xlu0 %616  ;;  %979 = vmatpush1.bf16.msra.mxu0 %v7941_v10 }
  0xa4   : > { %v661_v15 = vsel %vm658_vm7, %v650_v58, %v660_v11  ;;  %v615_v16 = vpop.permute.xlu1 %614  ;;  %1022 = vmatpush1.bf16.msra.mxu1 %v7355_v14  ;;  %v622_v21 = vrot.slane %v617_v13, 4 }
  0xa5   : > { %668 = vst [vmem:[#allocation3 + $0x84] sm:$0xff] %v661_v15  ;;  %v621_v17 = vrot.slane %v615_v16, 4  ;;  %634 = vst.msk [vmem:[#allocation3 + $0x68] sm:$0xf] %vm500_vm2, %v615_v16  ;;  %v7948_v18 = vcombine.high %v659_v7, %v661_v15  ;;  %v7950_v19 = vcombine.low %v659_v7, %v661_v15  ;;  %1023 = vmatprep.subr.bf16.mxu1 %v7718_v0 }
  0xa7   : > { %v624_v20 = vsel %vm524_vm4, %v620_v12, %v621_v17  ;;  %v580_v22 = vpop.permute.xlu0 %579  ;;  %980 = vmatprep.subr.bf16.mxu0 %v7948_v18 }
  0xa8   : > { %v626_v23 = vsel %vm625_vm8, %v613_v5, %v624_v20  ;;  %v619_v24 = vpop.permute.xlu1 %618  ;;  %v7356_v25 = vld [vmem:[#allocation3 + $0x80] ss:$12 sps:$4 sm:$0xff]   ;;  %981 = vmatpush1.bf16.msra.mxu0 %v7950_v19  ;;  %v587_v30 = vrot.slane %v580_v22, 4 }
  0xa9   : > { %633 = vst [vmem:[#allocation3 + $0x60] sm:$0xff] %v626_v23  ;;  %v623_v28 = vrot.slane %v619_v24, 4  ;;  %636 = vst.msk [vmem:[#allocation3 + $0x74] sm:$0xf] %vm500_vm2, %v619_v24  ;;  %1024 = vmatpush1.bf16.msra.mxu1 %v7356_v25 }
  0xaa   : > { %1025 = vmatprep.subr.bf16.mxu1 %v7718_v0 }
  0xab   : > { %v627_v29 = vsel %vm524_vm4, %v622_v21, %v623_v28  ;;  %v584_v31 = vpop.permute.xlu0 %583 }
  0xac   : > { %v628_v32 = vsel %vm625_vm8, %v617_v13, %v627_v29  ;;  %v582_v33 = vpop.permute.xlu1 %581  ;;  %v589_v38 = vrot.slane %v584_v31, 4 }
  0xad   : > { %635 = vst [vmem:[#allocation3 + $0x6c] sm:$0xff] %v628_v32  ;;  %v588_v34 = vrot.slane %v582_v33, 4  ;;  %601 = vst.msk [vmem:[#allocation3 + $0x50] sm:$0xf] %vm500_vm2, %v582_v33  ;;  %v7962_v35 = vcombine.high %v626_v23, %v628_v32  ;;  %v7964_v36 = vcombine.low %v626_v23, %v628_v32  ;;  %v7361_v33 = vld [vmem:[#allocation3 + $0x8] ss:$12 sps:$4 sm:$0xff]  }
  0xaf   : > { %v591_v37 = vsel %vm524_vm4, %v587_v30, %v588_v34  ;;  %v547_v39 = vpop.permute.xlu0 %546  ;;  %982 = vmatprep.subr.bf16.mxu0 %v7962_v35 }
  0xb0   : > { %v593_v40 = vsel %vm592_vm9, %v580_v22, %v591_v37  ;;  %v586_v41 = vpop.permute.xlu1 %585  ;;  %v7357_v42 = vld [vmem:[#allocation3 + $0x68] ss:$12 sps:$4 sm:$0xff]   ;;  %983 = vmatpush1.bf16.msra.mxu0 %v7964_v36  ;;  %v554_v45 = vrot.slane %v547_v39, 4 }
  0xb1   : > { %600 = vst [vmem:[#allocation3 + $0x48] sm:$0xff] %v593_v40  ;;  %v590_v43 = vrot.slane %v586_v41, 4  ;;  %603 = vst.msk [vmem:[#allocation3 + $0x5c] sm:$0xf] %vm500_vm2, %v586_v41  ;;  %1026 = vmatpush1.bf16.msra.mxu1 %v7357_v42 }
  0xb2   : > { %1027 = vmatprep.subr.bf16.mxu1 %v7718_v0 }
  0xb3   : > { %v594_v44 = vsel %vm524_vm4, %v589_v38, %v590_v43  ;;  %v551_v46 = vpop.permute.xlu0 %550 }
  0xb4   : > { %v595_v47 = vsel %vm592_vm9, %v584_v31, %v594_v44  ;;  %v549_v48 = vpop.permute.xlu1 %548  ;;  %v556_v53 = vrot.slane %v551_v46, 4 }
  0xb5   : > { %602 = vst [vmem:[#allocation3 + $0x54] sm:$0xff] %v595_v47  ;;  %v555_v49 = vrot.slane %v549_v48, 4  ;;  %568 = vst.msk [vmem:[#allocation3 + $0x38] sm:$0xf] %vm500_vm2, %v549_v48  ;;  %v7975_v50 = vcombine.high %v593_v40, %v595_v47  ;;  %v7977_v51 = vcombine.low %v593_v40, %v595_v47  ;;  %v7363_v40 = vld [vmem:[%s9136_s2] ss:$8 sps:$4 sm:$0xff]  }
  0xb7   : > { %v558_v52 = vsel %vm524_vm4, %v554_v45, %v555_v49  ;;  %v513_v54 = vpop.permute.xlu0 %512  ;;  %984 = vmatprep.subr.bf16.mxu0 %v7975_v50 }
  0xb8   : > { %v560_v55 = vsel %vm559_vm10, %v547_v39, %v558_v52  ;;  %v553_v56 = vpop.permute.xlu1 %552  ;;  %v7358_v57 = vld [vmem:[#allocation3 + $0x50] ss:$12 sps:$4 sm:$0xff]   ;;  %985 = vmatpush1.bf16.msra.mxu0 %v7977_v51  ;;  %v520_v60 = vrot.slane %v513_v54, 4 }
  0xb9   : > { %567 = vst [vmem:[#allocation3 + $0x30] sm:$0xff] %v560_v55  ;;  %v557_v58 = vrot.slane %v553_v56, 4  ;;  %570 = vst.msk [vmem:[#allocation3 + $0x44] sm:$0xf] %vm500_vm2, %v553_v56  ;;  %1028 = vmatpush1.bf16.msra.mxu1 %v7358_v57 }
  0xba   : > { %1029 = vmatprep.subr.bf16.mxu1 %v7718_v0 }
  0xbb   : > { %v561_v59 = vsel %vm524_vm4, %v556_v53, %v557_v58  ;;  %v517_v61 = vpop.permute.xlu0 %516 }
  0xbc   : > { %v562_v1 = vsel %vm559_vm10, %v551_v46, %v561_v59  ;;  %v515_v3 = vpop.permute.xlu1 %514  ;;  %v522_v8 = vrot.slane %v517_v61, 4 }
  0xbd   : > { %569 = vst [vmem:[#allocation3 + $0x3c] sm:$0xff] %v562_v1  ;;  %v521_v4 = vrot.slane %v515_v3, 4  ;;  %535 = vst.msk [vmem:[#allocation3 + $0x20] sm:$0xf] %vm500_vm2, %v515_v3  ;;  %v7988_v5 = vcombine.high %v560_v55, %v562_v1  ;;  %v7990_v6 = vcombine.low %v560_v55, %v562_v1 }
  0xbf   : > { %v525_v7 = vsel %vm524_vm4, %v520_v60, %v521_v4  ;;  %v745_v9 = vpop.permute.xlu0 %744  ;;  %986 = vmatprep.subr.bf16.mxu0 %v7988_v5 }
  0xc0   : > { %v527_v11 = vsel %vm526_vm11, %v513_v54, %v525_v7  ;;  %v519_v12 = vpop.permute.xlu1 %518  ;;  %v7359_v13 = vld [vmem:[#allocation3 + $0x38] ss:$12 sps:$4 sm:$0xff]   ;;  %987 = vmatpush1.bf16.msra.mxu0 %v7990_v6  ;;  %v752_v16 = vrot.slane %v745_v9, 4 }
  0xc1   : > { %534 = vst [vmem:[#allocation3 + $0x18] sm:$0xff] %v527_v11  ;;  %v523_v14 = vrot.slane %v519_v12, 4  ;;  %537 = vst.msk [vmem:[#allocation3 + $0x2c] sm:$0xf] %vm500_vm2, %v519_v12  ;;  %1030 = vmatpush1.bf16.msra.mxu1 %v7359_v13 }
  0xc2   : > { %1031 = vmatprep.subr.bf16.mxu1 %v7718_v0 }
  0xc3   : > { %v528_v15 = vsel %vm524_vm4, %v522_v8, %v523_v14  ;;  %v749_v21 = vpop.permute.xlu0 %748 }
  0xc4   : > { %v529_v17 = vsel %vm526_vm11, %v517_v61, %v528_v15  ;;  %v747_v20 = vpop.permute.xlu1 %746  ;;  %v754_v28 = vrot.slane %v749_v21, 4 }
  0xc5   : > { %536 = vst [vmem:[#allocation3 + $0x24] sm:$0xff] %v529_v17  ;;  %v753_v22 = vrot.slane %v747_v20, 4  ;;  %766 = vst.msk [vmem:[#allocation3 + $0xc8] sm:$0xf] %vm500_vm2, %v747_v20  ;;  %v6597_v23 = vcombine.high %v527_v11, %v529_v17  ;;  %v6596_v24 = vcombine.low %v527_v11, %v529_v17 }
  0xc7   : > { %v756_v25 = vsel %vm524_vm4, %v752_v16, %v753_v22  ;;  %988 = vmatprep.subr.bf16.mxu0 %v6597_v23 }
  0xc8   : > { %v758_v29 = vsel %vm757_vm12, %v745_v9, %v756_v25  ;;  %v751_v30 = vpop.permute.xlu1 %750  ;;  %v7360_v31 = vld [vmem:[#allocation3 + $0x20] ss:$12 sps:$4 sm:$0xff]   ;;  %989 = vmatpush1.bf16.msra.mxu0 %v6596_v24 }
  0xc9   : > { %765 = vst [vmem:[#allocation3 + $0xc0] sm:$0xff] %v758_v29  ;;  %v755_v32 = vrot.slane %v751_v30, 4  ;;  %768 = vst.msk [vmem:[#allocation3 + $0xd4] sm:$0xf] %vm500_vm2, %v751_v30  ;;  %990 = vmatprep.subr.bf16.mxu0 %v7891_v26  ;;  %1032 = vmatpush1.bf16.msra.mxu1 %v7360_v31 }
  0xca   : > { %1033 = vmatprep.subr.bf16.mxu1 %v7718_v0 }
  0xcb   : > { %v759_v34 = vsel %vm524_vm4, %v754_v28, %v755_v32 }
  0xcc   : > { %v760_v37 = vsel %vm757_vm12, %v749_v21, %v759_v34  ;;  %991 = vmatpush1.bf16.msra.mxu0 %v7896_v27 }
  0xcd   : > { %767 = vst [vmem:[#allocation3 + $0xcc] sm:$0xff] %v760_v37  ;;  %v6618_v38 = vcombine.high %v758_v29, %v760_v37  ;;  %v6617_v39 = vcombine.low %v758_v29, %v760_v37  ;;  %1034 = vmatpush1.bf16.msra.mxu1 %v7361_v33 }
  0xce   : > { %1049 = vmatprep.subr.bf16.mxu1 %v7718_v0 }
  0xcf   : > { %1006 = vmatprep.subr.bf16.mxu0 %v6618_v38 }
  0xd0   : > { %v7362_v41 = vld [vmem:[#allocation3 + $0xc8] ss:$12 sps:$4 sm:$0xff]   ;;  %1007 = vmatpush2.bf16.msra.mxu0 %v6617_v39 }
  0xd1   : > { %1802 = vmatprep.subr.bf16.mxu0 %v7928_v62  ;;  %1050 = vmatpush2.bf16.msra.mxu1 %v7362_v41 }
  0xd3   : > { %1009 = vmatmul.mubr.bf16.vlgmr.msra.gmra.mxu0 %v7363_v40 }
  0xd4   : > { %1803 = vmatpush1.bf16.msra.mxu0 %v7930_v63  ;;  %1052 = vmatmul.mubr.bf16.vlgmr.msra.gmra.mxu1 %v7363_v40 }
  0xd5   : > { %1804 = vmatprep.subr.bf16.mxu0 %v7933_v2  ;;  %1877 = vmatprep.mubr.bf16.mxu1 %v7718_v0 }
  0xd8   : > { %1805 = vmatpush1.bf16.msra.mxu0 %v7941_v10 }
  0xd9   : > { %1806 = vmatprep.subr.bf16.mxu0 %v7948_v18 }
  0xdc   : > { %1807 = vmatpush1.bf16.msra.mxu0 %v7950_v19  ;;  %v817_v19 = vpop.permute.xlu1 %816 }
  0xdd   : > { %1808 = vmatprep.subr.bf16.mxu0 %v7962_v35  ;;  %v494_v35 = vld [vmem:[%s9135_s1] sm:$0x7] }
  0xe0   : > { %1809 = vmatpush1.bf16.msra.mxu0 %v7964_v36 }
  0xe1   : > { %1810 = vmatprep.subr.bf16.mxu0 %v7975_v50 }
  0xe4   : > { %1811 = vmatpush1.bf16.msra.mxu0 %v7977_v51 }
  0xe5   : > { %1812 = vmatprep.subr.bf16.mxu0 %v7988_v5 }
  0xe8   : > { %1813 = vmatpush1.bf16.msra.mxu0 %v7990_v6 }
  0xe9   : > { %1814 = vmatprep.subr.bf16.mxu0 %v6597_v23 }
  0xec   : > { %1815 = vmatpush1.bf16.msra.mxu0 %v6596_v24 }
  0xed   : > { %1816 = vmatprep.subr.bf16.mxu0 %v7891_v26  ;;  %v1079_v26 = vlaneseq }
  0xef   : > { %v1080_v62 = vshrl.u32 %v1079_v26, 7 }
  0xf0   : > { %1817 = vmatpush1.bf16.msra.mxu0 %v7896_v27  ;;  %v812_v27 = vpop.permute.xlu0 %811 }
  0xf1   : > { %v1081_v2 = vsub.s32 0, %v1080_v62  ;;  %v1085_v10 = vsub.s32 1, %v1080_v62  ;;  %v1089_v43 = vsub.s32 2, %v1080_v62 }
  0xf3   : > { %v8039_v49 = vrot.slane %v494_v35, %v1081_v2  ;;  %v8041_v50 = vrot.slane %v494_v35, %v1085_v10  ;;  %v8051_v57 = vrot.slane %v494_v35, %v1089_v43 }
 0x193   : > { %v1010_v63 = vpop.f32.mrf.mxu0 }
 0x194   : > { %v1011_v18 = vadd.f32 %v1010_v63, %v812_v27  ;;  %v1053_v36 = vpop.f32.mrf.mxu1 }
 0x195   : > { %v1012_v42 = vpop.f32.mrf.mxu0  ;;  %v1054_v44 = vadd.f32 %v1053_v36, %v812_v27 }
 0x196   : > { %vm1060_vm14 = vcmp.ge.f32.partialorder %v1011_v18, 0.0  ;;  %v1066_v45 = vmul.f32 0.2, %v1011_v18  ;;  %v1013_v46 = vadd.f32 %v1012_v42, %v812_v27  ;;  %v1055_v47 = vpop.f32.mrf.mxu1 }
 0x197   : > { %v1014_v48 = vpop.f32.mrf.mxu0  ;;  %vm1062_vm1 = vcmp.ge.f32.partialorder %v1054_v44, 0.0  ;;  %v1068_v56 = vmul.f32 0.2, %v1054_v44 }
 0x198   : > { %v1072_v51 = vsel %vm1060_vm14, %v1011_v18, %v1066_v45  ;;  %vm1061_vm0 = vcmp.ge.f32.partialorder %v1013_v46, 0.0  ;;  %v1067_v52 = vmul.f32 0.2, %v1013_v46  ;;  %v1015_v53 = vadd.f32 %v1014_v48, %v817_v19  ;;  %v1056_v54 = vpop.f32.mrf.mxu1 }
 0x199   : > { %v1016_v55 = vpop.f32.mrf.mxu0  ;;  %v1057_v60 = vadd.f32 %v1056_v54, %v817_v19  ;;  %v1094_v3 = vmul.f32 %v8039_v49, %v1072_v51  ;;  %v1074_v5 = vsel %vm1062_vm1, %v1054_v44, %v1068_v56  ;;  %vm1136_vm1 = vcmask 1047556   ;;  %v1483_v51 = vld [vmem:[%s9139_s5] sm:$0xff] }
 0x19a   : > { %v1073_v58 = vsel %vm1061_vm0, %v1013_v46, %v1067_v52  ;;  %vm1063_vm13 = vcmp.ge.f32.partialorder %v1015_v53, 0.0  ;;  %v1069_v59 = vmul.f32 0.2, %v1015_v53  ;;  %v1017_v61 = vadd.f32 %v1016_v55, %v817_v19  ;;  %v1058_v1 = vpop.f32.mrf.mxu1  ;;  %v1484_v52 = vld [vmem:[%s9139_s5 + $0x8] sm:$0xff] }
 0x19b   : > { %v1095_v4 = vmul.f32 %v8041_v50, %v1073_v58  ;;  %vm1065_vm14 = vcmp.ge.f32.partialorder %v1057_v60, 0.0  ;;  %v1071_v7 = vmul.f32 0.2, %v1057_v60  ;;  %v1096_v11 = vmul.f32 %v8051_v57, %v1074_v5 }
 0x19c   : > { %v1075_v6 = vsel %vm1063_vm13, %v1015_v53, %v1069_v59  ;;  %vm1064_vm15 = vcmp.ge.f32.partialorder %v1017_v61, 0.0  ;;  %v1070_v8 = vmul.f32 0.2, %v1017_v61  ;;  %vm1135_vm0 = vcmask 1043608   ;;  %v8125_v53 = vld [vmem:[%s9138_s4 + $0x4] ss:$12 sps:$4 sm:$0xff]  }
 0x19d   : > { %v7066_v9 = vpack.c.bf16 %v1095_v4, %v1094_v3  ;;  %v1077_v12 = vsel %vm1065_vm14, %v1057_v60, %v1071_v7  ;;  %v1097_v14 = vmul.f32 %v8039_v49, %v1075_v6  ;;  %v7067_v16 = vpack.c.bf16 %v1096_v11, %v1096_v11  ;;  %vm8064_vm14 = vmor %vm1136_vm1, %vm1135_vm0  ;;  %1834 = vmatprep.mubr.bf16.mxu0 %v8125_v53 }
 0x19e   : > { %v1076_v13 = vsel %vm1064_vm15, %v1017_v61, %v1070_v8  ;;  %v1099_v20 = vmul.f32 %v8051_v57, %v1077_v12  ;;  %vm1126_vm13 = vcmask 154624   ;;  %vm1139_vm15 = vcmask 412672  }
 0x19f   : > { %1116 = vrot.lane.b32.xlu1 %v7066_v9, %s7727_s22  ;;  %v1098_v15 = vmul.f32 %v8041_v50, %v1076_v13  ;;  %vm9151_vm0 = vcmask 261120   ;;  %vm9153_vm1 = vmmov 0  }
 0x1a0   : > { %v7069_v21 = vpack.c.bf16 %v1099_v20, %v1099_v20 }
 0x1a1   : > { %v7068_v17 = vpack.c.bf16 %v1098_v15, %v1097_v14 }
 0x1a3   : > { %1118 = vrot.lane.b32.xlu1 %v7067_v16, %s7727_s22  ;;  %1120 = vrot.lane.b32.xlu0 %v7068_v17, %s7727_s22 }
 0x1a7   : > { %1122 = vrot.lane.b32.xlu0 %v7069_v21, %s7727_s22 }
 0x211   : > { %v1117_v22 = vpop.permute.xlu1 %1116 }
 0x212   : > { %v1124_v24 = vrot.slane %v1117_v22, 4 }
 0x214   : > { %v1127_v25 = vsel %vm1126_vm13, %v1124_v24, %v1117_v22 }
 0x215   : > { %1138 = vst.msk [vmem:[#allocation2 + $0x18] sm:$0xff] %vm8064_vm14, %v1127_v25  ;;  %v1119_v28 = vpop.permute.xlu1 %1118  ;;  %v1121_v29 = vpop.permute.xlu0 %1120 }
 0x216   : > { %v1128_v30 = vsel %vm1126_vm13, %v1124_v24, %v1119_v28  ;;  %v1125_v31 = vrot.slane %v1121_v29, 4 }
 0x217   : > { %1140 = vst.msk [vmem:[#allocation2 + $0x20] sm:$0xf] %vm1139_vm15, %v1128_v30 }
 0x218   : > { %v1129_v32 = vsel %vm1126_vm13, %v1125_v31, %v1121_v29 }
 0x219   : > { %1141 = vst.msk [vmem:[#allocation2 + $0x24] sm:$0xff] %vm8064_vm14, %v1129_v32  ;;  %v1123_v33 = vpop.permute.xlu0 %1122 }
 0x21a   : > { %v1130_v34 = vsel %vm1126_vm13, %v1125_v31, %v1123_v33 }
 0x21b   : > { %1142 = vst.msk [vmem:[#allocation2 + $0x2c] sm:$0xf] %vm1139_vm15, %v1130_v34 }
 0x21c   : > { %v1375_v37 = vld [vmem:[#allocation2 + $0x18] sm:$0xff] }
 0x21d   : > { %1383 = vrot.lane.b32.xlu1 %v1375_v37, %s7726_s21  ;;  %1147 = vst [vmem:[#allocation3 + $0xd8] sm:$0xff] %v1375_v37 }
 0x21e   : > { %v1144_v38 = vld [vmem:[#allocation2 + $0x20] sm:$0xf] }
 0x21f   : > { %v1376_v39 = vld [vmem:[#allocation2 + $0x20] sm:$0xf]  ;;  %1148 = vst.msk [vmem:[#allocation3 + $0xe0] sm:$0xf] %vm500_vm2, %v1144_v38 }
 0x220   : > { %1385 = vrot.lane.b32.xlu0 %v1376_v39, %s7726_s21  ;;  %v1377_v40 = vld [vmem:[#allocation2 + $0x24] sm:$0xff]  ;;  %v1344_v41 = vld [vmem:[#allocation2 + $0x20] sm:$0xf] }
 0x221   : > { %1351 = vrot.lane.b32.xlu1 %v1375_v37, %s7719_s14  ;;  %1149 = vst [vmem:[#allocation3 + $0xe4] sm:$0xff] %v1377_v40  ;;  %v8082_v26 = vcombine.low %v1375_v37, %v1377_v40  ;;  %v8084_v62 = vcombine.high %v1375_v37, %v1377_v40  ;;  %v1312_v63 = vld [vmem:[#allocation2 + $0x20] sm:$0xf] }
 0x222   : > { %v1146_v27 = vld [vmem:[#allocation2 + $0x2c] sm:$0xf]  ;;  %v1280_v2 = vld [vmem:[#allocation2 + $0x20] sm:$0xf] }
 0x223   : > { %1150 = vst.msk [vmem:[#allocation3 + $0xec] sm:$0xf] %vm500_vm2, %v1146_v27  ;;  %v1248_v10 = vld [vmem:[#allocation2 + $0x20] sm:$0xf]  ;;  %v1378_v35 = vld [vmem:[#allocation2 + $0x2c] sm:$0xf] }
 0x224   : > { %1353 = vrot.lane.b32.xlu0 %v1344_v41, %s7719_s14  ;;  %v1216_v18 = vld [vmem:[#allocation2 + $0x20] sm:$0xf]  ;;  %v1346_v36 = vld [vmem:[#allocation2 + $0x2c] sm:$0xf] }
 0x225   : > { %1319 = vrot.lane.b32.xlu1 %v1375_v37, %s9149_s15  ;;  %v1184_v19 = vld [vmem:[#allocation2 + $0x20] sm:$0xf]  ;;  %v1314_v43 = vld [vmem:[#allocation2 + $0x2c] sm:$0xf] }
 0x226   : > { %v1152_v42 = vld [vmem:[#allocation2 + $0x20] sm:$0xf]  ;;  %v1282_v44 = vld [vmem:[#allocation2 + $0x2c] sm:$0xf] }
 0x227   : > { %v1250_v45 = vld [vmem:[#allocation2 + $0x2c] sm:$0xf] }
 0x228   : > { %1321 = vrot.lane.b32.xlu0 %v1312_v63, %s9149_s15  ;;  %v1218_v46 = vld [vmem:[#allocation2 + $0x2c] sm:$0xf] }
 0x229   : > { %1287 = vrot.lane.b32.xlu1 %v1375_v37, %s9156_s16  ;;  %v1186_v47 = vld [vmem:[#allocation2 + $0x2c] sm:$0xf] }
 0x22a   : > { %v1154_v48 = vld [vmem:[#allocation2 + $0x2c] sm:$0xf] }
 0x22c   : > { %1289 = vrot.lane.b32.xlu0 %v1280_v2, %s9156_s16 }
 0x22d   : > { %1255 = vrot.lane.b32.xlu1 %v1375_v37, %s7722_s17 }
 0x230   : > { %1257 = vrot.lane.b32.xlu0 %v1248_v10, %s7722_s17 }
 0x231   : > { %1223 = vrot.lane.b32.xlu1 %v1375_v37, %s7723_s18 }
 0x234   : > { %1225 = vrot.lane.b32.xlu0 %v1216_v18, %s7723_s18 }
 0x235   : > { %1191 = vrot.lane.b32.xlu1 %v1375_v37, %s7724_s19 }
 0x238   : > { %1193 = vrot.lane.b32.xlu0 %v1184_v19, %s7724_s19 }
 0x239   : > { %1387 = vrot.lane.b32.xlu1 %v1377_v40, %s7726_s21 }
 0x23c   : > { %1389 = vrot.lane.b32.xlu0 %v1378_v35, %s7726_s21 }
 0x23d   : > { %1355 = vrot.lane.b32.xlu1 %v1377_v40, %s7719_s14 }
 0x240   : > { %1357 = vrot.lane.b32.xlu0 %v1346_v36, %s7719_s14 }
 0x241   : > { %1159 = vrot.lane.b32.xlu1 %v1375_v37, %s7725_s20 }
 0x244   : > { %1161 = vrot.lane.b32.xlu0 %v1152_v42, %s7725_s20 }
 0x245   : > { %1323 = vrot.lane.b32.xlu1 %v1377_v40, %s9149_s15 }
 0x248   : > { %1325 = vrot.lane.b32.xlu0 %v1314_v43, %s9149_s15 }
 0x249   : > { %1291 = vrot.lane.b32.xlu1 %v1377_v40, %s9156_s16 }
 0x24c   : > { %1293 = vrot.lane.b32.xlu0 %v1282_v44, %s9156_s16 }
 0x24d   : > { %1259 = vrot.lane.b32.xlu1 %v1377_v40, %s7722_s17 }
 0x250   : > { %1261 = vrot.lane.b32.xlu0 %v1250_v45, %s7722_s17 }
 0x251   : > { %1227 = vrot.lane.b32.xlu1 %v1377_v40, %s7723_s18 }
 0x254   : > { %1229 = vrot.lane.b32.xlu0 %v1218_v46, %s7723_s18 }
 0x255   : > { %1195 = vrot.lane.b32.xlu1 %v1377_v40, %s7724_s19 }
 0x258   : > { %1197 = vrot.lane.b32.xlu0 %v1186_v47, %s7724_s19 }
 0x259   : > { %1163 = vrot.lane.b32.xlu1 %v1377_v40, %s7725_s20 }
 0x25c   : > { %1165 = vrot.lane.b32.xlu0 %v1154_v48, %s7725_s20 }
 0x25d   : > { %1487 = vperm.xlu1 %7353, %v1483_v51  }
 0x260   : > { %1492 = vperm.xlu0 %7352, %v1484_v52  }
 0x28f   : > { %v1384_v54 = vpop.permute.xlu1 %1383 }
 0x290   : > { %v1391_v56 = vrot.slane %v1384_v54, 4 }
 0x292   : > { %v1386_v55 = vpop.permute.xlu0 %1385 }
 0x293   : > { %v1392_v58 = vrot.slane %v1386_v55, 4  ;;  %1404 = vst.msk [vmem:[#allocation3 + $0x1a0] sm:$0xf] %vm500_vm2, %v1386_v55  ;;  %v1352_v59 = vpop.permute.xlu1 %1351 }
 0x294   : > { %v1359_v3 = vrot.slane %v1352_v59, 4 }
 0x295   : > { %v1395_v60 = vsel %vm524_vm4, %v1391_v56, %v1392_v58 }
 0x296   : > { %v8131_v61 = vsel %vm757_vm12, %v1384_v54, %v1395_v60  ;;  %v1354_v1 = vpop.permute.xlu0 %1353 }
 0x297   : > { %1403 = vst [vmem:[#allocation3 + $0x198] sm:$0xff] %v8131_v61  ;;  %v1360_v4 = vrot.slane %v1354_v1, 4  ;;  %1372 = vst.msk [vmem:[#allocation3 + $0x188] sm:$0xf] %vm500_vm2, %v1354_v1  ;;  %v1320_v5 = vpop.permute.xlu1 %1319 }
 0x298   : > { %v1327_v9 = vrot.slane %v1320_v5, 4 }
 0x299   : > { %v1363_v6 = vsel %vm524_vm4, %v1359_v3, %v1360_v4  ;;  %v8185_v3 = vld [vmem:[%s9138_s4 + $0x8] ss:$12 sps:$4 sm:$0xff]  }
 0x29a   : > { %v8137_v7 = vsel %vm724_vm5, %v1352_v59, %v1363_v6  ;;  %v1322_v8 = vpop.permute.xlu0 %1321 }
 0x29b   : > { %1371 = vst [vmem:[#allocation3 + $0x180] sm:$0xff] %v8137_v7  ;;  %v1328_v11 = vrot.slane %v1322_v8, 4  ;;  %1340 = vst.msk [vmem:[#allocation3 + $0x170] sm:$0xf] %vm500_vm2, %v1322_v8  ;;  %v1288_v12 = vpop.permute.xlu1 %1287 }
 0x29c   : > { %v1295_v15 = vrot.slane %v1288_v12, 4 }
 0x29d   : > { %v1331_v13 = vsel %vm524_vm4, %v1327_v9, %v1328_v11 }
 0x29e   : > { %v8143_v14 = vsel %vm9155_vm6, %v1320_v5, %v1331_v13  ;;  %v1290_v16 = vpop.permute.xlu0 %1289 }
 0x29f   : > { %1339 = vst [vmem:[#allocation3 + $0x168] sm:$0xff] %v8143_v14  ;;  %v1296_v17 = vrot.slane %v1290_v16, 4  ;;  %1308 = vst.msk [vmem:[#allocation3 + $0x158] sm:$0xf] %vm500_vm2, %v1290_v16  ;;  %v1256_v20 = vpop.permute.xlu1 %1255 }
 0x2a0   : > { %v1263_v24 = vrot.slane %v1256_v20, 4 }
 0x2a1   : > { %v1299_v21 = vsel %vm524_vm4, %v1295_v15, %v1296_v17 }
 0x2a2   : > { %v8149_v22 = vsel %vm658_vm7, %v1288_v12, %v1299_v21  ;;  %v1258_v25 = vpop.permute.xlu0 %1257 }
 0x2a3   : > { %1307 = vst [vmem:[#allocation3 + $0x150] sm:$0xff] %v8149_v22  ;;  %v1264_v28 = vrot.slane %v1258_v25, 4  ;;  %1276 = vst.msk [vmem:[#allocation3 + $0x140] sm:$0xf] %vm500_vm2, %v1258_v25  ;;  %v1224_v29 = vpop.permute.xlu1 %1223 }
 0x2a4   : > { %v1231_v32 = vrot.slane %v1224_v29, 4 }
 0x2a5   : > { %v1267_v30 = vsel %vm524_vm4, %v1263_v24, %v1264_v28  ;;  %v7368_v24 = vld [vmem:[#allocation3 + $0xb0] ss:$12 sps:$4 sm:$0xff]  }
 0x2a6   : > { %v8155_v31 = vsel %vm625_vm8, %v1256_v20, %v1267_v30  ;;  %v1226_v33 = vpop.permute.xlu0 %1225 }
 0x2a7   : > { %1275 = vst [vmem:[#allocation3 + $0x138] sm:$0xff] %v8155_v31  ;;  %v1232_v34 = vrot.slane %v1226_v33, 4  ;;  %1244 = vst.msk [vmem:[#allocation3 + $0x128] sm:$0xf] %vm500_vm2, %v1226_v33  ;;  %v1192_v37 = vpop.permute.xlu1 %1191 }
 0x2a8   : > { %v1199_v40 = vrot.slane %v1192_v37, 4 }
 0x2a9   : > { %v1235_v38 = vsel %vm524_vm4, %v1231_v32, %v1232_v34 }
 0x2aa   : > { %v8161_v39 = vsel %vm592_vm9, %v1224_v29, %v1235_v38  ;;  %v1194_v41 = vpop.permute.xlu0 %1193 }
 0x2ab   : > { %1243 = vst [vmem:[#allocation3 + $0x120] sm:$0xff] %v8161_v39  ;;  %v1200_v27 = vrot.slane %v1194_v41, 4  ;;  %1212 = vst.msk [vmem:[#allocation3 + $0x110] sm:$0xf] %vm500_vm2, %v1194_v41  ;;  %v1388_v63 = vpop.permute.xlu1 %1387 }
 0x2ac   : > { %v1393_v18 = vrot.slane %v1388_v63, 4 }
 0x2ad   : > { %v1203_v2 = vsel %vm524_vm4, %v1199_v40, %v1200_v27 }
 0x2ae   : > { %v8167_v10 = vsel %vm559_vm10, %v1192_v37, %v1203_v2  ;;  %v1390_v19 = vpop.permute.xlu0 %1389 }
 0x2af   : > { %1211 = vst [vmem:[#allocation3 + $0x108] sm:$0xff] %v8167_v10  ;;  %v1394_v35 = vrot.slane %v1390_v19, 4  ;;  %1406 = vst.msk [vmem:[#allocation3 + $0x1ac] sm:$0xf] %vm500_vm2, %v1390_v19  ;;  %v1356_v36 = vpop.permute.xlu1 %1355 }
 0x2b0   : > { %v1361_v44 = vrot.slane %v1356_v36, 4 }
 0x2b1   : > { %v1397_v42 = vsel %vm524_vm4, %v1393_v18, %v1394_v35 }
 0x2b2   : > { %v1398_v43 = vsel %vm757_vm12, %v1388_v63, %v1397_v42  ;;  %v1358_v45 = vpop.permute.xlu0 %1357 }
 0x2b3   : > { %1405 = vst [vmem:[#allocation3 + $0x1a4] sm:$0xff] %v1398_v43  ;;  %v1362_v46 = vrot.slane %v1358_v45, 4  ;;  %1374 = vst.msk [vmem:[#allocation3 + $0x194] sm:$0xf] %vm500_vm2, %v1358_v45  ;;  %v6680_v47 = vcombine.low %v8131_v61, %v1398_v43  ;;  %v6681_v48 = vcombine.high %v8131_v61, %v1398_v43  ;;  %v1160_v51 = vpop.permute.xlu1 %1159 }
 0x2b4   : > { %v1167_v56 = vrot.slane %v1160_v51, 4 }
 0x2b5   : > { %v1365_v52 = vsel %vm524_vm4, %v1361_v44, %v1362_v46  ;;  %1857 = vmatprep.subr.bf16.mxu1 %v6681_v48 }
 0x2b6   : > { %v1366_v54 = vsel %vm724_vm5, %v1356_v36, %v1365_v52  ;;  %v1162_v55 = vpop.permute.xlu0 %1161  ;;  %1858 = vmatpush1.bf16.msra.mxu1 %v6680_v47 }
 0x2b7   : > { %1373 = vst [vmem:[#allocation3 + $0x18c] sm:$0xff] %v1366_v54  ;;  %v1168_v58 = vrot.slane %v1162_v55, 4  ;;  %1180 = vst.msk [vmem:[#allocation3 + $0xf8] sm:$0xf] %vm500_vm2, %v1162_v55  ;;  %v6677_v59 = vcombine.low %v8137_v7, %v1366_v54  ;;  %v6678_v60 = vcombine.high %v8137_v7, %v1366_v54  ;;  %v1324_v1 = vpop.permute.xlu1 %1323 }
 0x2b8   : > { %v1329_v6 = vrot.slane %v1324_v1, 4 }
 0x2b9   : > { %v1171_v61 = vsel %vm524_vm4, %v1167_v56, %v1168_v58  ;;  %1859 = vmatprep.subr.bf16.mxu1 %v6678_v60 }
 0x2ba   : > { %v8188_v4 = vsel %vm526_vm11, %v1160_v51, %v1171_v61  ;;  %v1326_v5 = vpop.permute.xlu0 %1325  ;;  %1860 = vmatpush1.bf16.msra.mxu1 %v6677_v59 }
 0x2bb   : > { %1179 = vst [vmem:[#allocation3 + $0xf0] sm:$0xff] %v8188_v4  ;;  %v1330_v8 = vrot.slane %v1326_v5, 4  ;;  %1342 = vst.msk [vmem:[#allocation3 + $0x17c] sm:$0xf] %vm500_vm2, %v1326_v5  ;;  %v1292_v7 = vpop.permute.xlu1 %1291  ;;  %v7376_v5 = vld [vmem:[#allocation3 + $0x50] ss:$12 sps:$4 sm:$0xff]  }
 0x2bc   : > { %v1297_v13 = vrot.slane %v1292_v7, 4 }
 0x2bd   : > { %v1333_v9 = vsel %vm524_vm4, %v1329_v6, %v1330_v8  ;;  %6683 = vmatmul.mubr.msk.bf16.vlgmr.msra.gmra.mxu1 %vm9151_vm0, %v8185_v3 }
 0x2be   : > { %v1334_v11 = vsel %vm9155_vm6, %v1324_v1, %v1333_v9  ;;  %v1294_v12 = vpop.permute.xlu0 %1293  ;;  %1920 = vmatprep.mubr.bf16.mxu1 %v8125_v53  ;;  %v7379_v9 = vld [vmem:[#allocation3 + $0xe0] ss:$12 sps:$4 sm:$0xff]  }
 0x2bf   : > { %1341 = vst [vmem:[#allocation3 + $0x174] sm:$0xff] %v1334_v11  ;;  %v1298_v15 = vrot.slane %v1294_v12, 4  ;;  %1310 = vst.msk [vmem:[#allocation3 + $0x164] sm:$0xf] %vm500_vm2, %v1294_v12  ;;  %v8199_v16 = vcombine.low %v8143_v14, %v1334_v11  ;;  %v8202_v17 = vcombine.high %v8143_v14, %v1334_v11  ;;  %v1260_v20 = vpop.permute.xlu1 %1259  ;;  %v8261_v11 = vld [vmem:[#allocation3 + $0xc4] ss:$12 sps:$4 sm:$0xff]  }
 0x2c0   : > { %v1265_v29 = vrot.slane %v1260_v20, 4  ;;  %v7381_v12 = vld [vmem:[#allocation3 + $0xc8] ss:$12 sps:$4 sm:$0xff]  }
 0x2c1   : > { %v1301_v21 = vsel %vm524_vm4, %v1297_v13, %v1298_v15  ;;  %1818 = vmatprep.subr.bf16.mxu0 %v8202_v17  ;;  %v8265_v13 = vld [vmem:[#allocation3 + $0xc0] ss:$12 sps:$4 sm:$0xff]   ;;  %v7382_v15 = vld [vmem:[#allocation3 + $0x8] ss:$12 sps:$4 sm:$0xff]  }
 0x2c2   : > { %v1302_v25 = vsel %vm658_vm7, %v1292_v7, %v1301_v21  ;;  %v1262_v53 = vpop.permute.xlu0 %1261  ;;  %v7367_v28 = vld [vmem:[#allocation3 + $0x170] ss:$12 sps:$4 sm:$0xff]   ;;  %1819 = vmatpush2.bf16.msra.mxu0 %v8199_v16  ;;  %v7378_v7 = vld [vmem:[#allocation3 + $0x38] ss:$12 sps:$4 sm:$0xff]   ;;  %v7728_v21 = vmov 0.0  }
 0x2c3   : > { %1309 = vst [vmem:[#allocation3 + $0x15c] sm:$0xff] %v1302_v25  ;;  %v1266_v30 = vrot.slane %v1262_v53, 4  ;;  %1278 = vst.msk [vmem:[#allocation3 + $0x14c] sm:$0xf] %vm500_vm2, %v1262_v53  ;;  %v8210_v14 = vcombine.low %v8149_v22, %v1302_v25  ;;  %v8213_v32 = vcombine.high %v8149_v22, %v1302_v25  ;;  %v1228_v33 = vpop.permute.xlu1 %1227  ;;  %7082 = vmatprep.subr.bf16.mxu1 %v7367_v28  ;;  %v7370_v22 = vld [vmem:[#allocation3 + $0x98] ss:$12 sps:$4 sm:$0xff]  }
 0x2c4   : > { %7083 = vmatpush3.bf16.msra.mxu1 %v7368_v24  ;;  %v1233_v41 = vrot.slane %v1228_v33, 4  ;;  %v7389_v24 = vld [vmem:[#allocation3 + $0x1a0] ss:$12 sps:$4 sm:$0xff]   ;;  %v7390_v25 = vld [vmem:[#allocation3 + $0x188] ss:$12 sps:$4 sm:$0xff]  }
 0x2c5   : > { %v1269_v34 = vsel %vm524_vm4, %v1265_v29, %v1266_v30  ;;  %1820 = vmatprep.subr.bf16.mxu0 %v8213_v32  ;;  %v7393_v53 = vld [vmem:[#allocation3 + $0xac] ss:$12 sps:$4 sm:$0xff]   ;;  %v7391_v28 = vld [vmem:[#allocation3 + $0xa8] ss:$12 sps:$4 sm:$0xff]   ;;  %v7394_v30 = vld [vmem:[#allocation3 + $0x90] ss:$12 sps:$4 sm:$0xff]  }
 0x2c6   : > { %v1270_v37 = vsel %vm625_vm8, %v1260_v20, %v1269_v34  ;;  %v1230_v38 = vpop.permute.xlu0 %1229  ;;  %v7369_v40 = vld [vmem:[#allocation3 + $0x158] ss:$12 sps:$4 sm:$0xff]   ;;  %1821 = vmatpush2.bf16.msra.mxu0 %v8210_v14  ;;  %v7386_v20 = vld [vmem:[%s9138_s4] ss:$12 sps:$4 sm:$0xff]  }
 0x2c7   : > { %1277 = vst [vmem:[#allocation3 + $0x144] sm:$0xff] %v1270_v37  ;;  %v1234_v27 = vrot.slane %v1230_v38, 4  ;;  %1246 = vst.msk [vmem:[#allocation3 + $0x134] sm:$0xf] %vm500_vm2, %v1230_v38  ;;  %v8221_v63 = vcombine.low %v8155_v31, %v1270_v37  ;;  %v8224_v2 = vcombine.high %v8155_v31, %v1270_v37  ;;  %v1196_v18 = vpop.permute.xlu1 %1195  ;;  %7084 = vmatprep.subr.bf16.mxu1 %v7369_v40  ;;  %v7372_v31 = vld [vmem:[#allocation3 + $0x80] ss:$12 sps:$4 sm:$0xff]  }
 0x2c8   : > { %7085 = vmatpush3.bf16.msra.mxu1 %v7370_v22  ;;  %v1201_v43 = vrot.slane %v1196_v18, 4  ;;  %v7396_v29 = vld [vmem:[#allocation3 + $0x94] ss:$12 sps:$4 sm:$0xff]   ;;  %v7397_v34 = vld [vmem:[#allocation3 + $0x78] ss:$12 sps:$4 sm:$0xff]  }
 0x2c9   : > { %v1237_v19 = vsel %vm524_vm4, %v1233_v41, %v1234_v27  ;;  %1822 = vmatprep.subr.bf16.mxu0 %v8224_v2  ;;  %v7402_v37 = vld [vmem:[#allocation3 + $0x64] ss:$12 sps:$4 sm:$0xff]   ;;  %v7400_v38 = vld [vmem:[#allocation3 + $0x60] ss:$12 sps:$4 sm:$0xff]   ;;  %v7403_v41 = vld [vmem:[#allocation3 + $0x48] ss:$12 sps:$4 sm:$0xff]  }
 0x2ca   : > { %v1238_v35 = vsel %vm592_vm9, %v1228_v33, %v1237_v19  ;;  %v1198_v36 = vpop.permute.xlu0 %1197  ;;  %v7371_v42 = vld [vmem:[#allocation3 + $0x140] ss:$12 sps:$4 sm:$0xff]   ;;  %1823 = vmatpush2.bf16.msra.mxu0 %v8221_v63  ;;  %v7399_v33 = vld [vmem:[#allocation3 + $0x7c] ss:$12 sps:$4 sm:$0xff]   ;;  %v7409_v19 = vld [vmem:[#allocation3 + $0x18] ss:$12 sps:$4 sm:$0xff]  }
 0x2cb   : > { %1245 = vst [vmem:[#allocation3 + $0x12c] sm:$0xff] %v1238_v35  ;;  %v1202_v44 = vrot.slane %v1198_v36, 4  ;;  %1214 = vst.msk [vmem:[#allocation3 + $0x11c] sm:$0xf] %vm500_vm2, %v1198_v36  ;;  %v8232_v45 = vcombine.low %v8161_v39, %v1238_v35  ;;  %v8235_v46 = vcombine.high %v8161_v39, %v1238_v35  ;;  %v1164_v47 = vpop.permute.xlu1 %1163  ;;  %7086 = vmatprep.subr.bf16.mxu1 %v7371_v42  ;;  %v7374_v39 = vld [vmem:[#allocation3 + $0x68] ss:$12 sps:$4 sm:$0xff]  }
 0x2cc   : > { %7087 = vmatpush3.bf16.msra.mxu1 %v7372_v31  ;;  %v1169_v55 = vrot.slane %v1164_v47, 4  ;;  %v7405_v40 = vld [vmem:[#allocation3 + $0x4c] ss:$12 sps:$4 sm:$0xff]   ;;  %v7408_v27 = vld [vmem:[#allocation3 + $0x34] ss:$12 sps:$4 sm:$0xff]  }
 0x2cd   : > { %v1205_v48 = vsel %vm524_vm4, %v1201_v43, %v1202_v44  ;;  %1824 = vmatprep.subr.bf16.mxu0 %v8235_v46  ;;  %v7411_v22 = vld [vmem:[#allocation3 + $0x1c] ss:$12 sps:$4 sm:$0xff]   ;;  %v7412_v35 = vld [vmem:[#allocation3] ss:$12 sps:$4 sm:$0xff]  }
 0x2ce   : > { %v1206_v51 = vsel %vm559_vm10, %v1196_v18, %v1205_v48  ;;  %v1166_v52 = vpop.permute.xlu0 %1165  ;;  %v7373_v54 = vld [vmem:[#allocation3 + $0x128] ss:$12 sps:$4 sm:$0xff]   ;;  %1825 = vmatpush2.bf16.msra.mxu0 %v8232_v45  ;;  %v7414_v18 = vld [vmem:[#allocation3 + $0x4] ss:$12 sps:$4 sm:$0xff]  }
 0x2cf   : > { %1213 = vst [vmem:[#allocation3 + $0x114] sm:$0xff] %v1206_v51  ;;  %v1170_v56 = vrot.slane %v1166_v52, 4  ;;  %1182 = vst.msk [vmem:[#allocation3 + $0x104] sm:$0xf] %vm500_vm2, %v1166_v52  ;;  %v8243_v58 = vcombine.low %v8167_v10, %v1206_v51  ;;  %v8246_v59 = vcombine.high %v8167_v10, %v1206_v51  ;;  %7088 = vmatprep.subr.bf16.mxu1 %v7373_v54 }
 0x2d0   : > { %7089 = vmatpush3.bf16.msra.mxu1 %v7374_v39 }
 0x2d1   : > { %v1173_v60 = vsel %vm524_vm4, %v1169_v55, %v1170_v56  ;;  %1826 = vmatprep.subr.bf16.mxu0 %v8246_v59 }
 0x2d2   : > { %v1174_v1 = vsel %vm526_vm11, %v1164_v47, %v1173_v60  ;;  %v7375_v61 = vld [vmem:[#allocation3 + $0x110] ss:$12 sps:$4 sm:$0xff]   ;;  %1827 = vmatpush2.bf16.msra.mxu0 %v8243_v58 }
 0x2d3   : > { %1181 = vst [vmem:[#allocation3 + $0xfc] sm:$0xff] %v1174_v1  ;;  %v8253_v6 = vcombine.low %v8188_v4, %v1174_v1  ;;  %v8256_v8 = vcombine.high %v8188_v4, %v1174_v1  ;;  %7090 = vmatprep.subr.bf16.mxu1 %v7375_v61  ;;  %v7380_v4 = vld [vmem:[#allocation3 + $0x20] ss:$12 sps:$4 sm:$0xff]  }
 0x2d4   : > { %7091 = vmatpush3.bf16.msra.mxu1 %v7376_v5 }
 0x2d5   : > { %1828 = vmatprep.subr.bf16.mxu0 %v8256_v8 }
 0x2d6   : > { %v7377_v10 = vld [vmem:[#allocation3 + $0xf8] ss:$12 sps:$4 sm:$0xff]   ;;  %1829 = vmatpush2.bf16.msra.mxu0 %v8253_v6 }
 0x2d7   : > { %1830 = vmatprep.subr.bf16.mxu0 %v8084_v62  ;;  %7092 = vmatprep.subr.bf16.mxu1 %v7377_v10 }
 0x2d8   : > { %7093 = vmatpush3.bf16.msra.mxu1 %v7378_v7 }
 0x2d9   : > { %7094 = vmatprep.subr.bf16.mxu1 %v7379_v9 }
 0x2da   : > { %1831 = vmatpush2.bf16.msra.mxu0 %v8082_v26 }
 0x2db   : > { %1832 = vmatprep.subr.bf16.mxu0 %v8261_v11 }
 0x2dc   : > { %7095 = vmatpush3.bf16.msra.mxu1 %v7380_v4 }
 0x2dd   : > { %7096 = vmatprep.subr.bf16.mxu1 %v7381_v12 }
 0x2de   : > { %1833 = vmatpush2.bf16.msra.mxu0 %v8265_v13 }
 0x2e0   : > { %7097 = vmatpush3.bf16.msra.mxu1 %v7382_v15 }
 0x2e1   : > { %1835 = vmatmul.mubr.bf16.vlgmr.msra.gmra.mxu0 %v7386_v20  ;;  %7245 = vmatprep.subr.bf16.mxu1 %v7728_v21 }
 0x2e3   : > { %1921 = vmatmul.mubr.bf16.vlgmr.msra.gmra.mxu1 %v7386_v20 }
 0x2e4   : > { %7246 = vmatpush3.bf16.msra.mxu1 %v7389_v24  ;;  %7249 = vmatprep.mubr.msk.bf16.mxu1 %vm9153_vm1, %v7728_v21 }
 0x2e5   : > { %7247 = vmatprep.subr.bf16.mxu1 %v7728_v21 }
 0x2e8   : > { %7248 = vmatpush3.bf16.msra.mxu1 %v7390_v25 }
 0x2e9   : > { %2875 = vmatprep.subr.bf16.mxu1 %v7393_v53 }
 0x2eb   : > { %7250 = vmatmul.mubr.msk.bf16.vlgmr.msra.gmra.mxu1 %vm9151_vm0, %v8185_v3  ;;  %v7406_v3 = vld [vmem:[#allocation3 + $0x30] ss:$12 sps:$4 sm:$0xff]  }
 0x2ec   : > { %2876 = vmatpush1.bf16.msra.mxu1 %v7391_v28 }
 0x2ed   : > { %2877 = vmatprep.subr.bf16.mxu1 %v7396_v29 }
 0x2f0   : > { %2878 = vmatpush1.bf16.msra.mxu1 %v7394_v30 }
 0x2f1   : > { %2879 = vmatprep.subr.bf16.mxu1 %v7399_v33 }
 0x2f4   : > { %2880 = vmatpush1.bf16.msra.mxu1 %v7397_v34 }
 0x2f5   : > { %2881 = vmatprep.subr.bf16.mxu1 %v7402_v37 }
 0x2f8   : > { %2882 = vmatpush1.bf16.msra.mxu1 %v7400_v38 }
 0x2f9   : > { %2883 = vmatprep.subr.bf16.mxu1 %v7405_v40 }
 0x2fc   : > { %2884 = vmatpush1.bf16.msra.mxu1 %v7403_v41 }
 0x2fd   : > { %2885 = vmatprep.subr.bf16.mxu1 %v7408_v27 }
 0x300   : > { %2886 = vmatpush1.bf16.msra.mxu1 %v7406_v3 }
 0x301   : > { %2887 = vmatprep.subr.bf16.mxu1 %v7411_v22 }
 0x304   : > { %2888 = vmatpush1.bf16.msra.mxu1 %v7409_v19 }
 0x305   : > { %2889 = vmatprep.subr.bf16.mxu1 %v7414_v18 }
 0x308   : > { %2890 = vmatpush1.bf16.msra.mxu1 %v7412_v35 }
 0x309   : > { %2891 = vmatprep.subr.bf16.mxu1 %v8202_v17 }
 0x30c   : > { %2892 = vmatpush2.bf16.msra.mxu1 %v8199_v16 }
 0x30d   : > { %2893 = vmatprep.subr.bf16.mxu1 %v8213_v32  ;;  %v1488_v32 = vpop.permute.xlu1 %1487 }
 0x310   : > { %2894 = vmatpush2.bf16.msra.mxu1 %v8210_v14 }
 0x311   : > { %2895 = vmatprep.subr.bf16.mxu1 %v8224_v2 }
 0x314   : > { %2896 = vmatpush2.bf16.msra.mxu1 %v8221_v63 }
 0x315   : > { %2897 = vmatprep.subr.bf16.mxu1 %v8235_v46  ;;  %v8302_v46 = vld [vmem:[%s9140_s6 + $0x4] ss:$16 sps:$4 sm:$0xff]  }
 0x316   : > { %2907 = vmatprep.mubr.bf16.mxu1 %v8302_v46 }
 0x318   : > { %2898 = vmatpush2.bf16.msra.mxu1 %v8232_v45 }
 0x319   : > { %2899 = vmatprep.subr.bf16.mxu1 %v8246_v59 }
 0x31c   : > { %2900 = vmatpush2.bf16.msra.mxu1 %v8243_v58 }
 0x31d   : > { %2901 = vmatprep.subr.bf16.mxu1 %v8256_v8 }
 0x320   : > { %2902 = vmatpush2.bf16.msra.mxu1 %v8253_v6 }
 0x321   : > { %2903 = vmatprep.subr.bf16.mxu1 %v8084_v62  ;;  %v1493_v62 = vpop.permute.xlu0 %1492 }
 0x324   : > { %2904 = vmatpush2.bf16.msra.mxu1 %v8082_v26  ;;  %v8297_v26 = vld [vmem:[%s9140_s6] ss:$16 sps:$4 sm:$0xff]  }
 0x325   : > { %2905 = vmatprep.subr.bf16.mxu1 %v8261_v11 }
 0x328   : > { %2906 = vmatpush2.bf16.msra.mxu1 %v8265_v13 }
 0x329   : > { %3002 = vmatprep.subr.bf16.mxu1 %v7718_v0 }
 0x32b   : > { %2908 = vmatmul.mubr.bf16.vlgmr.msra.gmra.mxu1 %v8297_v26 }
 0x37d   : > { %v1879_v16 = vpop.f32.mrf.mxu1 }
 0x37f   : > { %v1881_v17 = vpop.f32.mrf.mxu1 }
 0x381   : > { %v1883_v14 = vpop.f32.mrf.mxu1 }
 0x383   : > { %v1885_v2 = vpop.f32.mrf.mxu1 }
 0x3a1   : > { %v1836_v63 = vpop.f32.mrf.mxu0 }
 0x3a2   : > { %v1837_v36 = vadd.f32 %v1836_v63, %v1488_v32 }
 0x3a3   : > { %v1838_v42 = vpop.f32.mrf.mxu0  ;;  %v7098_v43 = vpop.f32.mrf.mxu1 }
 0x3a4   : > { %v1880_v44 = vadd.f32 %v1879_v16, %v1837_v36  ;;  %v1839_v31 = vadd.f32 %v1838_v42, %v1488_v32 }
 0x3a5   : > { %v1840_v45 = vpop.f32.mrf.mxu0  ;;  %v7099_v47 = vpop.f32.mrf.mxu1 }
 0x3a6   : > { %vm1970_vm0 = vcmp.ge.f32.partialorder %v1880_v44, 0.0  ;;  %v1976_v48 = vmul.f32 0.2, %v1880_v44  ;;  %v1882_v51 = vadd.f32 %v1881_v17, %v1839_v31  ;;  %v1841_v52 = vadd.f32 %v1840_v45, %v1493_v62 }
 0x3a7   : > { %v7100_v54 = vadd.f32 %v7099_v47, %v7098_v43  ;;  %v1842_v55 = vpop.f32.mrf.mxu0  ;;  %v7101_v56 = vpop.f32.mrf.mxu1 }
 0x3a8   : > { %vm1971_vm3 = vcmp.ge.f32.partialorder %v1882_v51, 0.0  ;;  %v1977_v39 = vmul.f32 0.2, %v1882_v51  ;;  %v1884_v58 = vadd.f32 %v1883_v14, %v1841_v52  ;;  %v1843_v59 = vadd.f32 %v1842_v55, %v1493_v62 }
 0x3a9   : > { %v1982_v60 = vsel %vm1970_vm0, %v1880_v44, %v1976_v48  ;;  %v7102_v1 = vpop.f32.mrf.mxu1  ;;  %v1923_v10 = vadd.f32 %v7100_v54, %v1488_v32 }
 0x3aa   : > { %vm1973_vm1 = vcmp.ge.f32.partialorder %v1884_v58, 0.0  ;;  %v1979_v61 = vmul.f32 0.2, %v1884_v58  ;;  %v1886_v5 = vadd.f32 %v1885_v2, %v1843_v59  ;;  %v1983_v6 = vsel %vm1971_vm3, %v1882_v51, %v1977_v39 }
 0x3ab   : > { %v7103_v8 = vadd.f32 %v7102_v1, %v7101_v56  ;;  %v1988_v7 = vmul.f32 %v1982_v60, %v8039_v49  ;;  %v1989_v9 = vmul.f32 %v1983_v6, %v8041_v50  ;;  %v1963_v11 = vpop.f32.mrf.mxu1 }
 0x3ac   : > { %vm1974_vm6 = vcmp.ge.f32.partialorder %v1886_v5, 0.0  ;;  %v1980_v4 = vmul.f32 0.2, %v1886_v5  ;;  %v1985_v12 = vsel %vm1973_vm1, %v1884_v58, %v1979_v61  ;;  %v1964_v13 = vadd.f32 %v1963_v11, %v1923_v10  ;;  %v2408_v10 = vld [vmem:[%s9141_s7] sm:$0xff]  ;;  %v2409_v11 = vld [vmem:[%s9141_s7 + $0x8] sm:$0xff] }
 0x3ad   : > { %v7070_v15 = vpack.c.bf16 %v1989_v9, %v1988_v7  ;;  %v7251_v20 = vpop.f32.mrf.mxu1  ;;  %v1926_v24 = vadd.f32 %v7103_v8, %v1493_v62  ;;  %v1991_v28 = vmul.f32 %v1985_v12, %v8039_v49  ;;  %v7435_v7 = vld [vmem:[%s9140_s6 + $0xc] ss:$16 sps:$4 sm:$0xff]   ;;  %vm9161_vm1 = vcmask 752640  }
 0x3ae   : > { %v1986_v25 = vsel %vm1974_vm6, %v1886_v5, %v1980_v4  ;;  %vm1972_vm0 = vcmp.ge.f32.partialorder %v1964_v13, 0.0  ;;  %v1978_v53 = vmul.f32 0.2, %v1964_v13  ;;  %vm2871_vm6 = vcmask 392192  }
 0x3af   : > { %2010 = vrot.lane.b32.xlu1 %v7070_v15, %s7727_s22  ;;  %v1992_v29 = vmul.f32 %v1986_v25, %v8041_v50  ;;  %v1966_v30 = vpop.f32.mrf.mxu1  ;;  %6775 = vmatprep.mubr.msk.bf16.mxu1 %vm2871_vm6, %v7435_v7 }
 0x3b0   : > { %v1984_v33 = vsel %vm1972_vm0, %v1964_v13, %v1978_v53  ;;  %v1967_v34 = vadd.f32 %v1966_v30, %v1926_v24  ;;  %6774 = vmatprep.mubr.msk.bf16.mxu0 %vm2871_vm6, %v7435_v7  ;;  %vm9162_vm0 = vmmov %vm9161_vm1 }
 0x3b1   : > { %v7072_v37 = vpack.c.bf16 %v1992_v29, %v1991_v28  ;;  %v7252_v38 = vpop.f32.mrf.mxu1  ;;  %v1990_v40 = vmul.f32 %v1984_v33, %v8051_v57 }
 0x3b2   : > { %vm1975_vm3 = vcmp.ge.f32.partialorder %v1967_v34, 0.0  ;;  %v1981_v41 = vmul.f32 0.2, %v1967_v34 }
 0x3b3   : > { %2014 = vrot.lane.b32.xlu0 %v7072_v37, %s7727_s22  ;;  %v7071_v27 = vpack.c.bf16 %v1990_v40, %v1990_v40 }
 0x3b4   : > { %v1987_v3 = vsel %vm1975_vm3, %v1967_v34, %v1981_v41 }
 0x3b5   : > { %2012 = vrot.lane.b32.xlu1 %v7071_v27, %s7727_s22  ;;  %v1993_v22 = vmul.f32 %v1987_v3, %v8051_v57 }
 0x3b7   : > { %v7073_v18 = vpack.c.bf16 %v1993_v22, %v1993_v22 }
 0x3b9   : > { %2016 = vrot.lane.b32.xlu0 %v7073_v18, %s7727_s22 }
 0x421   : > { %v2011_v19 = vpop.permute.xlu1 %2010 }
 0x422   : > { %v2018_v35 = vrot.slane %v2011_v19, 4 }
 0x424   : > { %v2020_v16 = vsel %vm1126_vm13, %v2018_v35, %v2011_v19 }
 0x425   : > { %2028 = vst.msk [vmem:[#allocation2 + $0x30] sm:$0xff] %vm8064_vm14, %v2020_v16  ;;  %v2015_v17 = vpop.permute.xlu0 %2014 }
 0x426   : > { %v2019_v14 = vrot.slane %v2015_v17, 4 }
 0x427   : > { %v2013_v63 = vpop.permute.xlu1 %2012 }
 0x428   : > { %v2022_v32 = vsel %vm1126_vm13, %v2019_v14, %v2015_v17  ;;  %v2021_v2 = vsel %vm1126_vm13, %v2018_v35, %v2013_v63 }
 0x429   : > { %2030 = vst.msk [vmem:[#allocation2 + $0x3c] sm:$0xff] %vm8064_vm14, %v2022_v32 }
 0x42a   : > { %2029 = vst.msk [vmem:[#allocation2 + $0x38] sm:$0xf] %vm1139_vm15, %v2021_v2 }
 0x42b   : > { %v2017_v36 = vpop.permute.xlu0 %2016 }
 0x42c   : > { %v2168_v42 = vld [vmem:[#allocation2 + $0x30] sm:$0xff]  ;;  %v2023_v43 = vsel %vm1126_vm13, %v2019_v14, %v2017_v36 }
 0x42d   : > { %2176 = vrot.lane.b32.xlu1 %v2168_v42, %s9156_s16  ;;  %2036 = vst [vmem:[#allocation3 + $0x1b0] sm:$0xff] %v2168_v42  ;;  %2031 = vst.msk [vmem:[#allocation2 + $0x44] sm:$0xf] %vm1139_vm15, %v2023_v43 }
 0x430   : > { %v2170_v44 = vld [vmem:[#allocation2 + $0x3c] sm:$0xff] }
 0x431   : > { %v2033_v31 = vld [vmem:[#allocation2 + $0x38] sm:$0xf]  ;;  %2144 = vrot.lane.b32.xlu1 %v2168_v42, %s7722_s17  ;;  %2038 = vst [vmem:[#allocation3 + $0x1bc] sm:$0xff] %v2170_v44  ;;  %v8328_v45 = vcombine.low %v2168_v42, %v2170_v44  ;;  %v8330_v47 = vcombine.high %v2168_v42, %v2170_v44 }
 0x432   : > { %v2169_v62 = vld [vmem:[#allocation2 + $0x38] sm:$0xf]  ;;  %2037 = vst.msk [vmem:[#allocation3 + $0x1b8] sm:$0xf] %vm500_vm2, %v2033_v31 }
 0x433   : > { %2178 = vrot.lane.b32.xlu0 %v2169_v62, %s9156_s16  ;;  %v2137_v51 = vld [vmem:[#allocation2 + $0x38] sm:$0xf] }
 0x434   : > { %v2035_v48 = vld [vmem:[#allocation2 + $0x44] sm:$0xf]  ;;  %v2105_v52 = vld [vmem:[#allocation2 + $0x38] sm:$0xf] }
 0x435   : > { %2112 = vrot.lane.b32.xlu1 %v2168_v42, %s7723_s18  ;;  %2039 = vst.msk [vmem:[#allocation3 + $0x1c4] sm:$0xf] %vm500_vm2, %v2035_v48  ;;  %v2073_v54 = vld [vmem:[#allocation2 + $0x38] sm:$0xf]  ;;  %v2171_v56 = vld [vmem:[#allocation2 + $0x44] sm:$0xf] }
 0x436   : > { %v2041_v55 = vld [vmem:[#allocation2 + $0x38] sm:$0xf]  ;;  %v2139_v39 = vld [vmem:[#allocation2 + $0x44] sm:$0xf] }
 0x437   : > { %2146 = vrot.lane.b32.xlu0 %v2137_v51, %s7722_s17  ;;  %v2107_v58 = vld [vmem:[#allocation2 + $0x44] sm:$0xf]  ;;  %v2265_v1 = vld [vmem:[#allocation2 + $0x38] sm:$0xf] }
 0x438   : > { %v2075_v59 = vld [vmem:[#allocation2 + $0x44] sm:$0xf]  ;;  %v2233_v61 = vld [vmem:[#allocation2 + $0x38] sm:$0xf] }
 0x439   : > { %2080 = vrot.lane.b32.xlu1 %v2168_v42, %s7724_s19  ;;  %v2043_v60 = vld [vmem:[#allocation2 + $0x44] sm:$0xf]  ;;  %v2201_v5 = vld [vmem:[#allocation2 + $0x38] sm:$0xf] }
 0x43a   : > { %v2267_v6 = vld [vmem:[#allocation2 + $0x44] sm:$0xf] }
 0x43b   : > { %2114 = vrot.lane.b32.xlu0 %v2105_v52, %s7723_s18  ;;  %v2235_v8 = vld [vmem:[#allocation2 + $0x44] sm:$0xf] }
 0x43c   : > { %v2203_v9 = vld [vmem:[#allocation2 + $0x44] sm:$0xf] }
 0x43d   : > { %2048 = vrot.lane.b32.xlu1 %v2168_v42, %s7725_s20 }
 0x43f   : > { %2082 = vrot.lane.b32.xlu0 %v2073_v54, %s7724_s19 }
 0x441   : > { %2180 = vrot.lane.b32.xlu1 %v2170_v44, %s9156_s16 }
 0x443   : > { %2050 = vrot.lane.b32.xlu0 %v2041_v55, %s7725_s20 }
 0x445   : > { %2148 = vrot.lane.b32.xlu1 %v2170_v44, %s7722_s17 }
 0x447   : > { %2182 = vrot.lane.b32.xlu0 %v2171_v56, %s9156_s16  ;;  %s9163_s16 = smov 108  }
 0x449   : > { %2116 = vrot.lane.b32.xlu1 %v2170_v44, %s7723_s18 }
 0x44b   : > { %2150 = vrot.lane.b32.xlu0 %v2139_v39, %s7722_s17 }
 0x44d   : > { %2084 = vrot.lane.b32.xlu1 %v2170_v44, %s7724_s19 }
 0x44f   : > { %2118 = vrot.lane.b32.xlu0 %v2107_v58, %s7723_s18 }
 0x451   : > { %2052 = vrot.lane.b32.xlu1 %v2170_v44, %s7725_s20 }
 0x453   : > { %2086 = vrot.lane.b32.xlu0 %v2075_v59, %s7724_s19 }
 0x455   : > { %2272 = vrot.lane.b32.xlu1 %v2168_v42, %s7726_s21 }
 0x457   : > { %2054 = vrot.lane.b32.xlu0 %v2043_v60, %s7725_s20 }
 0x459   : > { %2276 = vrot.lane.b32.xlu1 %v2170_v44, %s7726_s21 }
 0x45b   : > { %2274 = vrot.lane.b32.xlu0 %v2265_v1, %s7726_s21 }
 0x45d   : > { %2240 = vrot.lane.b32.xlu1 %v2168_v42, %s7719_s14 }
 0x45f   : > { %2242 = vrot.lane.b32.xlu0 %v2233_v61, %s7719_s14 }
 0x461   : > { %2244 = vrot.lane.b32.xlu1 %v2170_v44, %s7719_s14 }
 0x463   : > { %2210 = vrot.lane.b32.xlu0 %v2201_v5, %s9160_s23 }
 0x465   : > { %2208 = vrot.lane.b32.xlu1 %v2168_v42, %s9160_s23 }
 0x467   : > { %2278 = vrot.lane.b32.xlu0 %v2267_v6, %s7726_s21 }
 0x469   : > { %2212 = vrot.lane.b32.xlu1 %v2170_v44, %s9160_s23 }
 0x46b   : > { %2246 = vrot.lane.b32.xlu0 %v2235_v8, %s7719_s14 }
 0x46d   : > { %2412 = vperm.xlu1 %7353, %v2408_v10  }
 0x46f   : > { %2214 = vrot.lane.b32.xlu0 %v2203_v9, %s9160_s23 }
 0x473   : > { %2417 = vperm.xlu0 %7352, %v2409_v11  }
 0x49f   : > { %v2177_v4 = vpop.permute.xlu1 %2176 }
 0x4a0   : > { %v2184_v15 = vrot.slane %v2177_v4, 4 }
 0x4a3   : > { %v2145_v12 = vpop.permute.xlu1 %2144 }
 0x4a4   : > { %v2152_v29 = vrot.slane %v2145_v12, 4 }
 0x4a5   : > { %v2179_v13 = vpop.permute.xlu0 %2178 }
 0x4a6   : > { %v2185_v20 = vrot.slane %v2179_v13, 4  ;;  %2197 = vst.msk [vmem:[#allocation3 + $0x230] sm:$0xf] %vm500_vm2, %v2179_v13 }
 0x4a7   : > { %v2113_v25 = vpop.permute.xlu1 %2112 }
 0x4a8   : > { %v2188_v24 = vsel %vm524_vm4, %v2184_v15, %v2185_v20  ;;  %v2120_v40 = vrot.slane %v2113_v25, 4 }
 0x4a9   : > { %v2189_v53 = vsel %vm658_vm7, %v2177_v4, %v2188_v24  ;;  %v2147_v28 = vpop.permute.xlu0 %2146 }
 0x4aa   : > { %2196 = vst [vmem:[#allocation3 + $0x228] sm:$0xff] %v2189_v53  ;;  %v2153_v30 = vrot.slane %v2147_v28, 4  ;;  %2165 = vst.msk [vmem:[#allocation3 + $0x218] sm:$0xf] %vm500_vm2, %v2147_v28 }
 0x4ab   : > { %v2081_v34 = vpop.permute.xlu1 %2080 }
 0x4ac   : > { %v2156_v33 = vsel %vm524_vm4, %v2152_v29, %v2153_v30  ;;  %v2088_v19 = vrot.slane %v2081_v34, 4 }
 0x4ad   : > { %v2157_v37 = vsel %vm625_vm8, %v2145_v12, %v2156_v33  ;;  %v2115_v38 = vpop.permute.xlu0 %2114 }
 0x4ae   : > { %2164 = vst [vmem:[#allocation3 + $0x210] sm:$0xff] %v2157_v37  ;;  %v2121_v41 = vrot.slane %v2115_v38, 4  ;;  %2133 = vst.msk [vmem:[#allocation3 + $0x200] sm:$0xf] %vm500_vm2, %v2115_v38 }
 0x4af   : > { %v2049_v3 = vpop.permute.xlu1 %2048 }
 0x4b0   : > { %v2124_v27 = vsel %vm524_vm4, %v2120_v40, %v2121_v41  ;;  %v2056_v63 = vrot.slane %v2049_v3, 4 }
 0x4b1   : > { %v2125_v22 = vsel %vm592_vm9, %v2113_v25, %v2124_v27  ;;  %v2083_v18 = vpop.permute.xlu0 %2082 }
 0x4b2   : > { %2132 = vst [vmem:[#allocation3 + $0x1f8] sm:$0xff] %v2125_v22  ;;  %v2089_v35 = vrot.slane %v2083_v18, 4  ;;  %2101 = vst.msk [vmem:[#allocation3 + $0x1e8] sm:$0xf] %vm500_vm2, %v2083_v18 }
 0x4b3   : > { %v2181_v17 = vpop.permute.xlu1 %2180 }
 0x4b4   : > { %v2092_v16 = vsel %vm524_vm4, %v2088_v19, %v2089_v35  ;;  %v2186_v31 = vrot.slane %v2181_v17, 4 }
 0x4b5   : > { %v8385_v14 = vsel %vm559_vm10, %v2081_v34, %v2092_v16  ;;  %v2051_v32 = vpop.permute.xlu0 %2050 }
 0x4b6   : > { %2100 = vst [vmem:[#allocation3 + $0x1e0] sm:$0xff] %v8385_v14  ;;  %v2057_v2 = vrot.slane %v2051_v32, 4  ;;  %2069 = vst.msk [vmem:[#allocation3 + $0x1d0] sm:$0xf] %vm500_vm2, %v2051_v32 }
 0x4b7   : > { %v2149_v42 = vpop.permute.xlu1 %2148 }
 0x4b8   : > { %v2060_v36 = vsel %vm524_vm4, %v2056_v63, %v2057_v2  ;;  %v2154_v55 = vrot.slane %v2149_v42, 4 }
 0x4b9   : > { %v8391_v43 = vsel %vm526_vm11, %v2049_v3, %v2060_v36  ;;  %v2183_v44 = vpop.permute.xlu0 %2182 }
 0x4ba   : > { %2068 = vst [vmem:[#allocation3 + $0x1c8] sm:$0xff] %v8391_v43  ;;  %v2187_v62 = vrot.slane %v2183_v44, 4  ;;  %2199 = vst.msk [vmem:[#allocation3 + $0x23c] sm:$0xf] %vm500_vm2, %v2183_v44 }
 0x4bb   : > { %v2117_v51 = vpop.permute.xlu1 %2116 }
 0x4bc   : > { %v2190_v48 = vsel %vm524_vm4, %v2186_v31, %v2187_v62  ;;  %v2122_v6 = vrot.slane %v2117_v51, 4  ;;  %v7423_v62 = vld [vmem:[#allocation3 + $0x1b8] ss:$12 sps:$4 sm:$0xff]  }
 0x4bd   : > { %v2191_v52 = vsel %vm658_vm7, %v2181_v17, %v2190_v48  ;;  %v2151_v54 = vpop.permute.xlu0 %2150  ;;  %v8454_v48 = vld [vmem:[#allocation3 + $0x19c] ss:$12 sps:$4 sm:$0xff]  }
 0x4be   : > { %2198 = vst [vmem:[#allocation3 + $0x234] sm:$0xff] %v2191_v52  ;;  %v2155_v56 = vrot.slane %v2151_v54, 4  ;;  %2167 = vst.msk [vmem:[#allocation3 + $0x224] sm:$0xf] %vm500_vm2, %v2151_v54  ;;  %v8398_v39 = vcombine.low %v2189_v53, %v2191_v52  ;;  %v8400_v58 = vcombine.high %v2189_v53, %v2191_v52  ;;  %v8460_v54 = vld [vmem:[#allocation3 + $0x198] ss:$12 sps:$4 sm:$0xff]  }
 0x4bf   : > { %v2085_v60 = vpop.permute.xlu1 %2084 }
 0x4c0   : > { %v2158_v59 = vsel %vm524_vm4, %v2154_v55, %v2155_v56  ;;  %2918 = vmatprep.subr.bf16.mxu0 %v8400_v58  ;;  %v2090_v15 = vrot.slane %v2085_v60, 4 }
 0x4c1   : > { %v2159_v1 = vsel %vm625_vm8, %v2149_v42, %v2158_v59  ;;  %v2119_v61 = vpop.permute.xlu0 %2118  ;;  %v7418_v5 = vld [vmem:[#allocation3 + $0x230] ss:$12 sps:$4 sm:$0xff]   ;;  %2919 = vmatpush1.bf16.msra.mxu0 %v8398_v39  ;;  %v7424_v59 = vld [vmem:[#allocation3 + $0x1a0] ss:$12 sps:$4 sm:$0xff]  }
 0x4c2   : > { %2166 = vst [vmem:[#allocation3 + $0x21c] sm:$0xff] %v2159_v1  ;;  %v2123_v8 = vrot.slane %v2119_v61, 4  ;;  %2135 = vst.msk [vmem:[#allocation3 + $0x20c] sm:$0xf] %vm500_vm2, %v2119_v61  ;;  %v8407_v10 = vcombine.low %v2157_v37, %v2159_v1  ;;  %v8409_v7 = vcombine.high %v2157_v37, %v2159_v1  ;;  %3003 = vmatpush1.bf16.msra.mxu1 %v7418_v5 }
 0x4c3   : > { %3004 = vmatprep.subr.bf16.mxu1 %v7718_v0  ;;  %v2053_v11 = vpop.permute.xlu1 %2052 }
 0x4c4   : > { %v2126_v9 = vsel %vm524_vm4, %v2122_v6, %v2123_v8  ;;  %2920 = vmatprep.subr.bf16.mxu0 %v8409_v7  ;;  %v2058_v34 = vrot.slane %v2053_v11, 4 }
 0x4c5   : > { %v2127_v4 = vsel %vm592_vm9, %v2117_v51, %v2126_v9  ;;  %v2087_v12 = vpop.permute.xlu0 %2086  ;;  %v7419_v13 = vld [vmem:[#allocation3 + $0x218] ss:$12 sps:$4 sm:$0xff]   ;;  %2921 = vmatpush1.bf16.msra.mxu0 %v8407_v10  ;;  %v8469_v9 = vld [vmem:[#allocation3 + $0x180] ss:$12 sps:$4 sm:$0xff]  }
 0x4c6   : > { %2134 = vst [vmem:[#allocation3 + $0x204] sm:$0xff] %v2127_v4  ;;  %v2091_v20 = vrot.slane %v2087_v12, 4  ;;  %2103 = vst.msk [vmem:[#allocation3 + $0x1f4] sm:$0xf] %vm500_vm2, %v2087_v12  ;;  %v8417_v24 = vcombine.low %v2125_v22, %v2127_v4  ;;  %v8419_v25 = vcombine.high %v2125_v22, %v2127_v4  ;;  %3005 = vmatpush1.bf16.msra.mxu1 %v7419_v13  ;;  %v7428_v12 = vld [vmem:[#allocation3 + $0x188] ss:$12 sps:$4 sm:$0xff]  }
 0x4c7   : > { %3006 = vmatprep.subr.bf16.mxu1 %v7718_v0  ;;  %v2273_v28 = vpop.permute.xlu1 %2272 }
 0x4c8   : > { %v2094_v53 = vsel %vm524_vm4, %v2090_v15, %v2091_v20  ;;  %2922 = vmatprep.subr.bf16.mxu0 %v8419_v25  ;;  %v2280_v19 = vrot.slane %v2273_v28, 4 }
 0x4c9   : > { %v2095_v29 = vsel %vm559_vm10, %v2085_v60, %v2094_v53  ;;  %v2055_v30 = vpop.permute.xlu0 %2054  ;;  %v7420_v33 = vld [vmem:[#allocation3 + $0x200] ss:$12 sps:$4 sm:$0xff]   ;;  %2923 = vmatpush1.bf16.msra.mxu0 %v8417_v24  ;;  %v8463_v60 = vld [vmem:[#allocation3 + $0x184] ss:$12 sps:$4 sm:$0xff]  }
 0x4ca   : > { %2102 = vst [vmem:[#allocation3 + $0x1ec] sm:$0xff] %v2095_v29  ;;  %v2059_v37 = vrot.slane %v2055_v30, 4  ;;  %2071 = vst.msk [vmem:[#allocation3 + $0x1dc] sm:$0xf] %vm500_vm2, %v2055_v30  ;;  %v8428_v38 = vcombine.low %v8385_v14, %v2095_v29  ;;  %v8431_v40 = vcombine.high %v8385_v14, %v2095_v29  ;;  %3007 = vmatpush1.bf16.msra.mxu1 %v7420_v33 }
 0x4cb   : > { %3008 = vmatprep.subr.bf16.mxu1 %v7718_v0  ;;  %v2277_v27 = vpop.permute.xlu1 %2276 }
 0x4cc   : > { %v2062_v41 = vsel %vm524_vm4, %v2058_v34, %v2059_v37  ;;  %2924 = vmatprep.subr.bf16.mxu0 %v8431_v40  ;;  %v2282_v5 = vrot.slane %v2277_v27, 4 }
 0x4cd   : > { %v2063_v3 = vsel %vm526_vm11, %v2053_v11, %v2062_v41  ;;  %v2275_v22 = vpop.permute.xlu0 %2274  ;;  %v7421_v18 = vld [vmem:[#allocation3 + $0x1e8] ss:$12 sps:$4 sm:$0xff]   ;;  %2925 = vmatpush1.bf16.msra.mxu0 %v8428_v38 }
 0x4ce   : > { %2070 = vst [vmem:[#allocation3 + $0x1d4] sm:$0xff] %v2063_v3  ;;  %v2281_v35 = vrot.slane %v2275_v22, 4  ;;  %2293 = vst.msk [vmem:[#allocation3 + $0x278] sm:$0xf] %vm500_vm2, %v2275_v22  ;;  %v8440_v16 = vcombine.low %v8391_v43, %v2063_v3  ;;  %v8443_v17 = vcombine.high %v8391_v43, %v2063_v3  ;;  %3009 = vmatpush1.bf16.msra.mxu1 %v7421_v18 }
 0x4cf   : > { %3010 = vmatprep.subr.bf16.mxu1 %v7718_v0  ;;  %v2241_v32 = vpop.permute.xlu1 %2240 }
 0x4d0   : > { %v2284_v14 = vsel %vm524_vm4, %v2280_v19, %v2281_v35  ;;  %2926 = vmatprep.subr.bf16.mxu0 %v8443_v17  ;;  %v2248_v36 = vrot.slane %v2241_v32, 4 }
 0x4d1   : > { %v2285_v63 = vsel %vm757_vm12, %v2273_v28, %v2284_v14  ;;  %v2243_v2 = vpop.permute.xlu0 %2242  ;;  %v7422_v42 = vld [vmem:[#allocation3 + $0x1d0] ss:$12 sps:$4 sm:$0xff]   ;;  %2927 = vmatpush1.bf16.msra.mxu0 %v8440_v16 }
 0x4d2   : > { %2292 = vst [vmem:[#allocation3 + $0x270] sm:$0xff] %v2285_v63  ;;  %v2249_v44 = vrot.slane %v2243_v2, 4  ;;  %2261 = vst.msk [vmem:[#allocation3 + $0x260] sm:$0xf] %vm500_vm2, %v2243_v2  ;;  %2928 = vmatprep.subr.bf16.mxu0 %v8330_v47  ;;  %3011 = vmatpush1.bf16.msra.mxu1 %v7422_v42  ;;  %v7437_v2 = vld [vmem:[%s9140_s6 + $0x8] ss:$16 sps:$4 sm:$0xff]  }
 0x4d3   : > { %3012 = vmatprep.subr.bf16.mxu1 %v7718_v0  ;;  %v2245_v31 = vpop.permute.xlu1 %2244 }
 0x4d4   : > { %v2252_v43 = vsel %vm524_vm4, %v2248_v36, %v2249_v44  ;;  %v2250_v20 = vrot.slane %v2245_v31, 4  ;;  %v7438_v36 = vld [vmem:[#allocation3 + $0x170] ss:$12 sps:$4 sm:$0xff]  }
 0x4d5   : > { %v2253_v51 = vsel %vm724_vm5, %v2241_v32, %v2252_v43  ;;  %v2211_v52 = vpop.permute.xlu0 %2210  ;;  %2929 = vmatpush1.bf16.msra.mxu0 %v8328_v45  ;;  %v7439_v44 = vld [vmem:[#allocation3 + $0xb0] ss:$12 sps:$4 sm:$0xff]   ;;  %v7440_v43 = vld [vmem:[#allocation3 + $0x158] ss:$12 sps:$4 sm:$0xff]  }
 0x4d6   : > { %2260 = vst [vmem:[#allocation3 + $0x258] sm:$0xff] %v2253_v51  ;;  %2229 = vst.msk [vmem:[#allocation3 + $0x248] sm:$0xf] %vm500_vm2, %v2211_v52  ;;  %2930 = vmatprep.subr.bf16.mxu0 %v8454_v48  ;;  %3013 = vmatpush1.bf16.msra.mxu1 %v7423_v62  ;;  %v2217_v55 = vrot.slane %v2211_v52, 4  ;;  %v7442_v62 = vld [vmem:[#allocation3 + $0x140] ss:$12 sps:$4 sm:$0xff]  }
 0x4d7   : > { %3014 = vmatprep.subr.bf16.mxu1 %v7718_v0  ;;  %v2209_v56 = vpop.permute.xlu1 %2208  ;;  %v7453_v52 = vld [vmem:[#allocation3 + $0x8] ss:$12 sps:$4 sm:$0xff]  }
 0x4d8   : > { %v2216_v61 = vrot.slane %v2209_v56, 4 }
 0x4d9   : > { %v2279_v1 = vpop.permute.xlu0 %2278  ;;  %2931 = vmatpush1.bf16.msra.mxu0 %v8460_v54 }
 0x4da   : > { %v2283_v6 = vrot.slane %v2279_v1, 4  ;;  %2295 = vst.msk [vmem:[#allocation3 + $0x284] sm:$0xf] %vm500_vm2, %v2279_v1  ;;  %2932 = vmatprep.subr.bf16.mxu0 %v8463_v60  ;;  %v2220_v8 = vsel %vm524_vm4, %v2216_v61, %v2217_v55  ;;  %3015 = vmatpush1.bf16.msra.mxu1 %v7424_v59  ;;  %v7460_v55 = vld [vmem:[#allocation3 + $0x78] ss:$12 sps:$4 sm:$0xff]  }
 0x4db   : > { %v2221_v4 = vsel %vm9161_vm1, %v2209_v56, %v2220_v8  ;;  %3016 = vmatprep.subr.bf16.mxu1 %v7718_v0  ;;  %v2213_v30 = vpop.permute.xlu1 %2212  ;;  %v7465_v56 = vld [vmem:[#allocation3 + $0x64] ss:$12 sps:$4 sm:$0xff]   ;;  %v7468_v59 = vld [vmem:[#allocation3 + $0x4c] ss:$12 sps:$4 sm:$0xff]   ;;  %v7471_v1 = vld [vmem:[#allocation3 + $0x34] ss:$12 sps:$4 sm:$0xff]  }
 0x4dc   : > { %v2286_v11 = vsel %vm524_vm4, %v2282_v5, %v2283_v6  ;;  %2228 = vst [vmem:[#allocation3 + $0x240] sm:$0xff] %v2221_v4  ;;  %v7474_v61 = vld [vmem:[#allocation3 + $0x1c] ss:$12 sps:$4 sm:$0xff]   ;;  %v7477_v5 = vld [vmem:[#allocation3 + $0x4] ss:$12 sps:$4 sm:$0xff]  }
 0x4dd   : > { %v2287_v13 = vsel %vm757_vm12, %v2277_v27, %v2286_v11  ;;  %v2247_v15 = vpop.permute.xlu0 %2246  ;;  %2933 = vmatpush1.bf16.msra.mxu0 %v8469_v9  ;;  %v2218_v27 = vrot.slane %v2213_v30, 4  ;;  %v7472_v6 = vld [vmem:[#allocation3 + $0x18] ss:$12 sps:$4 sm:$0xff]   ;;  %v7475_v8 = vld [vmem:[#allocation3] ss:$12 sps:$4 sm:$0xff]  }
 0x4de   : > { %2294 = vst [vmem:[#allocation3 + $0x27c] sm:$0xff] %v2287_v13  ;;  %v2251_v53 = vrot.slane %v2247_v15, 4  ;;  %2263 = vst.msk [vmem:[#allocation3 + $0x26c] sm:$0xf] %vm500_vm2, %v2247_v15  ;;  %v6771_v28 = vcombine.low %v2285_v63, %v2287_v13  ;;  %v6772_v29 = vcombine.high %v2285_v63, %v2287_v13  ;;  %3017 = vmatpush1.bf16.msra.mxu1 %v7428_v12  ;;  %v7478_v11 = vld [vmem:[#allocation3 + $0x168] ss:$12 sps:$4 sm:$0xff]  }
 0x4df   : > { %3028 = vmatprep.subr.bf16.mxu1 %v7718_v0  ;;  %v7481_v12 = vld [vmem:[#allocation3 + $0x150] ss:$12 sps:$4 sm:$0xff]   ;;  %v7484_v15 = vld [vmem:[#allocation3 + $0x138] ss:$12 sps:$4 sm:$0xff]  }
 0x4e0   : > { %v2254_v33 = vsel %vm524_vm4, %v2250_v20, %v2251_v53  ;;  %2944 = vmatprep.subr.bf16.mxu0 %v6772_v29  ;;  %v7486_v13 = vld [vmem:[#allocation3 + $0x13c] ss:$12 sps:$4 sm:$0xff]   ;;  %v7489_v20 = vld [vmem:[#allocation3 + $0x124] ss:$12 sps:$4 sm:$0xff]   ;;  %v7487_v53 = vld [vmem:[#allocation3 + $0x120] ss:$12 sps:$4 sm:$0xff]  }
 0x4e1   : > { %v2255_v34 = vsel %vm724_vm5, %v2245_v31, %v2254_v33  ;;  %v2215_v37 = vpop.permute.xlu0 %2214  ;;  %v7432_v41 = vld [vmem:[#allocation3 + $0x278] ss:$12 sps:$4 sm:$0xff]   ;;  %2945 = vmatpush2.bf16.msra.mxu0 %v6771_v28  ;;  %v7490_v29 = vld [vmem:[#allocation3 + $0x108] ss:$12 sps:$4 sm:$0xff]   ;;  %v7493_v33 = vld [vmem:[#allocation3 + $0xf0] ss:$12 sps:$4 sm:$0xff]  }
 0x4e2   : > { %2262 = vst [vmem:[#allocation3 + $0x264] sm:$0xff] %v2255_v34  ;;  %v2219_v3 = vrot.slane %v2215_v37, 4  ;;  %2231 = vst.msk [vmem:[#allocation3 + $0x254] sm:$0xf] %vm500_vm2, %v2215_v37  ;;  %v6768_v22 = vcombine.low %v2253_v51, %v2255_v34  ;;  %v6769_v18 = vcombine.high %v2253_v51, %v2255_v34  ;;  %3029 = vmatpush2.bf16.msra.mxu1 %v7432_v41  ;;  %v7441_v31 = vld [vmem:[#allocation3 + $0x98] ss:$12 sps:$4 sm:$0xff]  }
 0x4e3   : > { %3030 = vmatprep.subr.bf16.mxu1 %v7718_v0  ;;  %v7443_v51 = vld [vmem:[#allocation3 + $0x80] ss:$12 sps:$4 sm:$0xff]   ;;  %v7498_v34 = vld [vmem:[#allocation3 + $0xdc] ss:$12 sps:$4 sm:$0xff]   ;;  %v7496_v37 = vld [vmem:[#allocation3 + $0xd8] ss:$12 sps:$4 sm:$0xff]  }
 0x4e4   : > { %v2222_v19 = vsel %vm524_vm4, %v2218_v27, %v2219_v3  ;;  %2946 = vmatprep.subr.bf16.mxu0 %v6769_v18  ;;  %v7492_v28 = vld [vmem:[#allocation3 + $0x10c] ss:$12 sps:$4 sm:$0xff]   ;;  %v7501_v41 = vld [vmem:[#allocation3 + $0xc4] ss:$12 sps:$4 sm:$0xff]   ;;  %v2909_v3 = vpop.f32.mrf.mxu1 }
 0x4e5   : > { %v2223_v35 = vsel %vm9162_vm0, %v2213_v30, %v2222_v19  ;;  %v7433_v14 = vld [vmem:[#allocation3 + $0x260] ss:$12 sps:$4 sm:$0xff]   ;;  %2947 = vmatpush2.bf16.msra.mxu0 %v6768_v22 }
 0x4e6   : > { %2230 = vst [vmem:[#allocation3 + $0x24c] sm:$0xff] %v2223_v35  ;;  %v6765_v32 = vcombine.low %v2221_v4, %v2223_v35  ;;  %v6766_v63 = vcombine.high %v2221_v4, %v2223_v35  ;;  %3031 = vmatpush2.bf16.msra.mxu1 %v7433_v14  ;;  %v7483_v4 = vld [vmem:[#allocation3 + $0x154] ss:$12 sps:$4 sm:$0xff]   ;;  %v2911_v22 = vpop.f32.mrf.mxu1 }
 0x4e7   : > { %3032 = vmatprep.subr.bf16.mxu1 %v7718_v0  ;;  %v7495_v30 = vld [vmem:[#allocation3 + $0xf4] ss:$12 sps:$4 sm:$0xff]  }
 0x4e8   : > { %2948 = vmatprep.subr.bf16.mxu0 %v6766_v63  ;;  %v7499_v27 = vld [vmem:[#allocation3 + $0xc0] ss:$12 sps:$4 sm:$0xff]   ;;  %v2913_v18 = vpop.f32.mrf.mxu1  ;;  %v2413_v19 = vpop.permute.xlu1 %2412 }
 0x4e9   : > { %v7434_v42 = vld [vmem:[#allocation3 + $0x248] ss:$12 sps:$4 sm:$0xff]   ;;  %2949 = vmatpush2.bf16.msra.mxu0 %v6765_v32  ;;  %v2910_v14 = vadd.f32 %v2909_v3, %v2413_v19 }
 0x4ea   : > { %7107 = vmatprep.subr.bf16.mxu0 %v7438_v36  ;;  %3033 = vmatpush2.bf16.msra.mxu1 %v7434_v42  ;;  %v2915_v35 = vpop.f32.mrf.mxu1  ;;  %v2912_v36 = vadd.f32 %v2911_v22, %v2413_v19 }
 0x4eb   : > { %4179 = vmatprep.subr.bf16.mxu1 %v8400_v58  ;;  %v7444_v58 = vld [vmem:[#allocation3 + $0x128] ss:$12 sps:$4 sm:$0xff]  }
 0x4ec   : > { %2951 = vmatmul.mubr.bf16.vlgmr.msra.gmra.mxu0 %v7437_v2 }
 0x4ed   : > { %7108 = vmatpush3.bf16.msra.mxu0 %v7439_v44  ;;  %2993 = vmatprep.mubr.bf16.mxu0 %v8302_v46  ;;  %v7445_v46 = vld [vmem:[#allocation3 + $0x68] ss:$12 sps:$4 sm:$0xff]  }
 0x4ee   : > { %3035 = vmatmul.mubr.bf16.vlgmr.msra.gmra.mxu1 %v7437_v2  ;;  %7109 = vmatprep.subr.bf16.mxu0 %v7440_v43  ;;  %v2418_v32 = vpop.permute.xlu0 %2417 }
 0x4ef   : > { %4180 = vmatpush1.bf16.msra.mxu1 %v8398_v39  ;;  %v7446_v39 = vld [vmem:[#allocation3 + $0x110] ss:$12 sps:$4 sm:$0xff]  }
 0x4f0   : > { %4181 = vmatprep.subr.bf16.mxu1 %v8409_v7  ;;  %v7447_v7 = vld [vmem:[#allocation3 + $0x50] ss:$12 sps:$4 sm:$0xff]  }
 0x4f1   : > { %7110 = vmatpush3.bf16.msra.mxu0 %v7441_v31 }
 0x4f2   : > { %7111 = vmatprep.subr.bf16.mxu0 %v7442_v62  ;;  %v2914_v62 = vadd.f32 %v2913_v18, %v2418_v32 }
 0x4f3   : > { %4182 = vmatpush1.bf16.msra.mxu1 %v8407_v10  ;;  %v7448_v10 = vld [vmem:[#allocation3 + $0xf8] ss:$12 sps:$4 sm:$0xff]  }
 0x4f4   : > { %4183 = vmatprep.subr.bf16.mxu1 %v8419_v25  ;;  %v7449_v25 = vld [vmem:[#allocation3 + $0x38] ss:$12 sps:$4 sm:$0xff]  }
 0x4f5   : > { %7112 = vmatpush3.bf16.msra.mxu0 %v7443_v51 }
 0x4f6   : > { %7113 = vmatprep.subr.bf16.mxu0 %v7444_v58  ;;  %v2916_v58 = vadd.f32 %v2915_v35, %v2418_v32 }
 0x4f7   : > { %4184 = vmatpush1.bf16.msra.mxu1 %v8417_v24  ;;  %v7450_v24 = vld [vmem:[#allocation3 + $0xe0] ss:$12 sps:$4 sm:$0xff]  }
 0x4f8   : > { %4185 = vmatprep.subr.bf16.mxu1 %v8431_v40  ;;  %v7451_v40 = vld [vmem:[#allocation3 + $0x20] ss:$12 sps:$4 sm:$0xff]  }
 0x4f9   : > { %7114 = vmatpush3.bf16.msra.mxu0 %v7445_v46 }
 0x4fa   : > { %7115 = vmatprep.subr.bf16.mxu0 %v7446_v39 }
 0x4fb   : > { %4186 = vmatpush1.bf16.msra.mxu1 %v8428_v38  ;;  %v7452_v38 = vld [vmem:[#allocation3 + $0xc8] ss:$12 sps:$4 sm:$0xff]  }
 0x4fc   : > { %4187 = vmatprep.subr.bf16.mxu1 %v8443_v17  ;;  %v7457_v17 = vld [vmem:[#allocation3 + $0x90] ss:$12 sps:$4 sm:$0xff]  }
 0x4fd   : > { %7116 = vmatpush3.bf16.msra.mxu0 %v7447_v7 }
 0x4fe   : > { %7117 = vmatprep.subr.bf16.mxu0 %v7448_v10 }
 0x4ff   : > { %4188 = vmatpush1.bf16.msra.mxu1 %v8440_v16  ;;  %v7456_v16 = vld [vmem:[#allocation3 + $0xac] ss:$12 sps:$4 sm:$0xff]  }
 0x500   : > { %4189 = vmatprep.subr.bf16.mxu1 %v8330_v47  ;;  %v7454_v47 = vld [vmem:[#allocation3 + $0xa8] ss:$12 sps:$4 sm:$0xff]  }
 0x501   : > { %7118 = vmatpush3.bf16.msra.mxu0 %v7449_v25 }
 0x502   : > { %7119 = vmatprep.subr.bf16.mxu0 %v7450_v24 }
 0x503   : > { %4190 = vmatpush1.bf16.msra.mxu1 %v8328_v45  ;;  %v7459_v45 = vld [vmem:[#allocation3 + $0x94] ss:$12 sps:$4 sm:$0xff]  }
 0x504   : > { %4191 = vmatprep.subr.bf16.mxu1 %v8454_v48  ;;  %v7462_v48 = vld [vmem:[#allocation3 + $0x7c] ss:$12 sps:$4 sm:$0xff]  }
 0x505   : > { %7120 = vmatpush3.bf16.msra.mxu0 %v7451_v40 }
 0x506   : > { %7121 = vmatprep.subr.bf16.mxu0 %v7452_v38 }
 0x507   : > { %4192 = vmatpush1.bf16.msra.mxu1 %v8460_v54  ;;  %v7463_v54 = vld [vmem:[#allocation3 + $0x60] ss:$12 sps:$4 sm:$0xff]  }
 0x508   : > { %4193 = vmatprep.subr.bf16.mxu1 %v8463_v60  ;;  %v7466_v60 = vld [vmem:[#allocation3 + $0x48] ss:$12 sps:$4 sm:$0xff]  }
 0x509   : > { %7122 = vmatpush3.bf16.msra.mxu0 %v7453_v52 }
 0x50a   : > { %4136 = vmatprep.subr.bf16.mxu0 %v7456_v16  ;;  %v8509_v16 = vld [vmem:[%s9142_s8 + $0x4] ss:$20 sps:$4 sm:$0xff]  }
 0x50b   : > { %4194 = vmatpush1.bf16.msra.mxu1 %v8469_v9  ;;  %v7480_v9 = vld [vmem:[#allocation3 + $0x16c] ss:$12 sps:$4 sm:$0xff]  }
 0x50c   : > { %2994 = vmatmul.mubr.bf16.vlgmr.msra.gmra.mxu0 %v8297_v26  ;;  %v7469_v26 = vld [vmem:[#allocation3 + $0x30] ss:$12 sps:$4 sm:$0xff]  }
 0x50d   : > { %4137 = vmatpush1.bf16.msra.mxu0 %v7454_v47  ;;  %4168 = vmatprep.mubr.bf16.mxu0 %v8509_v16 }
 0x50e   : > { %4138 = vmatprep.subr.bf16.mxu0 %v7459_v45 }
 0x511   : > { %4139 = vmatpush1.bf16.msra.mxu0 %v7457_v17 }
 0x512   : > { %4140 = vmatprep.subr.bf16.mxu0 %v7462_v48  ;;  %v8516_v48 = vld [vmem:[%s9142_s8] ss:$20 sps:$4 sm:$0xff]  }
 0x515   : > { %4141 = vmatpush1.bf16.msra.mxu0 %v7460_v55 }
 0x516   : > { %4142 = vmatprep.subr.bf16.mxu0 %v7465_v56 }
 0x519   : > { %4143 = vmatpush1.bf16.msra.mxu0 %v7463_v54 }
 0x51a   : > { %4144 = vmatprep.subr.bf16.mxu0 %v7468_v59 }
 0x51d   : > { %4145 = vmatpush1.bf16.msra.mxu0 %v7466_v60 }
 0x51e   : > { %4146 = vmatprep.subr.bf16.mxu0 %v7471_v1 }
 0x521   : > { %4147 = vmatpush1.bf16.msra.mxu0 %v7469_v26 }
 0x522   : > { %4148 = vmatprep.subr.bf16.mxu0 %v7474_v61 }
 0x525   : > { %4149 = vmatpush1.bf16.msra.mxu0 %v7472_v6 }
 0x526   : > { %4150 = vmatprep.subr.bf16.mxu0 %v7477_v5 }
 0x529   : > { %4151 = vmatpush1.bf16.msra.mxu0 %v7475_v8 }
 0x52a   : > { %4152 = vmatprep.subr.bf16.mxu0 %v7480_v9 }
 0x52d   : > { %4153 = vmatpush2.bf16.msra.mxu0 %v7478_v11 }
 0x52e   : > { %4154 = vmatprep.subr.bf16.mxu0 %v7483_v4 }
 0x531   : > { %4155 = vmatpush2.bf16.msra.mxu0 %v7481_v12 }
 0x532   : > { %4156 = vmatprep.subr.bf16.mxu0 %v7486_v13 }
 0x535   : > { %4157 = vmatpush2.bf16.msra.mxu0 %v7484_v15 }
 0x536   : > { %4158 = vmatprep.subr.bf16.mxu0 %v7489_v20 }
 0x539   : > { %4159 = vmatpush2.bf16.msra.mxu0 %v7487_v53 }
 0x53a   : > { %4160 = vmatprep.subr.bf16.mxu0 %v7492_v28 }
 0x53d   : > { %4161 = vmatpush2.bf16.msra.mxu0 %v7490_v29 }
 0x53e   : > { %4162 = vmatprep.subr.bf16.mxu0 %v7495_v30 }
 0x541   : > { %4163 = vmatpush2.bf16.msra.mxu0 %v7493_v33 }
 0x542   : > { %4164 = vmatprep.subr.bf16.mxu0 %v7498_v34 }
 0x545   : > { %4165 = vmatpush2.bf16.msra.mxu0 %v7496_v37 }
 0x546   : > { %4166 = vmatprep.subr.bf16.mxu0 %v7501_v41 }
 0x549   : > { %4167 = vmatpush2.bf16.msra.mxu0 %v7499_v27 }
 0x54c   : > { %4169 = vmatmul.mubr.bf16.vlgmr.msra.gmra.mxu0 %v8516_v48 }
 0x54d   : > { %4254 = vmatprep.mubr.bf16.mxu0 %v7718_v0 }
 0x5ac   : > { %v2952_v63 = vpop.f32.mrf.mxu0 }
 0x5ad   : > { %v2953_v2 = vadd.f32 %v2952_v63, %v2910_v14 }
 0x5ae   : > { %v2954_v42 = vpop.f32.mrf.mxu0  ;;  %v3036_v44 = vpop.f32.mrf.mxu1 }
 0x5af   : > { %vm3043_vm3 = vcmp.ge.f32.partialorder %v2953_v2, 0.0  ;;  %v3049_v43 = vmul.f32 0.2, %v2953_v2  ;;  %v2955_v31 = vadd.f32 %v2954_v42, %v2912_v36 }
 0x5b0   : > { %v2956_v51 = vpop.f32.mrf.mxu0  ;;  %v3038_v46 = vpop.f32.mrf.mxu1 }
 0x5b1   : > { %v3055_v39 = vsel %vm3043_vm3, %v2953_v2, %v3049_v43  ;;  %vm3044_vm6 = vcmp.ge.f32.partialorder %v2955_v31, 0.0  ;;  %v3050_v7 = vmul.f32 0.2, %v2955_v31  ;;  %v2957_v10 = vadd.f32 %v2956_v51, %v2914_v62 }
 0x5b2   : > { %v2958_v25 = vpop.f32.mrf.mxu0  ;;  %v3039_v24 = vpop.f32.mrf.mxu1  ;;  %v3061_v47 = vmul.f32 %v3055_v39, %v8039_v49 }
 0x5b3   : > { %v3056_v40 = vsel %vm3044_vm6, %v2955_v31, %v3050_v7  ;;  %vm3046_vm1 = vcmp.ge.f32.partialorder %v2957_v10, 0.0  ;;  %v3052_v38 = vmul.f32 0.2, %v2957_v10  ;;  %v2959_v52 = vadd.f32 %v2958_v25, %v2916_v58 }
 0x5b4   : > { %v3062_v45 = vmul.f32 %v3056_v40, %v8041_v50  ;;  %v3041_v17 = vpop.f32.mrf.mxu1 }
 0x5b5   : > { %v3058_v55 = vsel %vm3046_vm1, %v2957_v10, %v3052_v38  ;;  %vm3047_vm0 = vcmp.ge.f32.partialorder %v2959_v52, 0.0  ;;  %v3053_v56 = vmul.f32 0.2, %v2959_v52  ;;  %vm9164_vm1 = vcmask 752640  }
 0x5b6   : > { %v7074_v54 = vpack.c.bf16 %v3062_v45, %v3061_v47  ;;  %v3064_v60 = vmul.f32 %v3058_v55, %v8039_v49 }
 0x5b7   : > { %v3059_v59 = vsel %vm3047_vm0, %v2959_v52, %v3053_v56  ;;  %vm9165_vm0 = vmmov %vm9164_vm1 }
 0x5b8   : > { %v3065_v1 = vmul.f32 %v3059_v59, %v8041_v50  ;;  %3083 = vrot.lane.b32.xlu1 %v7074_v54, %s7727_s22  ;;  %v3520_v54 = vld [vmem:[%s9143_s9 + $0x8] sm:$0xff] }
 0x5b9   : > { %v8608_v59 = vld [vmem:[%s9142_s8 + $0xc] ss:$20 sps:$4 sm:$0xff]  }
 0x5ba   : > { %v7076_v26 = vpack.c.bf16 %v3065_v1, %v3064_v60  ;;  %4211 = vmatprep.mubr.bf16.mxu1 %v8608_v59 }
 0x5bc   : > { %3087 = vrot.lane.b32.xlu0 %v7076_v26, %s7727_s22 }
 0x5cc   : > { %v7123_v61 = vpop.f32.mrf.mxu0 }
 0x5ce   : > { %v7124_v5 = vpop.f32.mrf.mxu0 }
 0x5cf   : > { %v7125_v6 = vadd.f32 %v7124_v5, %v7123_v61 }
 0x5d0   : > { %v7126_v8 = vpop.f32.mrf.mxu0 }
 0x5d1   : > { %v2996_v9 = vadd.f32 %v7125_v6, %v2413_v19 }
 0x5d2   : > { %v7127_v11 = vpop.f32.mrf.mxu0 }
 0x5d3   : > { %v3037_v4 = vadd.f32 %v3036_v44, %v2996_v9  ;;  %v7128_v12 = vadd.f32 %v7127_v11, %v7126_v8 }
 0x5d5   : > { %vm3045_vm3 = vcmp.ge.f32.partialorder %v3037_v4, 0.0  ;;  %v3051_v13 = vmul.f32 0.2, %v3037_v4  ;;  %v2999_v15 = vadd.f32 %v7128_v12, %v2418_v32 }
 0x5d7   : > { %v3040_v20 = vadd.f32 %v3039_v24, %v2999_v15  ;;  %v3057_v53 = vsel %vm3045_vm3, %v3037_v4, %v3051_v13  ;;  %v3519_v24 = vld [vmem:[%s9143_s9] sm:$0xff] }
 0x5d8   : > { %v3063_v28 = vmul.f32 %v3057_v53, %v8051_v57 }
 0x5d9   : > { %vm3048_vm6 = vcmp.ge.f32.partialorder %v3040_v20, 0.0  ;;  %v3054_v29 = vmul.f32 0.2, %v3040_v20 }
 0x5da   : > { %v7075_v30 = vpack.c.bf16 %v3063_v28, %v3063_v28 }
 0x5db   : > { %v3060_v33 = vsel %vm3048_vm6, %v3040_v20, %v3054_v29 }
 0x5dc   : > { %3085 = vrot.lane.b32.xlu1 %v7075_v30, %s7727_s22  ;;  %v3066_v34 = vmul.f32 %v3060_v33, %v8051_v57 }
 0x5de   : > { %v7077_v37 = vpack.c.bf16 %v3066_v34, %v3066_v34 }
 0x5e0   : > { %3089 = vrot.lane.b32.xlu0 %v7077_v37, %s7727_s22 }
 0x62a   : > { %v3084_v41 = vpop.permute.xlu1 %3083 }
 0x62b   : > { %v3091_v27 = vrot.slane %v3084_v41, 4 }
 0x62d   : > { %v3093_v3 = vsel %vm1126_vm13, %v3091_v27, %v3084_v41 }
 0x62e   : > { %3101 = vst.msk [vmem:[#allocation2 + $0x48] sm:$0xff] %vm8064_vm14, %v3093_v3  ;;  %v3088_v22 = vpop.permute.xlu0 %3087 }
 0x62f   : > { %v3092_v18 = vrot.slane %v3088_v22, 4 }
 0x631   : > { %v3095_v19 = vsel %vm1126_vm13, %v3092_v18, %v3088_v22 }
 0x632   : > { %3103 = vst.msk [vmem:[#allocation2 + $0x54] sm:$0xff] %vm8064_vm14, %v3095_v19 }
 0x635   : > { %v8535_v35 = vld [vmem:[#allocation2 + $0x48] sm:$0xff] }
 0x636   : > { %3109 = vst [vmem:[#allocation3 + $0x288] sm:$0xff] %v8535_v35  ;;  %3217 = vrot.lane.b32.xlu1 %v8535_v35, %s7722_s17 }
 0x639   : > { %v8540_v14 = vld [vmem:[#allocation2 + $0x54] sm:$0xff] }
 0x63a   : > { %3111 = vst [vmem:[#allocation3 + $0x294] sm:$0xff] %v8540_v14  ;;  %3185 = vrot.lane.b32.xlu1 %v8535_v35, %s7723_s18  ;;  %v6866_v32 = vcombine.low %v8535_v35, %v8540_v14  ;;  %v6867_v63 = vcombine.high %v8535_v35, %v8540_v14 }
 0x63e   : > { %3345 = vrot.lane.b32.xlu1 %v8535_v35, %s7726_s21 }
 0x642   : > { %3153 = vrot.lane.b32.xlu1 %v8535_v35, %s7724_s19 }
 0x646   : > { %3313 = vrot.lane.b32.xlu1 %v8535_v35, %s7719_s14 }
 0x64a   : > { %3121 = vrot.lane.b32.xlu1 %v8535_v35, %s7725_s20 }
 0x64e   : > { %3281 = vrot.lane.b32.xlu1 %v8535_v35, %s9160_s23  ;;  %v3086_v2 = vpop.permute.xlu1 %3085 }
 0x64f   : > { %v3094_v36 = vsel %vm1126_vm13, %v3091_v27, %v3086_v2 }
 0x650   : > { %3102 = vst.msk [vmem:[#allocation2 + $0x50] sm:$0xf] %vm1139_vm15, %v3094_v36 }
 0x652   : > { %v3090_v42 = vpop.permute.xlu0 %3089  ;;  %3249 = vrot.lane.b32.xlu1 %v8535_v35, %s9163_s16  ;;  %v7508_v35 = vld [vmem:[#allocation3 + $0x258] ss:$12 sps:$4 sm:$0xff]  }
 0x653   : > { %v3096_v44 = vsel %vm1126_vm13, %v3092_v18, %v3090_v42 }
 0x654   : > { %3104 = vst.msk [vmem:[#allocation2 + $0x5c] sm:$0xf] %vm1139_vm15, %v3096_v44 }
 0x656   : > { %3221 = vrot.lane.b32.xlu1 %v8540_v14, %s7722_s17 }
 0x657   : > { %v3106_v43 = vld [vmem:[#allocation2 + $0x50] sm:$0xf] }
 0x658   : > { %v3210_v31 = vld [vmem:[#allocation2 + $0x50] sm:$0xf]  ;;  %3110 = vst.msk [vmem:[#allocation3 + $0x290] sm:$0xf] %vm500_vm2, %v3106_v43 }
 0x659   : > { %3219 = vrot.lane.b32.xlu0 %v3210_v31, %s7722_s17  ;;  %v3178_v51 = vld [vmem:[#allocation2 + $0x50] sm:$0xf] }
 0x65a   : > { %3189 = vrot.lane.b32.xlu1 %v8540_v14, %s7723_s18  ;;  %v3338_v58 = vld [vmem:[#allocation2 + $0x50] sm:$0xf] }
 0x65b   : > { %v3108_v62 = vld [vmem:[#allocation2 + $0x5c] sm:$0xf]  ;;  %v3146_v46 = vld [vmem:[#allocation2 + $0x50] sm:$0xf] }
 0x65c   : > { %3112 = vst.msk [vmem:[#allocation3 + $0x29c] sm:$0xf] %vm500_vm2, %v3108_v62  ;;  %v3306_v39 = vld [vmem:[#allocation2 + $0x50] sm:$0xf]  ;;  %v3212_v40 = vld [vmem:[#allocation2 + $0x5c] sm:$0xf] }
 0x65d   : > { %3187 = vrot.lane.b32.xlu0 %v3178_v51, %s7723_s18  ;;  %v3114_v7 = vld [vmem:[#allocation2 + $0x50] sm:$0xf]  ;;  %v3180_v38 = vld [vmem:[#allocation2 + $0x5c] sm:$0xf] }
 0x65e   : > { %3349 = vrot.lane.b32.xlu1 %v8540_v14, %s7726_s21  ;;  %v3274_v10 = vld [vmem:[#allocation2 + $0x50] sm:$0xf]  ;;  %v3340_v52 = vld [vmem:[#allocation2 + $0x5c] sm:$0xf] }
 0x65f   : > { %v3242_v25 = vld [vmem:[#allocation2 + $0x50] sm:$0xf]  ;;  %v3148_v47 = vld [vmem:[#allocation2 + $0x5c] sm:$0xf] }
 0x660   : > { %v3308_v45 = vld [vmem:[#allocation2 + $0x5c] sm:$0xf] }
 0x661   : > { %3347 = vrot.lane.b32.xlu0 %v3338_v58, %s7726_s21  ;;  %v3116_v17 = vld [vmem:[#allocation2 + $0x5c] sm:$0xf] }
 0x662   : > { %3157 = vrot.lane.b32.xlu1 %v8540_v14, %s7724_s19  ;;  %v3276_v55 = vld [vmem:[#allocation2 + $0x5c] sm:$0xf] }
 0x663   : > { %v3244_v56 = vld [vmem:[#allocation2 + $0x5c] sm:$0xf] }
 0x665   : > { %3155 = vrot.lane.b32.xlu0 %v3146_v46, %s7724_s19 }
 0x666   : > { %3317 = vrot.lane.b32.xlu1 %v8540_v14, %s7719_s14 }
 0x669   : > { %3315 = vrot.lane.b32.xlu0 %v3306_v39, %s7719_s14 }
 0x66a   : > { %3125 = vrot.lane.b32.xlu1 %v8540_v14, %s7725_s20 }
 0x66d   : > { %3123 = vrot.lane.b32.xlu0 %v3114_v7, %s7725_s20 }
 0x66e   : > { %3285 = vrot.lane.b32.xlu1 %v8540_v14, %s9160_s23 }
 0x671   : > { %3283 = vrot.lane.b32.xlu0 %v3274_v10, %s9160_s23 }
 0x672   : > { %3253 = vrot.lane.b32.xlu1 %v8540_v14, %s9163_s16  ;;  %v7513_v14 = vld [vmem:[#allocation3 + $0xb0] ss:$12 sps:$4 sm:$0xff]  }
 0x675   : > { %3251 = vrot.lane.b32.xlu0 %v3242_v25, %s9163_s16 }
 0x676   : > { %3523 = vperm.xlu1 %7353, %v3519_v24  }
 0x679   : > { %3223 = vrot.lane.b32.xlu0 %v3212_v40, %s7722_s17 }
 0x67d   : > { %3191 = vrot.lane.b32.xlu0 %v3180_v38, %s7723_s18 }
 0x681   : > { %3351 = vrot.lane.b32.xlu0 %v3340_v52, %s7726_s21 }
 0x685   : > { %3159 = vrot.lane.b32.xlu0 %v3148_v47, %s7724_s19 }
 0x689   : > { %3319 = vrot.lane.b32.xlu0 %v3308_v45, %s7719_s14 }
 0x68d   : > { %3127 = vrot.lane.b32.xlu0 %v3116_v17, %s7725_s20 }
 0x691   : > { %3287 = vrot.lane.b32.xlu0 %v3276_v55, %s9160_s23 }
 0x695   : > { %3255 = vrot.lane.b32.xlu0 %v3244_v56, %s9163_s16 }
 0x699   : > { %3528 = vperm.xlu0 %7352, %v3520_v54  }
 0x6a8   : > { %v3218_v60 = vpop.permute.xlu1 %3217 }
 0x6a9   : > { %v3225_v9 = vrot.slane %v3218_v60, 4 }
 0x6ac   : > { %v3186_v1 = vpop.permute.xlu1 %3185 }
 0x6ad   : > { %v3193_v20 = vrot.slane %v3186_v1, 4 }
 0x6b0   : > { %v3346_v26 = vpop.permute.xlu1 %3345 }
 0x6b1   : > { %v3353_v33 = vrot.slane %v3346_v26, 4 }
 0x6b4   : > { %v3154_v61 = vpop.permute.xlu1 %3153 }
 0x6b5   : > { %v3161_v22 = vrot.slane %v3154_v61, 4 }
 0x6b8   : > { %v3314_v5 = vpop.permute.xlu1 %3313 }
 0x6b9   : > { %v3321_v44 = vrot.slane %v3314_v5, 4 }
 0x6bc   : > { %v3122_v6 = vpop.permute.xlu1 %3121 }
 0x6bd   : > { %v3129_v58 = vrot.slane %v3122_v6, 4 }
 0x6c0   : > { %v3282_v12 = vpop.permute.xlu1 %3281 }
 0x6c1   : > { %v3289_v24 = vrot.slane %v3282_v12, 4 }
 0x6c4   : > { %v3250_v37 = vpop.permute.xlu1 %3249 }
 0x6c5   : > { %v3257_v17 = vrot.slane %v3250_v37, 4 }
 0x6c8   : > { %v3222_v2 = vpop.permute.xlu1 %3221 }
 0x6cb   : > { %v3220_v8 = vpop.permute.xlu0 %3219 }
 0x6cc   : > { %v3226_v11 = vrot.slane %v3220_v8, 4  ;;  %3238 = vst.msk [vmem:[#allocation3 + $0x2f0] sm:$0xf] %vm500_vm2, %v3220_v8  ;;  %v3190_v39 = vpop.permute.xlu1 %3189 }
 0x6ce   : > { %v3229_v4 = vsel %vm524_vm4, %v3225_v9, %v3226_v11  ;;  %v3195_v9 = vrot.slane %v3190_v39, 4 }
 0x6cf   : > { %v8614_v13 = vsel %vm625_vm8, %v3218_v60, %v3229_v4  ;;  %v3188_v15 = vpop.permute.xlu0 %3187 }
 0x6d0   : > { %3237 = vst [vmem:[#allocation3 + $0x2e8] sm:$0xff] %v8614_v13  ;;  %v3194_v53 = vrot.slane %v3188_v15, 4  ;;  %3206 = vst.msk [vmem:[#allocation3 + $0x2d8] sm:$0xf] %vm500_vm2, %v3188_v15  ;;  %v3350_v52 = vpop.permute.xlu1 %3349 }
 0x6d2   : > { %v3197_v28 = vsel %vm524_vm4, %v3193_v20, %v3194_v53 }
 0x6d3   : > { %v8620_v29 = vsel %vm592_vm9, %v3186_v1, %v3197_v28  ;;  %v3348_v30 = vpop.permute.xlu0 %3347  ;;  %v3227_v1 = vrot.slane %v3222_v2, 4 }
 0x6d4   : > { %3205 = vst [vmem:[#allocation3 + $0x2d0] sm:$0xff] %v8620_v29  ;;  %v3354_v34 = vrot.slane %v3348_v30, 4  ;;  %3366 = vst.msk [vmem:[#allocation3 + $0x350] sm:$0xf] %vm500_vm2, %v3348_v30  ;;  %v3355_v30 = vrot.slane %v3350_v52, 4 }
 0x6d6   : > { %v3357_v41 = vsel %vm524_vm4, %v3353_v33, %v3354_v34 }
 0x6d7   : > { %v8626_v27 = vsel %vm757_vm12, %v3346_v26, %v3357_v41  ;;  %v3156_v3 = vpop.permute.xlu0 %3155 }
 0x6d8   : > { %v3162_v18 = vrot.slane %v3156_v3, 4  ;;  %3174 = vst.msk [vmem:[#allocation3 + $0x2c0] sm:$0xf] %vm500_vm2, %v3156_v3 }
 0x6da   : > { %v3165_v19 = vsel %vm524_vm4, %v3161_v22, %v3162_v18 }
 0x6db   : > { %v8631_v36 = vsel %vm559_vm10, %v3154_v61, %v3165_v19  ;;  %v3316_v42 = vpop.permute.xlu0 %3315  ;;  %v3158_v61 = vpop.permute.xlu1 %3157 }
 0x6dc   : > { %3173 = vst [vmem:[#allocation3 + $0x2b8] sm:$0xff] %v8631_v36  ;;  %v3322_v43 = vrot.slane %v3316_v42, 4  ;;  %3334 = vst.msk [vmem:[#allocation3 + $0x338] sm:$0xf] %vm500_vm2, %v3316_v42  ;;  %v3163_v22 = vrot.slane %v3158_v61, 4 }
 0x6de   : > { %v3325_v31 = vsel %vm524_vm4, %v3321_v44, %v3322_v43 }
 0x6df   : > { %v8637_v62 = vsel %vm724_vm5, %v3314_v5, %v3325_v31  ;;  %v3124_v51 = vpop.permute.xlu0 %3123  ;;  %v3318_v20 = vpop.permute.xlu1 %3317 }
 0x6e0   : > { %v3130_v46 = vrot.slane %v3124_v51, 4  ;;  %3142 = vst.msk [vmem:[#allocation3 + $0x2a8] sm:$0xf] %vm500_vm2, %v3124_v51  ;;  %v3323_v31 = vrot.slane %v3318_v20, 4 }
 0x6e2   : > { %v3133_v7 = vsel %vm524_vm4, %v3129_v58, %v3130_v46 }
 0x6e3   : > { %v8642_v10 = vsel %vm526_vm11, %v3122_v6, %v3133_v7  ;;  %v3284_v25 = vpop.permute.xlu0 %3283  ;;  %v3126_v42 = vpop.permute.xlu1 %3125 }
 0x6e4   : > { %3141 = vst [vmem:[#allocation3 + $0x2a0] sm:$0xff] %v8642_v10  ;;  %v3290_v40 = vrot.slane %v3284_v25, 4  ;;  %3302 = vst.msk [vmem:[#allocation3 + $0x320] sm:$0xf] %vm500_vm2, %v3284_v25 }
 0x6e6   : > { %v3293_v38 = vsel %vm524_vm4, %v3289_v24, %v3290_v40  ;;  %v3131_v24 = vrot.slane %v3126_v42, 4 }
 0x6e7   : > { %v8648_v47 = vsel %vm9164_vm1, %v3282_v12, %v3293_v38  ;;  %v3252_v45 = vpop.permute.xlu0 %3251 }
 0x6e8   : > { %v3258_v55 = vrot.slane %v3252_v45, 4  ;;  %3270 = vst.msk [vmem:[#allocation3 + $0x308] sm:$0xf] %vm500_vm2, %v3252_v45 }
 0x6ea   : > { %v3261_v56 = vsel %vm524_vm4, %v3257_v17, %v3258_v55 }
 0x6eb   : > { %v8653_v54 = vsel %vm658_vm7, %v3250_v37, %v3261_v56  ;;  %v3224_v60 = vpop.permute.xlu0 %3223 }
 0x6ec   : > { %v3228_v26 = vrot.slane %v3224_v60, 4  ;;  %3240 = vst.msk [vmem:[#allocation3 + $0x2fc] sm:$0xf] %vm500_vm2, %v3224_v60 }
 0x6ee   : > { %v3231_v5 = vsel %vm524_vm4, %v3227_v1, %v3228_v26 }
 0x6ef   : > { %v3232_v6 = vsel %vm625_vm8, %v3222_v2, %v3231_v5  ;;  %v3192_v8 = vpop.permute.xlu0 %3191 }
 0x6f0   : > { %3239 = vst [vmem:[#allocation3 + $0x2f4] sm:$0xff] %v3232_v6  ;;  %v3196_v11 = vrot.slane %v3192_v8, 4  ;;  %3208 = vst.msk [vmem:[#allocation3 + $0x2e4] sm:$0xf] %vm500_vm2, %v3192_v8  ;;  %v6878_v4 = vcombine.low %v8614_v13, %v3232_v6  ;;  %v6879_v12 = vcombine.high %v8614_v13, %v3232_v6 }
 0x6f2   : > { %v3199_v15 = vsel %vm524_vm4, %v3195_v9, %v3196_v11  ;;  %4195 = vmatprep.subr.bf16.mxu1 %v6879_v12 }
 0x6f3   : > { %v3200_v53 = vsel %vm592_vm9, %v3190_v39, %v3199_v15  ;;  %v3352_v28 = vpop.permute.xlu0 %3351  ;;  %4196 = vmatpush2.bf16.msra.mxu1 %v6878_v4  ;;  %v3286_v39 = vpop.permute.xlu1 %3285  ;;  %v7507_v4 = vld [vmem:[#allocation3 + $0x274] ss:$12 sps:$4 sm:$0xff]   ;;  %v7505_v15 = vld [vmem:[#allocation3 + $0x270] ss:$12 sps:$4 sm:$0xff]  }
 0x6f4   : > { %3207 = vst [vmem:[#allocation3 + $0x2dc] sm:$0xff] %v3200_v53  ;;  %v3356_v33 = vrot.slane %v3352_v28, 4  ;;  %3368 = vst.msk [vmem:[#allocation3 + $0x35c] sm:$0xf] %vm500_vm2, %v3352_v28  ;;  %v6875_v34 = vcombine.low %v8620_v29, %v3200_v53  ;;  %v6876_v37 = vcombine.high %v8620_v29, %v3200_v53  ;;  %v3291_v55 = vrot.slane %v3286_v39, 4 }
 0x6f5   : > { %v7511_v53 = vld [vmem:[#allocation3 + $0x170] ss:$12 sps:$4 sm:$0xff]   ;;  %v8727_v28 = vld [vmem:[%s9142_s8 + $0x10] ss:$20 sps:$4 sm:$0xff]  }
 0x6f6   : > { %v3359_v41 = vsel %vm524_vm4, %v3355_v30, %v3356_v33  ;;  %4197 = vmatprep.subr.bf16.mxu1 %v6876_v37  ;;  %v7514_v30 = vld [vmem:[#allocation3 + $0x240] ss:$12 sps:$4 sm:$0xff]   ;;  %v7518_v33 = vld [vmem:[#allocation3 + $0x98] ss:$12 sps:$4 sm:$0xff]   ;;  %v7520_v37 = vld [vmem:[#allocation3 + $0x2f0] ss:$12 sps:$4 sm:$0xff]  }
 0x6f7   : > { %v3360_v13 = vsel %vm757_vm12, %v3350_v52, %v3359_v41  ;;  %v3160_v3 = vpop.permute.xlu0 %3159  ;;  %4198 = vmatpush2.bf16.msra.mxu1 %v6875_v34  ;;  %v7519_v34 = vld [vmem:[#allocation3 + $0x140] ss:$12 sps:$4 sm:$0xff]   ;;  %v8736_v41 = vld [vmem:[%s9142_s8 + $0x8] ss:$20 sps:$4 sm:$0xff]  }
 0x6f8   : > { %v3164_v18 = vrot.slane %v3160_v3, 4  ;;  %3176 = vst.msk [vmem:[#allocation3 + $0x2cc] sm:$0xf] %vm500_vm2, %v3160_v3  ;;  %v8670_v19 = vcombine.low %v8626_v27, %v3360_v13  ;;  %v8673_v2 = vcombine.high %v8626_v27, %v3360_v13  ;;  %v7524_v13 = vld [vmem:[#allocation3 + $0x80] ss:$12 sps:$4 sm:$0xff]  }
 0x6f9   : > { %v7525_v3 = vld [vmem:[#allocation3 + $0x230] ss:$12 sps:$4 sm:$0xff]  }
 0x6fa   : > { %v3167_v29 = vsel %vm524_vm4, %v3163_v22, %v3164_v18  ;;  %4230 = vmatprep.subr.bf16.mxu0 %v8673_v2  ;;  %v7526_v22 = vld [vmem:[#allocation3 + $0x128] ss:$12 sps:$4 sm:$0xff]   ;;  %v7527_v18 = vld [vmem:[#allocation3 + $0x2d8] ss:$12 sps:$4 sm:$0xff]  }
 0x6fb   : > { %v3168_v44 = vsel %vm559_vm10, %v3158_v61, %v3167_v29  ;;  %v3320_v43 = vpop.permute.xlu0 %3319  ;;  %4231 = vmatpush1.bf16.msra.mxu0 %v8670_v19  ;;  %v7530_v29 = vld [vmem:[#allocation3 + $0x110] ss:$12 sps:$4 sm:$0xff]  }
 0x6fc   : > { %3175 = vst [vmem:[#allocation3 + $0x2c4] sm:$0xff] %v3168_v44  ;;  %v3324_v51 = vrot.slane %v3320_v43, 4  ;;  %3336 = vst.msk [vmem:[#allocation3 + $0x344] sm:$0xf] %vm500_vm2, %v3320_v43  ;;  %v6872_v58 = vcombine.low %v8631_v36, %v3168_v44  ;;  %v6873_v27 = vcombine.high %v8631_v36, %v3168_v44  ;;  %v7532_v43 = vld [vmem:[#allocation3 + $0x50] ss:$12 sps:$4 sm:$0xff]  }
 0x6fe   : > { %v3327_v46 = vsel %vm524_vm4, %v3323_v31, %v3324_v51  ;;  %4199 = vmatprep.subr.bf16.mxu1 %v6873_v27  ;;  %v7533_v31 = vld [vmem:[#allocation3 + $0x200] ss:$12 sps:$4 sm:$0xff]   ;;  %v7534_v51 = vld [vmem:[#allocation3 + $0xf8] ss:$12 sps:$4 sm:$0xff]  }
 0x6ff   : > { %v3328_v7 = vsel %vm724_vm5, %v3318_v20, %v3327_v46  ;;  %v3128_v25 = vpop.permute.xlu0 %3127  ;;  %4200 = vmatpush2.bf16.msra.mxu1 %v6872_v58  ;;  %v7510_v20 = vld [vmem:[#allocation3 + $0x25c] ss:$12 sps:$4 sm:$0xff]   ;;  %v7531_v44 = vld [vmem:[#allocation3 + $0x2c0] ss:$12 sps:$4 sm:$0xff]   ;;  %v7536_v27 = vld [vmem:[#allocation3 + $0x38] ss:$12 sps:$4 sm:$0xff]  }
 0x700   : > { %v3132_v40 = vrot.slane %v3128_v25, 4  ;;  %3144 = vst.msk [vmem:[#allocation3 + $0x2b4] sm:$0xf] %vm500_vm2, %v3128_v25  ;;  %v8686_v38 = vcombine.low %v8637_v62, %v3328_v7  ;;  %v8689_v52 = vcombine.high %v8637_v62, %v3328_v7  ;;  %v3254_v62 = vpop.permute.xlu1 %3253  ;;  %v7537_v46 = vld [vmem:[#allocation3 + $0x1e8] ss:$12 sps:$4 sm:$0xff]  }
 0x701   : > { %v3259_v6 = vrot.slane %v3254_v62, 4  ;;  %v7539_v7 = vld [vmem:[#allocation3 + $0x290] ss:$12 sps:$4 sm:$0xff]  }
 0x702   : > { %v3135_v36 = vsel %vm524_vm4, %v3131_v24, %v3132_v40  ;;  %4232 = vmatprep.subr.bf16.mxu0 %v8689_v52  ;;  %v7541_v25 = vld [vmem:[#allocation3 + $0x1d0] ss:$12 sps:$4 sm:$0xff]   ;;  %v7542_v24 = vld [vmem:[#allocation3 + $0xc8] ss:$12 sps:$4 sm:$0xff]   ;;  %v7543_v40 = vld [vmem:[#allocation3 + $0x278] ss:$12 sps:$4 sm:$0xff]  }
 0x703   : > { %v3136_v45 = vsel %vm526_vm11, %v3126_v42, %v3135_v36  ;;  %v3288_v17 = vpop.permute.xlu0 %3287  ;;  %4233 = vmatpush1.bf16.msra.mxu0 %v8686_v38  ;;  %v7529_v42 = vld [vmem:[#allocation3 + $0x218] ss:$12 sps:$4 sm:$0xff]   ;;  %v7544_v36 = vld [vmem:[#allocation3 + $0x8] ss:$12 sps:$4 sm:$0xff]  }
 0x704   : > { %3143 = vst [vmem:[#allocation3 + $0x2ac] sm:$0xff] %v3136_v45  ;;  %v3292_v56 = vrot.slane %v3288_v17, 4  ;;  %3304 = vst.msk [vmem:[#allocation3 + $0x32c] sm:$0xf] %vm500_vm2, %v3288_v17  ;;  %v6869_v60 = vcombine.low %v8642_v10, %v3136_v45  ;;  %v6870_v1 = vcombine.high %v8642_v10, %v3136_v45  ;;  %v7545_v45 = vld [vmem:[#allocation3 + $0x1b8] ss:$12 sps:$4 sm:$0xff]  }
 0x705   : > { %v7546_v17 = vld [vmem:[#allocation3 + $0x260] ss:$12 sps:$4 sm:$0xff]  }
 0x706   : > { %v3295_v26 = vsel %vm524_vm4, %v3291_v55, %v3292_v56  ;;  %4201 = vmatprep.subr.bf16.mxu1 %v6870_v1  ;;  %v7547_v55 = vld [vmem:[#allocation3 + $0x1a0] ss:$12 sps:$4 sm:$0xff]   ;;  %v7548_v56 = vld [vmem:[#allocation3 + $0x350] ss:$12 sps:$4 sm:$0xff]   ;;  %v7550_v1 = vld [vmem:[#allocation3 + $0x188] ss:$12 sps:$4 sm:$0xff]  }
 0x707   : > { %v3296_v61 = vsel %vm9165_vm0, %v3286_v39, %v3295_v26  ;;  %v3256_v5 = vpop.permute.xlu0 %3255  ;;  %4202 = vmatpush2.bf16.msra.mxu1 %v6869_v60  ;;  %v7535_v58 = vld [vmem:[#allocation3 + $0x2a8] ss:$12 sps:$4 sm:$0xff]   ;;  %v7538_v39 = vld [vmem:[#allocation3 + $0xe0] ss:$12 sps:$4 sm:$0xff]  }
 0x708   : > { %v3260_v8 = vrot.slane %v3256_v5, 4  ;;  %3272 = vst.msk [vmem:[#allocation3 + $0x314] sm:$0xf] %vm500_vm2, %v3256_v5  ;;  %4203 = vmatprep.subr.bf16.mxu1 %v6867_v63  ;;  %v8705_v9 = vcombine.low %v8648_v47, %v3296_v61  ;;  %v8708_v10 = vcombine.high %v8648_v47, %v3296_v61  ;;  %vm4132_vm2 = vcmask 523264   ;;  %v7549_v60 = vld [vmem:[#allocation3 + $0x248] ss:$12 sps:$4 sm:$0xff]  }
 0x709   : > { %v7556_v61 = vld [vmem:[#allocation3 + $0xac] ss:$12 sps:$4 sm:$0xff]  }
 0x70a   : > { %v3263_v11 = vsel %vm524_vm4, %v3259_v6, %v3260_v8  ;;  %4234 = vmatprep.subr.bf16.mxu0 %v8708_v10  ;;  %vm9166_vm4 = vmmov 0   ;;  %v8752_v5 = vld [vmem:[%s9144_s10 + $0x4] ss:$20 sps:$4 sm:$0xff]   ;;  %v7554_v6 = vld [vmem:[#allocation3 + $0xa8] ss:$12 sps:$4 sm:$0xff]  }
 0x70b   : > { %v3264_v12 = vsel %vm658_vm7, %v3254_v62, %v3263_v11  ;;  %4204 = vmatpush2.bf16.msra.mxu1 %v6866_v32  ;;  %4235 = vmatpush1.bf16.msra.mxu0 %v8705_v9  ;;  %v7516_v32 = vld [vmem:[#allocation3 + $0x244] ss:$12 sps:$4 sm:$0xff]   ;;  %v7552_v26 = vld [vmem:[#allocation3 + $0x320] ss:$12 sps:$4 sm:$0xff]  }
 0x70c   : > { %4205 = vmatprep.subr.bf16.mxu1 %v7507_v4  ;;  %v8718_v63 = vcombine.low %v8653_v54, %v3264_v12  ;;  %v8721_v47 = vcombine.high %v8653_v54, %v3264_v12  ;;  %v7517_v54 = vld [vmem:[#allocation3 + $0x158] ss:$12 sps:$4 sm:$0xff]   ;;  %v7559_v8 = vld [vmem:[#allocation3 + $0x94] ss:$12 sps:$4 sm:$0xff]   ;;  %v7557_v11 = vld [vmem:[#allocation3 + $0x90] ss:$12 sps:$4 sm:$0xff]  }
 0x70d   : > { %v7551_v62 = vld [vmem:[#allocation3 + $0x338] ss:$12 sps:$4 sm:$0xff]   ;;  %v7562_v4 = vld [vmem:[#allocation3 + $0x7c] ss:$12 sps:$4 sm:$0xff]  }
 0x70e   : > { %4236 = vmatprep.subr.bf16.mxu0 %v8721_v47  ;;  %v7560_v12 = vld [vmem:[#allocation3 + $0x78] ss:$12 sps:$4 sm:$0xff]  }
 0x70f   : > { %4206 = vmatpush2.bf16.msra.mxu1 %v7505_v15  ;;  %4237 = vmatpush1.bf16.msra.mxu0 %v8718_v63  ;;  %v7565_v15 = vld [vmem:[#allocation3 + $0x64] ss:$12 sps:$4 sm:$0xff]  }
 0x710   : > { %4207 = vmatprep.subr.bf16.mxu1 %v7510_v20  ;;  %7129 = vmatprep.subr.bf16.mxu0 %v7511_v53  ;;  %v7563_v20 = vld [vmem:[#allocation3 + $0x60] ss:$12 sps:$4 sm:$0xff]  }
 0x711   : > { %v7568_v53 = vld [vmem:[#allocation3 + $0x4c] ss:$12 sps:$4 sm:$0xff]  }
 0x712   : > { %6893 = vmatmul.mubr.msk.bf16.vlgmr.msra.gmra.mxu0 %vm4132_vm2, %v8727_v28 }
 0x713   : > { %4208 = vmatpush2.bf16.msra.mxu1 %v7508_v35  ;;  %7130 = vmatpush3.bf16.msra.mxu0 %v7513_v14  ;;  %v7566_v35 = vld [vmem:[#allocation3 + $0x48] ss:$12 sps:$4 sm:$0xff]  }
 0x714   : > { %4209 = vmatprep.subr.bf16.mxu1 %v7516_v32  ;;  %7131 = vmatprep.subr.bf16.mxu0 %v7517_v54  ;;  %v7571_v14 = vld [vmem:[#allocation3 + $0x34] ss:$12 sps:$4 sm:$0xff]   ;;  %v7574_v32 = vld [vmem:[#allocation3 + $0x1c] ss:$12 sps:$4 sm:$0xff]   ;;  %v7577_v54 = vld [vmem:[#allocation3 + $0x4] ss:$12 sps:$4 sm:$0xff]  }
 0x715   : > { %4297 = vmatprep.mubr.bf16.mxu0 %v8509_v16  ;;  %v7528_v16 = vld [vmem:[#allocation3 + $0x68] ss:$12 sps:$4 sm:$0xff]  }
 0x717   : > { %4210 = vmatpush2.bf16.msra.mxu1 %v7514_v30  ;;  %7132 = vmatpush3.bf16.msra.mxu0 %v7518_v33  ;;  %v7572_v30 = vld [vmem:[#allocation3 + $0x18] ss:$12 sps:$4 sm:$0xff]   ;;  %v7575_v33 = vld [vmem:[#allocation3] ss:$12 sps:$4 sm:$0xff]  }
 0x718   : > { %7133 = vmatprep.subr.bf16.mxu0 %v7519_v34  ;;  %7151 = vmatprep.subr.bf16.mxu1 %v7520_v37  ;;  %v7580_v34 = vld [vmem:[#allocation3 + $0x16c] ss:$12 sps:$4 sm:$0xff]   ;;  %v7578_v37 = vld [vmem:[#allocation3 + $0x168] ss:$12 sps:$4 sm:$0xff]  }
 0x71a   : > { %4212 = vmatmul.mubr.bf16.vlgmr.msra.gmra.mxu1 %v8736_v41 }
 0x71b   : > { %7134 = vmatpush3.bf16.msra.mxu0 %v7524_v13  ;;  %7152 = vmatpush3.bf16.msra.mxu1 %v7525_v3  ;;  %v7581_v13 = vld [vmem:[#allocation3 + $0x150] ss:$12 sps:$4 sm:$0xff]  }
 0x71c   : > { %7135 = vmatprep.subr.bf16.mxu0 %v7526_v22  ;;  %7153 = vmatprep.subr.bf16.mxu1 %v7527_v18  ;;  %v7586_v3 = vld [vmem:[#allocation3 + $0x13c] ss:$12 sps:$4 sm:$0xff]   ;;  %v7584_v22 = vld [vmem:[#allocation3 + $0x138] ss:$12 sps:$4 sm:$0xff]  }
 0x71d   : > { %4338 = vmatprep.mubr.bf16.mxu1 %v8608_v59  ;;  %v7540_v59 = vld [vmem:[#allocation3 + $0x20] ss:$12 sps:$4 sm:$0xff]   ;;  %v7589_v18 = vld [vmem:[#allocation3 + $0x124] ss:$12 sps:$4 sm:$0xff]  }
 0x71f   : > { %7136 = vmatpush3.bf16.msra.mxu0 %v7528_v16  ;;  %7154 = vmatpush3.bf16.msra.mxu1 %v7529_v42  ;;  %v7587_v16 = vld [vmem:[#allocation3 + $0x120] ss:$12 sps:$4 sm:$0xff]  }
 0x720   : > { %7137 = vmatprep.subr.bf16.mxu0 %v7530_v29  ;;  %7155 = vmatprep.subr.bf16.mxu1 %v7531_v44  ;;  %v7592_v42 = vld [vmem:[#allocation3 + $0x10c] ss:$12 sps:$4 sm:$0xff]   ;;  %v7590_v29 = vld [vmem:[#allocation3 + $0x108] ss:$12 sps:$4 sm:$0xff]  }
 0x721   : > { %v7595_v44 = vld [vmem:[#allocation3 + $0xf4] ss:$12 sps:$4 sm:$0xff]  }
 0x723   : > { %7138 = vmatpush3.bf16.msra.mxu0 %v7532_v43  ;;  %7156 = vmatpush3.bf16.msra.mxu1 %v7533_v31  ;;  %v7593_v43 = vld [vmem:[#allocation3 + $0xf0] ss:$12 sps:$4 sm:$0xff]  }
 0x724   : > { %7139 = vmatprep.subr.bf16.mxu0 %v7534_v51  ;;  %7157 = vmatprep.subr.bf16.mxu1 %v7535_v58  ;;  %v7598_v31 = vld [vmem:[#allocation3 + $0xdc] ss:$12 sps:$4 sm:$0xff]   ;;  %v7596_v51 = vld [vmem:[#allocation3 + $0xd8] ss:$12 sps:$4 sm:$0xff]  }
 0x725   : > { %v7601_v58 = vld [vmem:[#allocation3 + $0xc4] ss:$12 sps:$4 sm:$0xff]  }
 0x727   : > { %7140 = vmatpush3.bf16.msra.mxu0 %v7536_v27  ;;  %7158 = vmatpush3.bf16.msra.mxu1 %v7537_v46  ;;  %v7599_v27 = vld [vmem:[#allocation3 + $0xc0] ss:$12 sps:$4 sm:$0xff]   ;;  %v8760_v46 = vld [vmem:[%s9144_s10] ss:$20 sps:$4 sm:$0xff]  }
 0x728   : > { %7141 = vmatprep.subr.bf16.mxu0 %v7538_v39  ;;  %7159 = vmatprep.subr.bf16.mxu1 %v7539_v7  ;;  %v7605_v39 = vld [vmem:[#allocation3 + $0x2f0] ss:$12 sps:$4 sm:$0xff]   ;;  %v7613_v7 = vld [vmem:[#allocation3 + $0x1e8] ss:$12 sps:$4 sm:$0xff]  }
 0x72b   : > { %7142 = vmatpush3.bf16.msra.mxu0 %v7540_v59  ;;  %7160 = vmatpush3.bf16.msra.mxu1 %v7541_v25  ;;  %v7614_v59 = vld [vmem:[#allocation3 + $0x290] ss:$12 sps:$4 sm:$0xff]   ;;  %v7616_v25 = vld [vmem:[#allocation3 + $0x278] ss:$12 sps:$4 sm:$0xff]  }
 0x72c   : > { %7143 = vmatprep.subr.bf16.mxu0 %v7542_v24  ;;  %7161 = vmatprep.subr.bf16.mxu1 %v7543_v40  ;;  %v7617_v24 = vld [vmem:[#allocation3 + $0x1b8] ss:$12 sps:$4 sm:$0xff]   ;;  %v7618_v40 = vld [vmem:[#allocation3 + $0x260] ss:$12 sps:$4 sm:$0xff]  }
 0x72f   : > { %7144 = vmatpush3.bf16.msra.mxu0 %v7544_v36  ;;  %7162 = vmatpush3.bf16.msra.mxu1 %v7545_v45  ;;  %v7619_v36 = vld [vmem:[#allocation3 + $0x1a0] ss:$12 sps:$4 sm:$0xff]   ;;  %v7620_v45 = vld [vmem:[#allocation3 + $0x248] ss:$12 sps:$4 sm:$0xff]  }
 0x730   : > { %7163 = vmatprep.subr.bf16.mxu1 %v7546_v17  ;;  %7253 = vmatprep.subr.bf16.mxu0 %v7728_v21  ;;  %v7621_v17 = vld [vmem:[#allocation3 + $0x188] ss:$12 sps:$4 sm:$0xff]  }
 0x732   : > { %4298 = vmatmul.mubr.bf16.vlgmr.msra.gmra.mxu0 %v8516_v48  ;;  %v7553_v48 = vld [vmem:[#allocation3 + $0x308] ss:$12 sps:$4 sm:$0xff]  }
 0x733   : > { %7164 = vmatpush3.bf16.msra.mxu1 %v7547_v55  ;;  %7254 = vmatpush3.bf16.msra.mxu0 %v7548_v56  ;;  %v4170_v55 = vpop.f32.mrf.mxu0 }
 0x734   : > { %7165 = vmatprep.subr.bf16.mxu1 %v7549_v60  ;;  %7255 = vmatprep.subr.bf16.mxu0 %v7728_v21 }
 0x735   : > { %7261 = vmatprep.mubr.msk.bf16.mxu0 %vm9166_vm4, %v7728_v21  ;;  %v4172_v56 = vpop.f32.mrf.mxu0 }
 0x737   : > { %7166 = vmatpush3.bf16.msra.mxu1 %v7550_v1  ;;  %7256 = vmatpush3.bf16.msra.mxu0 %v7551_v62  ;;  %v4174_v60 = vpop.f32.mrf.mxu0  ;;  %v3524_v62 = vpop.permute.xlu1 %3523 }
 0x738   : > { %7257 = vmatprep.subr.bf16.mxu0 %v7728_v21 }
 0x739   : > { %v4176_v1 = vpop.f32.mrf.mxu0 }
 0x73a   : > { %4339 = vmatmul.mubr.bf16.vlgmr.msra.gmra.mxu1 %v8736_v41  ;;  %v7583_v41 = vld [vmem:[#allocation3 + $0x154] ss:$12 sps:$4 sm:$0xff]  }
 0x73b   : > { %7258 = vmatpush3.bf16.msra.mxu0 %v7552_v26  ;;  %4662 = vmatprep.mubr.bf16.mxu1 %v7718_v0 }
 0x73c   : > { %7259 = vmatprep.subr.bf16.mxu0 %v7728_v21 }
 0x73f   : > { %7260 = vmatpush3.bf16.msra.mxu0 %v7553_v48  ;;  %v4171_v48 = vadd.f32 %v4170_v55, %v3524_v62 }
 0x740   : > { %5318 = vmatprep.subr.bf16.mxu0 %v7556_v61  ;;  %v3529_v61 = vpop.permute.xlu0 %3528 }
 0x742   : > { %7262 = vmatmul.mubr.msk.bf16.vlgmr.msra.gmra.mxu0 %vm4132_vm2, %v8727_v28  ;;  %v7569_v28 = vld [vmem:[#allocation3 + $0x30] ss:$12 sps:$4 sm:$0xff]  }
 0x743   : > { %5319 = vmatpush1.bf16.msra.mxu0 %v7554_v6  ;;  %5350 = vmatprep.mubr.bf16.mxu0 %v8752_v5 }
 0x744   : > { %5320 = vmatprep.subr.bf16.mxu0 %v7559_v8 }
 0x747   : > { %5321 = vmatpush1.bf16.msra.mxu0 %v7557_v11 }
 0x748   : > { %5322 = vmatprep.subr.bf16.mxu0 %v7562_v4  ;;  %v4173_v4 = vadd.f32 %v4172_v56, %v3524_v62 }
 0x74b   : > { %5323 = vmatpush1.bf16.msra.mxu0 %v7560_v12 }
 0x74c   : > { %5324 = vmatprep.subr.bf16.mxu0 %v7565_v15 }
 0x74f   : > { %5325 = vmatpush1.bf16.msra.mxu0 %v7563_v20 }
 0x750   : > { %5326 = vmatprep.subr.bf16.mxu0 %v7568_v53  ;;  %v4175_v53 = vadd.f32 %v4174_v60, %v3529_v61 }
 0x753   : > { %5327 = vmatpush1.bf16.msra.mxu0 %v7566_v35 }
 0x754   : > { %5328 = vmatprep.subr.bf16.mxu0 %v7571_v14 }
 0x757   : > { %5329 = vmatpush1.bf16.msra.mxu0 %v7569_v28 }
 0x758   : > { %5330 = vmatprep.subr.bf16.mxu0 %v7574_v32 }
 0x75b   : > { %5331 = vmatpush1.bf16.msra.mxu0 %v7572_v30  ;;  %v4177_v30 = vadd.f32 %v4176_v1, %v3529_v61 }
 0x75c   : > { %5332 = vmatprep.subr.bf16.mxu0 %v7577_v54 }
 0x75f   : > { %5333 = vmatpush1.bf16.msra.mxu0 %v7575_v33 }
 0x760   : > { %5334 = vmatprep.subr.bf16.mxu0 %v7580_v34 }
 0x763   : > { %5335 = vmatpush2.bf16.msra.mxu0 %v7578_v37 }
 0x764   : > { %5336 = vmatprep.subr.bf16.mxu0 %v7583_v41 }
 0x767   : > { %5337 = vmatpush2.bf16.msra.mxu0 %v7581_v13 }
 0x768   : > { %5338 = vmatprep.subr.bf16.mxu0 %v7586_v3 }
 0x76b   : > { %5339 = vmatpush2.bf16.msra.mxu0 %v7584_v22 }
 0x76c   : > { %5340 = vmatprep.subr.bf16.mxu0 %v7589_v18 }
 0x76f   : > { %5341 = vmatpush2.bf16.msra.mxu0 %v7587_v16 }
 0x770   : > { %5342 = vmatprep.subr.bf16.mxu0 %v7592_v42 }
 0x773   : > { %5343 = vmatpush2.bf16.msra.mxu0 %v7590_v29 }
 0x774   : > { %5344 = vmatprep.subr.bf16.mxu0 %v7595_v44 }
 0x777   : > { %5345 = vmatpush2.bf16.msra.mxu0 %v7593_v43 }
 0x778   : > { %5346 = vmatprep.subr.bf16.mxu0 %v7598_v31 }
 0x77b   : > { %5347 = vmatpush2.bf16.msra.mxu0 %v7596_v51 }
 0x77c   : > { %5348 = vmatprep.subr.bf16.mxu0 %v7601_v58 }
 0x77f   : > { %5349 = vmatpush2.bf16.msra.mxu0 %v7599_v27 }
 0x780   : > { %5412 = vmatprep.subr.bf16.mxu0 %v8673_v2  ;;  %v8774_v2 = vld [vmem:[%s9144_s10 + $0x10] ss:$20 sps:$4 sm:$0xff]  }
 0x782   : > { %5351 = vmatmul.mubr.bf16.vlgmr.msra.gmra.mxu0 %v8760_v46 }
 0x783   : > { %5413 = vmatpush1.bf16.msra.mxu0 %v8670_v19  ;;  %5436 = vmatprep.mubr.bf16.mxu0 %v7718_v0  ;;  %v7607_v19 = vld [vmem:[#allocation3 + $0x230] ss:$12 sps:$4 sm:$0xff]  }
 0x784   : > { %5414 = vmatprep.subr.bf16.mxu0 %v8689_v52  ;;  %v7609_v52 = vld [vmem:[#allocation3 + $0x218] ss:$12 sps:$4 sm:$0xff]  }
 0x787   : > { %5415 = vmatpush1.bf16.msra.mxu0 %v8686_v38  ;;  %v7608_v38 = vld [vmem:[#allocation3 + $0x2d8] ss:$12 sps:$4 sm:$0xff]  }
 0x788   : > { %5416 = vmatprep.subr.bf16.mxu0 %v8708_v10  ;;  %v7611_v10 = vld [vmem:[#allocation3 + $0x200] ss:$12 sps:$4 sm:$0xff]  }
 0x78b   : > { %5417 = vmatpush1.bf16.msra.mxu0 %v8705_v9  ;;  %v7610_v9 = vld [vmem:[#allocation3 + $0x2c0] ss:$12 sps:$4 sm:$0xff]  }
 0x78c   : > { %5418 = vmatprep.subr.bf16.mxu0 %v8721_v47  ;;  %v7612_v47 = vld [vmem:[#allocation3 + $0x2a8] ss:$12 sps:$4 sm:$0xff]  }
 0x78f   : > { %5419 = vmatpush1.bf16.msra.mxu0 %v8718_v63  ;;  %v7615_v63 = vld [vmem:[#allocation3 + $0x1d0] ss:$12 sps:$4 sm:$0xff]  }
 0x790   : > { %7202 = vmatprep.subr.bf16.mxu0 %v7605_v39 }
 0x792   : > { %7018 = vmatmul.mubr.msk.bf16.vlgmr.msra.gmra.mxu0 %vm4132_vm2, %v8774_v2 }
 0x793   : > { %7203 = vmatpush3.bf16.msra.mxu0 %v7607_v19 }
 0x794   : > { %7204 = vmatprep.subr.bf16.mxu0 %v7608_v38 }
 0x797   : > { %7205 = vmatpush3.bf16.msra.mxu0 %v7609_v52 }
 0x798   : > { %7206 = vmatprep.subr.bf16.mxu0 %v7610_v9 }
 0x79b   : > { %7207 = vmatpush3.bf16.msra.mxu0 %v7611_v10 }
 0x79c   : > { %7208 = vmatprep.subr.bf16.mxu0 %v7612_v47 }
 0x79f   : > { %7209 = vmatpush3.bf16.msra.mxu0 %v7613_v7 }
 0x7a0   : > { %7210 = vmatprep.subr.bf16.mxu0 %v7614_v59 }
 0x7a3   : > { %7211 = vmatpush3.bf16.msra.mxu0 %v7615_v63 }
 0x7a4   : > { %7212 = vmatprep.subr.bf16.mxu0 %v7616_v25 }
 0x7a7   : > { %7213 = vmatpush3.bf16.msra.mxu0 %v7617_v24 }
 0x7a8   : > { %7214 = vmatprep.subr.bf16.mxu0 %v7618_v40 }
 0x7ab   : > { %7215 = vmatpush3.bf16.msra.mxu0 %v7619_v36 }
 0x7ac   : > { %7216 = vmatprep.subr.bf16.mxu0 %v7620_v45 }
 0x7af   : > { %7217 = vmatpush3.bf16.msra.mxu0 %v7621_v17 }
 0x7d2   : > { %v4256_v26 = vpop.f32.mrf.mxu0 }
 0x7d4   : > { %v4258_v8 = vpop.f32.mrf.mxu0 }
 0x7d6   : > { %v4260_v14 = vpop.f32.mrf.mxu0 }
 0x7d8   : > { %v4262_v3 = vpop.f32.mrf.mxu0 }
 0x7da   : > { %v4213_v6 = vpop.f32.mrf.mxu1 }
 0x7db   : > { %v4214_v11 = vadd.f32 %v4213_v6, %v4171_v48 }
 0x7dc   : > { %v4215_v12 = vpop.f32.mrf.mxu1 }
 0x7dd   : > { %v4257_v15 = vadd.f32 %v4256_v26, %v4214_v11  ;;  %v4216_v20 = vadd.f32 %v4215_v12, %v4173_v4 }
 0x7de   : > { %v4217_v35 = vpop.f32.mrf.mxu1 }
 0x7df   : > { %vm4388_vm3 = vcmp.ge.f32.partialorder %v4257_v15, 0.0  ;;  %v4394_v28 = vmul.f32 0.2, %v4257_v15  ;;  %v4259_v32 = vadd.f32 %v4258_v8, %v4216_v20  ;;  %v4218_v54 = vadd.f32 %v4217_v35, %v4175_v53  ;;  %v8795_v20 = vld [vmem:[%s9144_s10 + $0x8] ss:$20 sps:$4 sm:$0xff]  }
 0x7e0   : > { %v4219_v33 = vpop.f32.mrf.mxu1 }
 0x7e1   : > { %v4400_v34 = vsel %vm4388_vm3, %v4257_v15, %v4394_v28  ;;  %vm4389_vm6 = vcmp.ge.f32.partialorder %v4259_v32, 0.0  ;;  %v4395_v37 = vmul.f32 0.2, %v4259_v32  ;;  %v4261_v41 = vadd.f32 %v4260_v14, %v4218_v54  ;;  %v7674_v15 = vld [vmem:[%s9144_s10 + $0xc] ss:$20 sps:$4 sm:$0xff]  }
 0x7e2   : > { %v4220_v13 = vadd.f32 %v4219_v33, %v4177_v30  ;;  %v4406_v16 = vmul.f32 %v4400_v34, %v8039_v49  ;;  %5520 = vmatprep.mubr.bf16.mxu0 %v7674_v15 }
 0x7e3   : > { %v4401_v22 = vsel %vm4389_vm6, %v4259_v32, %v4395_v37  ;;  %vm4391_vm1 = vcmp.ge.f32.partialorder %v4261_v41, 0.0  ;;  %v4397_v18 = vmul.f32 0.2, %v4261_v41  ;;  %5521 = vmatmul.mubr.bf16.vlgmr.msra.gmra.mxu0 %v8795_v20  ;;  %v7622_v37 = vld [vmem:[%s9145_s11] sm:$0xff]  }
 0x7e4   : > { %v4407_v42 = vmul.f32 %v4401_v22, %v8041_v50  ;;  %v4263_v29 = vadd.f32 %v4262_v3, %v4220_v13  ;;  %5624 = vmatprep.mubr.bf16.mxu0 %v7718_v0 }
 0x7e5   : > { %v4403_v44 = vsel %vm4391_vm1, %v4261_v41, %v4397_v18 }
 0x7e6   : > { %vm4392_vm0 = vcmp.ge.f32.partialorder %v4263_v29, 0.0  ;;  %v4398_v43 = vmul.f32 0.2, %v4263_v29  ;;  %v7078_v31 = vpack.c.bf16 %v4407_v42, %v4406_v16  ;;  %v4409_v58 = vmul.f32 %v4403_v44, %v8039_v49  ;;  %v7625_v42 = vld [vmem:[#allocation3 + $0x22c] ss:$12 sps:$4 sm:$0xff]  }
 0x7e7   : > { %v7628_v44 = vld [vmem:[#allocation3 + $0x214] ss:$12 sps:$4 sm:$0xff]  }
 0x7e8   : > { %v4404_v51 = vsel %vm4392_vm0, %v4263_v29, %v4398_v43  ;;  %4428 = vrot.lane.b32.xlu1 %v7078_v31, %s7727_s22  ;;  %v7623_v29 = vld [vmem:[#allocation3 + $0x228] ss:$12 sps:$4 sm:$0xff]   ;;  %v7626_v43 = vld [vmem:[#allocation3 + $0x210] ss:$12 sps:$4 sm:$0xff]  }
 0x7e9   : > { %v4410_v27 = vmul.f32 %v4404_v51, %v8041_v50  ;;  %v7631_v31 = vld [vmem:[#allocation3 + $0x1fc] ss:$12 sps:$4 sm:$0xff]   ;;  %v7629_v51 = vld [vmem:[#allocation3 + $0x1f8] ss:$12 sps:$4 sm:$0xff]  }
 0x7eb   : > { %v7080_v39 = vpack.c.bf16 %v4410_v27, %v4409_v58  ;;  %v7634_v58 = vld [vmem:[#allocation3 + $0x1e4] ss:$12 sps:$4 sm:$0xff]   ;;  %v7632_v27 = vld [vmem:[#allocation3 + $0x1e0] ss:$12 sps:$4 sm:$0xff]  }
 0x7ed   : > { %4432 = vrot.lane.b32.xlu0 %v7080_v39, %s7727_s22  ;;  %v7637_v39 = vld [vmem:[#allocation3 + $0x1cc] ss:$12 sps:$4 sm:$0xff]  }
 0x7f2   : > { %v7145_v19 = vpop.f32.mrf.mxu0 }
 0x7f4   : > { %v7146_v38 = vpop.f32.mrf.mxu0 }
 0x7f5   : > { %v7147_v10 = vadd.f32 %v7146_v38, %v7145_v19  ;;  %v7635_v19 = vld [vmem:[#allocation3 + $0x1c8] ss:$12 sps:$4 sm:$0xff]  }
 0x7f6   : > { %v7148_v52 = vpop.f32.mrf.mxu0  ;;  %v7640_v38 = vld [vmem:[#allocation3 + $0x1b4] ss:$12 sps:$4 sm:$0xff]  }
 0x7f7   : > { %v4300_v25 = vadd.f32 %v7147_v10, %v3524_v62  ;;  %v7641_v10 = vld [vmem:[#allocation3 + $0x198] ss:$12 sps:$4 sm:$0xff]  }
 0x7f8   : > { %v7149_v47 = vpop.f32.mrf.mxu0 }
 0x7f9   : > { %v7150_v24 = vadd.f32 %v7149_v47, %v7148_v52  ;;  %v7638_v52 = vld [vmem:[#allocation3 + $0x1b0] ss:$12 sps:$4 sm:$0xff]  }
 0x7fa   : > { %v7167_v9 = vpop.f32.mrf.mxu1  ;;  %v7646_v47 = vld [vmem:[#allocation3 + $0x184] ss:$12 sps:$4 sm:$0xff]  }
 0x7fb   : > { %v4303_v17 = vadd.f32 %v7150_v24, %v3529_v61  ;;  %v6466_v24 = vld [vmem:[%s9146_s12] sm:$0xff] }
 0x7fc   : > { %v7168_v7 = vpop.f32.mrf.mxu1 }
 0x7fd   : > { %v7169_v59 = vadd.f32 %v7168_v7, %v7167_v9  ;;  %v7643_v9 = vld [vmem:[#allocation3 + $0x19c] ss:$12 sps:$4 sm:$0xff]   ;;  %v7644_v7 = vld [vmem:[#allocation3 + $0x180] ss:$12 sps:$4 sm:$0xff]  }
 0x7fe   : > { %v7170_v63 = vpop.f32.mrf.mxu1 }
 0x7ff   : > { %v4341_v45 = vadd.f32 %v7169_v59, %v4300_v25  ;;  %v7649_v59 = vld [vmem:[#allocation3 + $0x2ec] ss:$12 sps:$4 sm:$0xff]   ;;  %v7652_v25 = vld [vmem:[#allocation3 + $0x2d4] ss:$12 sps:$4 sm:$0xff]  }
 0x800   : > { %v7171_v40 = vpop.f32.mrf.mxu1 }
 0x801   : > { %v7172_v36 = vadd.f32 %v7171_v40, %v7170_v63  ;;  %v7647_v63 = vld [vmem:[#allocation3 + $0x2e8] ss:$12 sps:$4 sm:$0xff]   ;;  %v7650_v40 = vld [vmem:[#allocation3 + $0x2d0] ss:$12 sps:$4 sm:$0xff]  }
 0x802   : > { %v4381_v49 = vpop.f32.mrf.mxu0 }
 0x803   : > { %v4382_v50 = vadd.f32 %v4381_v49, %v4341_v45  ;;  %v4344_v60 = vadd.f32 %v7172_v36, %v4303_v17  ;;  %v7655_v36 = vld [vmem:[#allocation3 + $0x2bc] ss:$12 sps:$4 sm:$0xff]   ;;  %v7653_v45 = vld [vmem:[#allocation3 + $0x2b8] ss:$12 sps:$4 sm:$0xff]  }
 0x804   : > { %v7263_v55 = vpop.f32.mrf.mxu0  ;;  %v7658_v49 = vld [vmem:[#allocation3 + $0x2a4] ss:$12 sps:$4 sm:$0xff]   ;;  %v7702_v17 = vld [vmem:[%s7819_s30] sm:$0xff] }
 0x805   : > { %vm4390_vm3 = vcmp.ge.f32.partialorder %v4382_v50, 0.0  ;;  %v4396_v56 = vmul.f32 0.2, %v4382_v50  ;;  %v7656_v55 = vld [vmem:[#allocation3 + $0x2a0] ss:$12 sps:$4 sm:$0xff]  }
 0x806   : > { %v4384_v1 = vpop.f32.mrf.mxu0 }
 0x807   : > { %v4402_v26 = vsel %vm4390_vm3, %v4382_v50, %v4396_v56  ;;  %v4385_v48 = vadd.f32 %v4384_v1, %v4344_v60  ;;  %v6467_v50 = vld [vmem:[%s9146_s12 + $0x8] sm:$0xff]  ;;  %v7661_v56 = vld [vmem:[#allocation3 + $0x28c] ss:$12 sps:$4 sm:$0xff]   ;;  %vm9176_vm3 = vcmask 752640  }
 0x808   : > { %v4408_v6 = vmul.f32 %v4402_v26, %v8051_v57  ;;  %v7264_v8 = vpop.f32.mrf.mxu0  ;;  %v7703_v60 = vld [vmem:[%s7819_s30 + $0x10] sm:$0xff]  ;;  %v7659_v1 = vld [vmem:[#allocation3 + $0x288] ss:$12 sps:$4 sm:$0xff]  }
 0x809   : > { %vm4393_vm6 = vcmp.ge.f32.partialorder %v4385_v48, 0.0  ;;  %v4399_v11 = vmul.f32 0.2, %v4385_v48  ;;  %v7664_v26 = vld [vmem:[#allocation3 + $0x274] ss:$12 sps:$4 sm:$0xff]  }
 0x80a   : > { %v7079_v62 = vpack.c.bf16 %v4408_v6, %v4408_v6  ;;  %v7705_v6 = vld [vmem:[%s7819_s30 + $0x8] sm:$0xff] }
 0x80b   : > { %v4405_v4 = vsel %vm4393_vm6, %v4385_v48, %v4399_v11  ;;  %v7704_v48 = vld [vmem:[%s7819_s30 + $0x20] sm:$0xff]  ;;  %v7662_v8 = vld [vmem:[#allocation3 + $0x270] ss:$12 sps:$4 sm:$0xff]  }
 0x80c   : > { %v4411_v12 = vmul.f32 %v4405_v4, %v8051_v57  ;;  %4430 = vrot.lane.b32.xlu1 %v7079_v62, %s7727_s22  ;;  %v7667_v11 = vld [vmem:[#allocation3 + $0x25c] ss:$12 sps:$4 sm:$0xff]   ;;  %v7706_v62 = vld [vmem:[%s7819_s30 + $0x18] sm:$0xff] }
 0x80d   : > { %v7665_v4 = vld [vmem:[#allocation3 + $0x258] ss:$12 sps:$4 sm:$0xff]  }
 0x80e   : > { %v7081_v61 = vpack.c.bf16 %v4411_v12, %v4411_v12  ;;  %v7670_v12 = vld [vmem:[#allocation3 + $0x244] ss:$12 sps:$4 sm:$0xff]  }
 0x810   : > { %4434 = vrot.lane.b32.xlu0 %v7081_v61, %s7727_s22  ;;  %v7707_v61 = vld [vmem:[%s7819_s30 + $0x28] sm:$0xff] }
 0x85a   : > { %v4429_v57 = vpop.permute.xlu1 %4428 }
 0x85b   : > { %v4436_v53 = vrot.slane %v4429_v57, 4 }
 0x85d   : > { %v4438_v35 = vsel %vm1126_vm13, %v4436_v53, %v4429_v57  ;;  %v7671_v57 = vld [vmem:[#allocation3 + $0x170] ss:$12 sps:$4 sm:$0xff]  }
 0x85e   : > { %4446 = vst.msk [vmem:[#allocation2 + $0x60] sm:$0xff] %vm8064_vm14, %v4438_v35  ;;  %v7676_v35 = vld [vmem:[#allocation3 + $0x158] ss:$12 sps:$4 sm:$0xff]  }
 0x85f   : > { %v4433_v14 = vpop.permute.xlu0 %4432 }
 0x860   : > { %v4437_v28 = vrot.slane %v4433_v14, 4 }
 0x862   : > { %v4440_v32 = vsel %vm1126_vm13, %v4437_v28, %v4433_v14  ;;  %v7677_v14 = vld [vmem:[#allocation3 + $0x98] ss:$12 sps:$4 sm:$0xff]  }
 0x863   : > { %4448 = vst.msk [vmem:[#allocation2 + $0x6c] sm:$0xff] %vm8064_vm14, %v4440_v32  ;;  %vm9167_vm14 = vcmask 130048   ;;  %v7679_v32 = vld [vmem:[#allocation3 + $0x80] ss:$12 sps:$4 sm:$0xff]  }
 0x864   : > { %vm9168_vm1 = vmmov %vm9167_vm14 }
 0x865   : > { %v4602_v54 = vld [vmem:[#allocation2 + $0x60] sm:$0xff]  ;;  %vm9175_vm0 = vmmov %vm9168_vm1 }
 0x866   : > { %vm9177_vm6 = vmmov %vm9175_vm0 }
 0x86a   : > { %v4604_v30 = vld [vmem:[#allocation2 + $0x6c] sm:$0xff] }
 0x86b   : > { %v8805_v33 = vcombine.low %v4602_v54, %v4604_v30  ;;  %v8807_v34 = vcombine.high %v4602_v54, %v4604_v30  ;;  %v7680_v54 = vld [vmem:[#allocation3 + $0x128] ss:$12 sps:$4 sm:$0xff]  }
 0x86c   : > { %v7681_v30 = vld [vmem:[#allocation3 + $0x68] ss:$12 sps:$4 sm:$0xff]  }
 0x86d   : > { %5580 = vrot.lane.b32.xlu1 %v8807_v34, %s7725_s20  ;;  %4644 = vmatprep.subr.bf16.mxu1 %v8807_v34 }
 0x86e   : > { %4645 = vmatpush1.bf16.msra.mxu1 %v8805_v33 }
 0x86f   : > { %7265 = vmatprep.subr.bf16.mxu1 %v7728_v21 }
 0x871   : > { %5578 = vrot.lane.b32.xlu1 %v8805_v33, %s7725_s20  ;;  %6903 = vmatmul.mubr.msk.bf16.vlgmr.msra.gmra.mxu1 %vm9167_vm14, %v7622_v37  ;;  %vm9179_vm14 = vmmov %vm9175_vm0 }
 0x872   : > { %7267 = vmatprep.mubr.msk.bf16.mxu1 %vm9166_vm4, %v7728_v21 }
 0x87e   : > { %v4431_v23 = vpop.permute.xlu1 %4430 }
 0x87f   : > { %v4439_v41 = vsel %vm1126_vm13, %v4436_v53, %v4431_v23  ;;  %v7675_v53 = vld [vmem:[#allocation3 + $0xb0] ss:$12 sps:$4 sm:$0xff]   ;;  %v7686_v23 = vld [vmem:[#allocation3 + $0xe0] ss:$12 sps:$4 sm:$0xff]  }
 0x880   : > { %4447 = vst.msk [vmem:[#allocation2 + $0x68] sm:$0xf] %vm1139_vm15, %v4439_v41  ;;  %v7688_v41 = vld [vmem:[#allocation3 + $0xc8] ss:$12 sps:$4 sm:$0xff]  }
 0x882   : > { %v4435_v13 = vpop.permute.xlu0 %4434 }
 0x883   : > { %v4441_v3 = vsel %vm1126_vm13, %v4437_v28, %v4435_v13  ;;  %v7678_v28 = vld [vmem:[#allocation3 + $0x140] ss:$12 sps:$4 sm:$0xff]   ;;  %v7689_v13 = vld [vmem:[#allocation3 + $0x8] ss:$12 sps:$4 sm:$0xff]   ;;  %vm9169_vm13 = vmmov %vm9168_vm1 }
 0x884   : > { %4449 = vst.msk [vmem:[#allocation2 + $0x74] sm:$0xf] %vm1139_vm15, %v4441_v3  ;;  %v7690_v3 = vld [vmem:[#allocation3 + $0x350] ss:$12 sps:$4 sm:$0xff]   ;;  %vm9171_vm15 = vmmov %vm9168_vm1 }
 0x887   : > { %v4603_v22 = vld [vmem:[#allocation2 + $0x68] sm:$0xf] }
 0x88b   : > { %v4605_v18 = vld [vmem:[#allocation2 + $0x74] sm:$0xf] }
 0x88c   : > { %v6902_v16 = vcombine.low %v4603_v22, %v4605_v18  ;;  %v7691_v22 = vld [vmem:[#allocation3 + $0x338] ss:$12 sps:$4 sm:$0xff]  }
 0x88e   : > { %5694 = vrot.lane.b32.xlu1 %v6902_v16, %s7724_s19  ;;  %5582 = vrot.lane.b32.xlu0 %v6902_v16, %s7725_s20 }
 0x88f   : > { %7266 = vmatpush3.bf16.msra.mxu1 %v6902_v16 }
 0x890   : > { %5361 = vmatprep.subr.bf16.mxu1 %v7625_v42 }
 0x892   : > { %7268 = vmatmul.mubr.msk.bf16.vlgmr.msra.gmra.mxu1 %vm9168_vm1, %v7622_v37  ;;  %5804 = vrot.lane.b32.xlu1 %v8807_v34, %s7723_s18  ;;  %v7684_v37 = vld [vmem:[#allocation3 + $0xf8] ss:$12 sps:$4 sm:$0xff]  }
 0x893   : > { %5692 = vrot.lane.b32.xlu0 %v8807_v34, %s7724_s19  ;;  %5362 = vmatpush1.bf16.msra.mxu1 %v7623_v29  ;;  %v7693_v29 = vld [vmem:[#allocation3 + $0x308] ss:$12 sps:$4 sm:$0xff]  }
 0x894   : > { %5363 = vmatprep.subr.bf16.mxu1 %v7628_v44  ;;  %5393 = vmatprep.mubr.bf16.mxu1 %v7674_v15  ;;  %v7668_v15 = vld [vmem:[#allocation3 + $0x240] ss:$12 sps:$4 sm:$0xff]  }
 0x896   : > { %5802 = vrot.lane.b32.xlu1 %v8805_v33, %s7723_s18 }
 0x897   : > { %5690 = vrot.lane.b32.xlu0 %v8805_v33, %s7724_s19  ;;  %5364 = vmatpush1.bf16.msra.mxu1 %v7626_v43 }
 0x898   : > { %5365 = vmatprep.subr.bf16.mxu1 %v7631_v31 }
 0x89a   : > { %5918 = vrot.lane.b32.xlu1 %v6902_v16, %s7722_s17 }
 0x89b   : > { %5806 = vrot.lane.b32.xlu0 %v6902_v16, %s7723_s18  ;;  %5366 = vmatpush1.bf16.msra.mxu1 %v7629_v51  ;;  %v7694_v51 = vld [vmem:[%s9145_s11 + $0x8] sm:$0xff]  }
 0x89c   : > { %5367 = vmatprep.subr.bf16.mxu1 %v7634_v58 }
 0x89e   : > { %6028 = vrot.lane.b32.xlu1 %v8807_v34, %s9163_s16 }
 0x89f   : > { %5916 = vrot.lane.b32.xlu0 %v8807_v34, %s7722_s17  ;;  %5368 = vmatpush1.bf16.msra.mxu1 %v7632_v27 }
 0x8a0   : > { %5369 = vmatprep.subr.bf16.mxu1 %v7637_v39 }
 0x8a2   : > { %6026 = vrot.lane.b32.xlu1 %v8805_v33, %s9163_s16 }
 0x8a3   : > { %5914 = vrot.lane.b32.xlu0 %v8805_v33, %s7722_s17  ;;  %5370 = vmatpush1.bf16.msra.mxu1 %v7635_v19 }
 0x8a4   : > { %5371 = vmatprep.subr.bf16.mxu1 %v7640_v38 }
 0x8a6   : > { %6142 = vrot.lane.b32.xlu1 %v6902_v16, %s9160_s23 }
 0x8a7   : > { %6030 = vrot.lane.b32.xlu0 %v6902_v16, %s9163_s16  ;;  %5372 = vmatpush1.bf16.msra.mxu1 %v7638_v52  ;;  %v7695_v52 = vld [vmem:[%s9145_s11 + $0x10] sm:$0xff]  }
 0x8a8   : > { %5373 = vmatprep.subr.bf16.mxu1 %v7643_v9 }
 0x8aa   : > { %6252 = vrot.lane.b32.xlu1 %v8807_v34, %s7719_s14 }
 0x8ab   : > { %6140 = vrot.lane.b32.xlu0 %v8807_v34, %s9160_s23  ;;  %5374 = vmatpush1.bf16.msra.mxu1 %v7641_v10 }
 0x8ac   : > { %5375 = vmatprep.subr.bf16.mxu1 %v7646_v47 }
 0x8ae   : > { %6250 = vrot.lane.b32.xlu1 %v8805_v33, %s7719_s14 }
 0x8af   : > { %6138 = vrot.lane.b32.xlu0 %v8805_v33, %s9160_s23  ;;  %5376 = vmatpush1.bf16.msra.mxu1 %v7644_v7 }
 0x8b0   : > { %5377 = vmatprep.subr.bf16.mxu1 %v7649_v59 }
 0x8b2   : > { %6366 = vrot.lane.b32.xlu1 %v6902_v16, %s7726_s21 }
 0x8b3   : > { %6254 = vrot.lane.b32.xlu0 %v6902_v16, %s7719_s14  ;;  %5378 = vmatpush2.bf16.msra.mxu1 %v7647_v63  ;;  %v7692_v16 = vld [vmem:[#allocation3 + $0x320] ss:$12 sps:$4 sm:$0xff]  }
 0x8b4   : > { %5379 = vmatprep.subr.bf16.mxu1 %v7652_v25 }
 0x8b6   : > { %6470 = vperm.xlu1 %7353, %v6466_v24   ;;  %v7696_v24 = vld [vmem:[%s9145_s11 + $0x18] sm:$0xff]  }
 0x8b7   : > { %6364 = vrot.lane.b32.xlu0 %v8807_v34, %s7726_s21  ;;  %5380 = vmatpush2.bf16.msra.mxu1 %v7650_v40  ;;  %v7683_v34 = vld [vmem:[#allocation3 + $0x50] ss:$12 sps:$4 sm:$0xff]  }
 0x8b8   : > { %5381 = vmatprep.subr.bf16.mxu1 %v7655_v36 }
 0x8ba   : > { %6490 = vrot.lane.b32.xlu1 %v7702_v17, %s7722_s17 }
 0x8bb   : > { %6362 = vrot.lane.b32.xlu0 %v8805_v33, %s7726_s21  ;;  %5382 = vmatpush2.bf16.msra.mxu1 %v7653_v45  ;;  %v7682_v33 = vld [vmem:[#allocation3 + $0x110] ss:$12 sps:$4 sm:$0xff]  }
 0x8bc   : > { %5383 = vmatprep.subr.bf16.mxu1 %v7658_v49 }
 0x8be   : > { %6494 = vrot.lane.b32.xlu1 %v7703_v60, %s7722_s17 }
 0x8bf   : > { %6475 = vperm.xlu0 %7352, %v6467_v50   ;;  %5384 = vmatpush2.bf16.msra.mxu1 %v7656_v55  ;;  %v7697_v50 = vld [vmem:[%s9145_s11 + $0x20] sm:$0xff]  }
 0x8c0   : > { %5385 = vmatprep.subr.bf16.mxu1 %v7661_v56 }
 0x8c2   : > { %6498 = vrot.lane.b32.xlu1 %v7704_v48, %s7722_s17 }
 0x8c3   : > { %5386 = vmatpush2.bf16.msra.mxu1 %v7659_v1  ;;  %6492 = vrot.lane.b32.xlu0 %v7705_v6, %s7722_s17  ;;  %v7698_v6 = vld [vmem:[%s9145_s11 + $0x28] sm:$0xff]  }
 0x8c4   : > { %5387 = vmatprep.subr.bf16.mxu1 %v7664_v26 }
 0x8c7   : > { %5388 = vmatpush2.bf16.msra.mxu1 %v7662_v8  ;;  %6496 = vrot.lane.b32.xlu0 %v7706_v62, %s7722_s17 }
 0x8c8   : > { %5389 = vmatprep.subr.bf16.mxu1 %v7667_v11 }
 0x8cb   : > { %5390 = vmatpush2.bf16.msra.mxu1 %v7665_v4  ;;  %6500 = vrot.lane.b32.xlu0 %v7707_v61, %s7722_s17  ;;  %s9193_s17 = smul.u32 48, %s9197_s26 }
 0x8cc   : > { %5391 = vmatprep.subr.bf16.mxu1 %v7670_v12  ;;  %v7699_v12 = vld [vmem:[%s9145_s11 + $0x30] sm:$0xff]  }
 0x8cd   : > { %s9113_s16 = scalar_lea.vmem %s9147_s13, %s9193_s17 }
 0x8cf   : > { %5392 = vmatpush2.bf16.msra.mxu1 %v7668_v15 }
 0x8d0   : > { %7180 = vmatprep.subr.bf16.mxu1 %v7671_v57 }
 0x8d2   : > { %5394 = vmatmul.mubr.bf16.vlgmr.msra.gmra.mxu1 %v8795_v20  ;;  %v7685_v20 = vld [vmem:[#allocation3 + $0x38] ss:$12 sps:$4 sm:$0xff]  }
 0x8d3   : > { %7181 = vmatpush3.bf16.msra.mxu1 %v7675_v53  ;;  %5479 = vmatprep.mubr.bf16.mxu1 %v8752_v5  ;;  %v7687_v5 = vld [vmem:[#allocation3 + $0x20] ss:$12 sps:$4 sm:$0xff]  }
 0x8d4   : > { %7182 = vmatprep.subr.bf16.mxu1 %v7676_v35  ;;  %v7700_v35 = vld [vmem:[%s9145_s11 + $0x38] sm:$0xff]  }
 0x8d7   : > { %7183 = vmatpush3.bf16.msra.mxu1 %v7677_v14 }
 0x8d8   : > { %7184 = vmatprep.subr.bf16.mxu1 %v7678_v28 }
 0x8db   : > { %7185 = vmatpush3.bf16.msra.mxu1 %v7679_v32  ;;  %v7701_v32 = vld [vmem:[%s9145_s11 + $0x40] sm:$0xff]  }
 0x8dc   : > { %7186 = vmatprep.subr.bf16.mxu1 %v7680_v54 }
 0x8df   : > { %7187 = vmatpush3.bf16.msra.mxu1 %v7681_v30  ;;  %v5581_v18 = vpop.permute.xlu1 %5580 }
 0x8e0   : > { %7188 = vmatprep.subr.bf16.mxu1 %v7682_v33 }
 0x8e3   : > { %7189 = vmatpush3.bf16.msra.mxu1 %v7683_v34  ;;  %v5579_v42 = vpop.permute.xlu1 %5578 }
 0x8e4   : > { %7190 = vmatprep.subr.bf16.mxu1 %v7684_v37  ;;  %v5584_v31 = vsel %vm526_vm11, %v5579_v42, %v5581_v18 }
 0x8e7   : > { %7191 = vmatpush3.bf16.msra.mxu1 %v7685_v20 }
 0x8e8   : > { %7192 = vmatprep.subr.bf16.mxu1 %v7686_v23 }
 0x8eb   : > { %7193 = vmatpush3.bf16.msra.mxu1 %v7687_v5  ;;  %v5352_v5 = vpop.f32.mrf.mxu0 }
 0x8ec   : > { %7194 = vmatprep.subr.bf16.mxu1 %v7688_v41 }
 0x8ef   : > { %7195 = vmatpush3.bf16.msra.mxu1 %v7689_v13 }
 0x8f0   : > { %7271 = vmatprep.subr.bf16.mxu1 %v7728_v21 }
 0x8f2   : > { %5480 = vmatmul.mubr.bf16.vlgmr.msra.gmra.mxu1 %v8760_v46 }
 0x8f3   : > { %7272 = vmatpush3.bf16.msra.mxu1 %v7690_v3  ;;  %7279 = vmatprep.mubr.msk.bf16.mxu1 %vm9166_vm4, %v7728_v21 }
 0x8f4   : > { %7273 = vmatprep.subr.bf16.mxu1 %v7728_v21 }
 0x8f7   : > { %7274 = vmatpush3.bf16.msra.mxu1 %v7691_v22 }
 0x8f8   : > { %7275 = vmatprep.subr.bf16.mxu1 %v7728_v21 }
 0x8fb   : > { %7276 = vmatpush3.bf16.msra.mxu1 %v7692_v16 }
 0x8fc   : > { %7277 = vmatprep.subr.bf16.mxu1 %v7728_v21 }
 0x8ff   : > { %7278 = vmatpush3.bf16.msra.mxu1 %v7693_v29 }
 0x900   : > { %v5583_v44 = vpop.permute.xlu0 %5582  ;;  %v5695_v46 = vpop.permute.xlu1 %5694  ;;  %7283 = vmatprep.subr.bf16.mxu1 %v7728_v21 }
 0x901   : > { %v5585_v43 = vsel %vm526_vm11, %v5581_v18, %v5583_v44  ;;  %vm9170_vm11 = vmmov %vm9168_vm1 }
 0x902   : > { %7280 = vmatmul.mubr.msk.bf16.vlgmr.msra.gmra.mxu1 %vm4132_vm2, %v8774_v2  ;;  %5606 = vmatprep.subr.bf16.mxu0 %v5585_v43  ;;  %vm9174_vm2 = vmmov %vm9168_vm1 }
 0x903   : > { %7284 = vmatpush3.bf16.msra.mxu1 %v5583_v44  ;;  %5607 = vmatpush1.bf16.msra.mxu0 %v5584_v31 }
 0x904   : > { %v5805_v58 = vpop.permute.xlu1 %5804  ;;  %7285 = vmatprep.mubr.msk.bf16.mxu1 %vm9166_vm4, %v7728_v21  ;;  %7289 = vmatprep.subr.bf16.mxu1 %v7728_v21 }
 0x905   : > { %v5693_v27 = vpop.permute.xlu0 %5692 }
 0x906   : > { %7023 = vmatmul.mubr.msk.bf16.vlgmr.msra.gmra.mxu0 %vm9169_vm13, %v7694_v51  ;;  %v5697_v39 = vsel %vm559_vm10, %v5693_v27, %v5695_v46  ;;  %vm9181_vm13 = vmmov %vm9175_vm0 }
 0x907   : > { %5718 = vmatprep.subr.bf16.mxu0 %v5697_v39  ;;  %5736 = vmatprep.mubr.bf16.mxu0 %v7718_v0 }
 0x908   : > { %v5803_v2 = vpop.permute.xlu1 %5802 }
 0x909   : > { %v5691_v19 = vpop.permute.xlu0 %5690  ;;  %v5808_v7 = vsel %vm592_vm9, %v5803_v2, %v5805_v58 }
 0x90a   : > { %v5696_v38 = vsel %vm559_vm10, %v5691_v19, %v5693_v27  ;;  %7286 = vmatmul.mubr.msk.bf16.vlgmr.msra.gmra.mxu1 %vm9170_vm11, %v7694_v51  ;;  %vm9172_vm10 = vmmov %vm9168_vm1 }
 0x90b   : > { %7290 = vmatpush3.bf16.msra.mxu1 %v5695_v46  ;;  %5719 = vmatpush1.bf16.msra.mxu0 %v5696_v38  ;;  %vm9182_vm11 = vmmov %vm9175_vm0 }
 0x90c   : > { %v5919_v9 = vpop.permute.xlu1 %5918  ;;  %7291 = vmatprep.mubr.msk.bf16.mxu1 %vm9166_vm4, %v7728_v21  ;;  %7295 = vmatprep.subr.bf16.mxu1 %v7728_v21 }
 0x90d   : > { %v5807_v10 = vpop.permute.xlu0 %5806 }
 0x90e   : > { %7028 = vmatmul.mubr.msk.bf16.vlgmr.msra.gmra.mxu0 %vm9171_vm15, %v7695_v52  ;;  %v5809_v47 = vsel %vm592_vm9, %v5805_v58, %v5807_v10  ;;  %vm9173_vm9 = vmmov %vm9168_vm1 }
 0x90f   : > { %5830 = vmatprep.subr.bf16.mxu0 %v5809_v47  ;;  %5848 = vmatprep.mubr.bf16.mxu0 %v7718_v0  ;;  %vm9180_vm1 = vmmov %vm9175_vm0 }
 0x910   : > { %5831 = vmatpush1.bf16.msra.mxu0 %v5808_v7  ;;  %v6029_v59 = vpop.permute.xlu1 %6028  ;;  %vm9184_vm15 = vmmov %vm9175_vm0 }
 0x911   : > { %v5917_v63 = vpop.permute.xlu0 %5916 }
 0x912   : > { %7292 = vmatmul.mubr.msk.bf16.vlgmr.msra.gmra.mxu1 %vm9172_vm10, %v7695_v52  ;;  %v5921_v25 = vsel %vm625_vm8, %v5917_v63, %v5919_v9  ;;  %vm9185_vm10 = vmmov %vm9175_vm0 }
 0x913   : > { %7296 = vmatpush3.bf16.msra.mxu1 %v5807_v10  ;;  %5942 = vmatprep.subr.bf16.mxu0 %v5921_v25 }
 0x914   : > { %7297 = vmatprep.mubr.msk.bf16.mxu1 %vm9166_vm4, %v7728_v21  ;;  %7301 = vmatprep.subr.bf16.mxu1 %v7728_v21  ;;  %v6027_v45 = vpop.permute.xlu1 %6026 }
 0x915   : > { %v5915_v40 = vpop.permute.xlu0 %5914  ;;  %v6032_v60 = vsel %vm658_vm7, %v6027_v45, %v6029_v59 }
 0x916   : > { %v5920_v36 = vsel %vm625_vm8, %v5915_v40, %v5917_v63  ;;  %7033 = vmatmul.mubr.msk.bf16.vlgmr.msra.gmra.mxu0 %vm9173_vm9, %v7696_v24  ;;  %vm9186_vm9 = vmmov %vm9175_vm0 }
 0x917   : > { %5943 = vmatpush1.bf16.msra.mxu0 %v5920_v36  ;;  %5960 = vmatprep.mubr.bf16.mxu0 %v7718_v0 }
 0x918   : > { %v6143_v55 = vpop.permute.xlu1 %6142 }
 0x919   : > { %v6031_v49 = vpop.permute.xlu0 %6030 }
 0x91a   : > { %7298 = vmatmul.mubr.msk.bf16.vlgmr.msra.gmra.mxu1 %vm9174_vm2, %v7696_v24  ;;  %v6033_v17 = vsel %vm658_vm7, %v6029_v59, %v6031_v49  ;;  %vm9178_vm7 = vmmov %vm9176_vm3 }
 0x91b   : > { %7302 = vmatpush3.bf16.msra.mxu1 %v5919_v9  ;;  %6054 = vmatprep.subr.bf16.mxu0 %v6033_v17 }
 0x91c   : > { %7303 = vmatprep.mubr.msk.bf16.mxu1 %vm9166_vm4, %v7728_v21  ;;  %7307 = vmatprep.subr.bf16.mxu1 %v7728_v21  ;;  %v6253_v48 = vpop.permute.xlu1 %6252 }
 0x91d   : > { %v6141_v56 = vpop.permute.xlu0 %6140 }
 0x91e   : > { %7038 = vmatmul.mubr.msk.bf16.vlgmr.msra.gmra.mxu0 %vm9175_vm0, %v7697_v50  ;;  %v6145_v1 = vsel %vm9176_vm3, %v6141_v56, %v6143_v55 }
 0x91f   : > { %6055 = vmatpush1.bf16.msra.mxu0 %v6032_v60  ;;  %6072 = vmatprep.mubr.bf16.mxu0 %v7718_v0 }
 0x920   : > { %6166 = vmatprep.subr.bf16.mxu0 %v6145_v1  ;;  %v6251_v4 = vpop.permute.xlu1 %6250 }
 0x921   : > { %v6139_v26 = vpop.permute.xlu0 %6138  ;;  %v6256_v15 = vsel %vm724_vm5, %v6251_v4, %v6253_v48 }
 0x922   : > { %7304 = vmatmul.mubr.msk.bf16.vlgmr.msra.gmra.mxu1 %vm9177_vm6, %v7697_v50  ;;  %v6144_v11 = vsel %vm9178_vm7, %v6139_v26, %v6141_v56 }
 0x923   : > { %7308 = vmatpush3.bf16.msra.mxu1 %v6031_v49  ;;  %7309 = vmatprep.mubr.msk.bf16.mxu1 %vm9166_vm4, %v7728_v21 }
 0x924   : > { %7313 = vmatprep.subr.bf16.mxu1 %v7728_v21  ;;  %v6367_v57 = vpop.permute.xlu1 %6366 }
 0x925   : > { %v6255_v8 = vpop.permute.xlu0 %6254 }
 0x926   : > { %7043 = vmatmul.mubr.msk.bf16.vlgmr.msra.gmra.mxu0 %vm9179_vm14, %v7698_v6  ;;  %v6257_v62 = vsel %vm724_vm5, %v6253_v48, %v6255_v8  ;;  %vm9183_vm5 = vmmov %vm9175_vm0 }
 0x927   : > { %6167 = vmatpush1.bf16.msra.mxu0 %v6144_v11  ;;  %6184 = vmatprep.mubr.bf16.mxu0 %v7718_v0 }
 0x928   : > { %6278 = vmatprep.subr.bf16.mxu0 %v6257_v62 }
 0x929   : > { %v6365_v61 = vpop.permute.xlu0 %6364 }
 0x92a   : > { %7310 = vmatmul.mubr.msk.bf16.vlgmr.msra.gmra.mxu1 %vm9180_vm1, %v7698_v6  ;;  %v6369_v53 = vsel %vm757_vm12, %v6365_v61, %v6367_v57 }
 0x92b   : > { %7314 = vmatpush3.bf16.msra.mxu1 %v6143_v55  ;;  %7315 = vmatprep.mubr.msk.bf16.mxu1 %vm9166_vm4, %v7728_v21 }
 0x92c   : > { %7319 = vmatprep.subr.bf16.mxu1 %v7728_v21 }
 0x92d   : > { %v6363_v14 = vpop.permute.xlu0 %6362 }
 0x92e   : > { %7048 = vmatmul.mubr.msk.bf16.vlgmr.msra.gmra.mxu0 %vm9181_vm13, %v7699_v12  ;;  %v6368_v28 = vsel %vm757_vm12, %v6363_v14, %v6365_v61  ;;  %vm9194_vm12 = vcmask 261120  }
 0x92f   : > { %6279 = vmatpush1.bf16.msra.mxu0 %v6256_v15  ;;  %6296 = vmatprep.mubr.bf16.mxu0 %v7718_v0 }
 0x930   : > { %6390 = vmatprep.subr.bf16.mxu0 %v6369_v53 }
 0x931   : > { %v8979_v54 = vpop.f32.mrf.mxu1 }
 0x932   : > { %7316 = vmatmul.mubr.msk.bf16.vlgmr.msra.gmra.mxu1 %vm9182_vm11, %v7699_v12 }
 0x933   : > { %7320 = vmatpush3.bf16.msra.mxu1 %v6255_v8  ;;  %7321 = vmatprep.mubr.msk.bf16.mxu1 %vm9166_vm4, %v7728_v21  ;;  %v8981_v30 = vpop.f32.mrf.mxu1 }
 0x934   : > { %7325 = vmatprep.subr.bf16.mxu1 %v7728_v21 }
 0x935   : > { %v8983_v33 = vpop.f32.mrf.mxu1 }
 0x936   : > { %7053 = vmatmul.mubr.msk.bf16.vlgmr.msra.gmra.mxu0 %vm9183_vm5, %v7700_v35 }
 0x937   : > { %6391 = vmatpush1.bf16.msra.mxu0 %v6368_v28  ;;  %6408 = vmatprep.mubr.bf16.mxu0 %v7718_v0  ;;  %v8985_v0 = vpop.f32.mrf.mxu1 }
 0x93a   : > { %7322 = vmatmul.mubr.msk.bf16.vlgmr.msra.gmra.mxu1 %vm9184_vm15, %v7700_v35 }
 0x93b   : > { %7326 = vmatpush3.bf16.msra.mxu1 %v6367_v57  ;;  %7327 = vmatprep.mubr.msk.bf16.mxu1 %vm9166_vm4, %v7728_v21  ;;  %v5354_v21 = vpop.f32.mrf.mxu0  ;;  %vm9195_vm4 = vmmov %vm9194_vm12 }
 0x93d   : > { %v8991_v41 = vpop.f32.mrf.mxu0 }
 0x93e   : > { %7058 = vmatmul.mubr.msk.bf16.vlgmr.msra.gmra.mxu0 %vm9185_vm10, %v7701_v32 }
 0x93f   : > { %v8993_v3 = vpop.f32.mrf.mxu0 }
 0x941   : > { %v8995_v22 = vpop.f32.mrf.mxu0 }
 0x942   : > { %7328 = vmatmul.mubr.msk.bf16.vlgmr.msra.gmra.mxu1 %vm9186_vm9, %v7701_v32 }
 0x943   : > { %v8997_v16 = vpop.f32.mrf.mxu0 }
 0x945   : > { %v9003_v44 = vpop.f32.mrf.mxu0 }
 0x947   : > { %v9005_v43 = vpop.f32.mrf.mxu0 }
 0x949   : > { %v7218_v51 = vpop.f32.mrf.mxu0 }
 0x94b   : > { %v7219_v27 = vpop.f32.mrf.mxu0 }
 0x94d   : > { %v7221_v2 = vpop.f32.mrf.mxu0 }
 0x94f   : > { %v7222_v38 = vpop.f32.mrf.mxu0 }
 0x952   : > { %v8987_v34 = vpop.f32.mrf.mxu1 }
 0x954   : > { %v7269_v37 = vpop.f32.mrf.mxu1 }
 0x956   : > { %v8989_v20 = vpop.f32.mrf.mxu1 }
 0x958   : > { %v7270_v23 = vpop.f32.mrf.mxu1 }
 0x992   : > { %v5395_v13 = vpop.f32.mrf.mxu1 }
 0x994   : > { %v5397_v18 = vpop.f32.mrf.mxu1 }
 0x996   : > { %v8999_v42 = vpop.f32.mrf.mxu1 }
 0x998   : > { %v9001_v29 = vpop.f32.mrf.mxu1 }
 0x9b2   : > { %v7196_v46 = vpop.f32.mrf.mxu1 }
 0x9b4   : > { %v7197_v31 = vpop.f32.mrf.mxu1 }
 0x9b6   : > { %v7199_v58 = vpop.f32.mrf.mxu1 }
 0x9b8   : > { %v7200_v39 = vpop.f32.mrf.mxu1 }
 0x9c2   : > { %v9007_v19 = vpop.f32.mrf.mxu1 }
 0x9c4   : > { %v7281_v52 = vpop.f32.mrf.mxu1 }
 0x9c5   : > { %v5353_v52 = vadd.f32 %v5352_v5, %v8979_v54  ;;  %v5359_v54 = vadd.f32 %v8993_v3, %v8985_v0 }
 0x9c6   : > { %v9009_v9 = vpop.f32.mrf.mxu1  ;;  %v5626_v10 = vpop.f32.mrf.mxu0 }
 0x9c8   : > { %v7282_v47 = vpop.f32.mrf.mxu1  ;;  %v9011_v7 = vpop.f32.mrf.mxu0 }
 0x9c9   : > { %v7198_v47 = vadd.f32 %v7197_v31, %v7196_v46 }
 0x9ca   : > { %v9013_v59 = vpop.f32.mrf.mxu1  ;;  %v9015_v63 = vpop.f32.mrf.mxu0 }
 0x9cc   : > { %v7287_v25 = vpop.f32.mrf.mxu1  ;;  %v9017_v24 = vpop.f32.mrf.mxu0 }
 0x9ce   : > { %v9019_v40 = vpop.f32.mrf.mxu1  ;;  %v5738_v36 = vpop.f32.mrf.mxu0 }
 0x9d0   : > { %v7288_v45 = vpop.f32.mrf.mxu1  ;;  %v9021_v49 = vpop.f32.mrf.mxu0 }
 0x9d2   : > { %v9023_v17 = vpop.f32.mrf.mxu1  ;;  %v9025_v50 = vpop.f32.mrf.mxu0 }
 0x9d4   : > { %v7293_v55 = vpop.f32.mrf.mxu1  ;;  %v9027_v56 = vpop.f32.mrf.mxu0 }
 0x9d5   : > { %v5355_v55 = vadd.f32 %v5354_v21, %v8981_v30 }
 0x9d6   : > { %v9029_v60 = vpop.f32.mrf.mxu1  ;;  %v5850_v1 = vpop.f32.mrf.mxu0 }
 0x9d8   : > { %v7294_v26 = vpop.f32.mrf.mxu1  ;;  %v9031_v48 = vpop.f32.mrf.mxu0 }
 0x9d9   : > { %v5396_v26 = vadd.f32 %v5395_v13, %v5353_v52  ;;  %v5402_v13 = vadd.f32 %v9001_v29, %v5359_v54 }
 0x9da   : > { %v9033_v6 = vpop.f32.mrf.mxu1  ;;  %v9035_v8 = vpop.f32.mrf.mxu0 }
 0x9db   : > { %v5439_v30 = vadd.f32 %v8995_v22, %v5396_v26 }
 0x9dc   : > { %v7299_v11 = vpop.f32.mrf.mxu1  ;;  %v9037_v62 = vpop.f32.mrf.mxu0 }
 0x9dd   : > { %v7201_v11 = vadd.f32 %v7200_v39, %v7199_v58  ;;  %v7223_v58 = vadd.f32 %v7222_v38, %v7221_v2  ;;  %v5676_v0 = vadd.f32 %v5626_v10, %v5439_v30  ;;  %v9075_v39 = vpop.permute.xlu0 %6475  ;;  %v5445_v2 = vadd.f32 %v9005_v43, %v5402_v13 }
 0x9de   : > { %v9039_v4 = vpop.f32.mrf.mxu1  ;;  %v5962_v12 = vpop.f32.mrf.mxu0 }
 0x9df   : > { %9187 = vst [vmem:[#allocation4_spill] sm:$0xff] %v9039_v4  ;;  %v7220_v4 = vadd.f32 %v7219_v27, %v7218_v51  ;;  %v5485_v31 = vadd.f32 %v7201_v11, %v8989_v20  ;;  %v5788_v20 = vadd.f32 %v5738_v36, %v5676_v0 }
 0x9e0   : > { %v7300_v61 = vpop.f32.mrf.mxu1  ;;  %v9041_v15 = vpop.f32.mrf.mxu0 }
 0x9e1   : > { %v5526_v38 = vadd.f32 %v7223_v58, %v5485_v31 }
 0x9e2   : > { %v9043_v57 = vpop.f32.mrf.mxu1  ;;  %v9045_v53 = vpop.f32.mrf.mxu0 }
 0x9e4   : > { %v7305_v35 = vpop.f32.mrf.mxu1  ;;  %v9047_v14 = vpop.f32.mrf.mxu0 }
 0x9e5   : > { %9188 = vst [vmem:[#allocation5_spill] sm:$0xff] %v9047_v14  ;;  %v5482_v14 = vadd.f32 %v7198_v47, %v8987_v34 }
 0x9e6   : > { %v9049_v28 = vpop.f32.mrf.mxu1  ;;  %v6074_v32 = vpop.f32.mrf.mxu0 }
 0x9e7   : > { %9189 = vst [vmem:[#allocation6_spill] sm:$0xff] %v9049_v28  ;;  %v5357_v28 = vadd.f32 %v8991_v41, %v8983_v33  ;;  %v5523_v51 = vadd.f32 %v7220_v4, %v5482_v14  ;;  %v5900_v14 = vadd.f32 %v5850_v1, %v5788_v20 }
 0x9e8   : > { %v7306_v37 = vpop.f32.mrf.mxu1  ;;  %v9051_v23 = vpop.f32.mrf.mxu0 }
 0x9e9   : > { %v5398_v37 = vadd.f32 %v5397_v18, %v5355_v55  ;;  %v5400_v21 = vadd.f32 %v8999_v42, %v5357_v28  ;;  %v9072_v18 = vpop.permute.xlu1 %6470  ;;  %v5564_v42 = vadd.f32 %v9007_v19, %v5523_v51  ;;  %v5680_v19 = vadd.f32 %v9017_v24, %v5445_v2 }
 0x9ea   : > { %v9054_v25 = vpop.f32.mrf.mxu1  ;;  %v9056_v45 = vpop.f32.mrf.mxu0  ;;  %v6012_v11 = vadd.f32 %v5962_v12, %v5900_v14 }
 0x9eb   : > { %v5441_v34 = vadd.f32 %v8997_v16, %v5398_v37  ;;  %v5443_v22 = vadd.f32 %v9003_v44, %v5400_v21  ;;  %v5678_v16 = vadd.f32 %v9013_v59, %v5564_v42  ;;  %v5567_v44 = vadd.f32 %v9009_v9, %v5526_v38  ;;  %v6493_v59 = vpop.permute.xlu0 %6492 }
 0x9ec   : > { %v7311_v61 = vpop.f32.mrf.mxu1  ;;  %v9059_v35 = vpop.f32.mrf.mxu0  ;;  %v6124_v54 = vadd.f32 %v6074_v32, %v6012_v11 }
 0x9ed   : > { %v5677_v29 = vadd.f32 %v9011_v7, %v5441_v34  ;;  %v5679_v10 = vadd.f32 %v9015_v63, %v5443_v22  ;;  %v6491_v47 = vpop.permute.xlu1 %6490  ;;  %v5790_v36 = vadd.f32 %v9023_v17, %v5678_v16  ;;  %v5681_v63 = vadd.f32 %v9019_v40, %v5567_v44 }
 0x9ee   : > { %v9066_v5 = vpop.f32.mrf.mxu1  ;;  %v6186_v46 = vpop.f32.mrf.mxu0 }
 0x9ef   : > { %v5789_v4 = vadd.f32 %v9021_v49, %v5677_v29  ;;  %v5791_v43 = vadd.f32 %v9025_v50, %v5679_v10  ;;  %v5792_v49 = vadd.f32 %v9027_v56, %v5680_v19  ;;  %v5902_v9 = vadd.f32 %v9033_v6, %v5790_v36  ;;  %v9190_v6 = vld [vmem:[#allocation4_spill] sm:$0xff]  ;;  %v6497_v51 = vpop.permute.xlu0 %6496 }
 0x9f0   : > { %v7312_v33 = vpop.f32.mrf.mxu1  ;;  %v6188_v41 = vpop.f32.mrf.mxu0  ;;  %v5793_v17 = vadd.f32 %v9029_v60, %v5681_v63  ;;  %v6236_v21 = vadd.f32 %v6186_v46, %v6124_v54 }
 0x9f1   : > { %v5901_v26 = vadd.f32 %v9031_v48, %v5789_v4  ;;  %v5903_v24 = vadd.f32 %v9035_v8, %v5791_v43  ;;  %v5904_v50 = vadd.f32 %v9037_v62, %v5792_v49  ;;  %v6014_v30 = vadd.f32 %v9043_v57, %v5902_v9  ;;  %v6495_v13 = vpop.permute.xlu1 %6494  ;;  %v9191_v8 = vld [vmem:[#allocation5_spill] sm:$0xff]  ;;  %v9192_v57 = vld [vmem:[#allocation6_spill] sm:$0xff] }
 0x9f2   : > { %v6229_v3 = vpop.f32.mrf.mxu1  ;;  %v6190_v27 = vpop.f32.mrf.mxu0  ;;  %v5905_v31 = vadd.f32 %v9190_v6, %v5793_v17 }
 0x9f3   : > { %v6013_v37 = vadd.f32 %v9041_v15, %v5901_v26  ;;  %v6015_v40 = vadd.f32 %v9045_v53, %v5903_v24  ;;  %v6016_v58 = vadd.f32 %v9191_v8, %v5904_v50  ;;  %v6126_v60 = vadd.f32 %v9054_v25, %v6014_v30 }
 0x9f4   : > { %v7317_v28 = vpop.f32.mrf.mxu1  ;;  %v6192_v52 = vpop.f32.mrf.mxu0  ;;  %v6017_v0 = vadd.f32 %v9192_v57, %v5905_v31  ;;  %v6503_v25 = vsel %vm625_vm8, %v6491_v47, %v6493_v59 }
 0x9f5   : > { %v6125_v56 = vadd.f32 %v9051_v23, %v6013_v37  ;;  %v6127_v62 = vadd.f32 %v9056_v45, %v6015_v40  ;;  %v6128_v53 = vadd.f32 %v9059_v35, %v6016_v58  ;;  %v6238_v22 = vadd.f32 %v6229_v3, %v6126_v60  ;;  %v6499_v35 = vpop.permute.xlu1 %6498 }
 0x9f6   : > { %v6232_v55 = vpop.f32.mrf.mxu1  ;;  %v6298_v7 = vpop.f32.mrf.mxu0  ;;  %v6129_v2 = vadd.f32 %v9066_v5, %v6017_v0  ;;  %v6505_v11 = vsel %vm625_vm8, %v6497_v51, %v6499_v35 }
 0x9f7   : > { %v6237_v33 = vadd.f32 %v6188_v41, %v6125_v56  ;;  %v6348_v34 = vadd.f32 %v6298_v7, %v6236_v21  ;;  %v6239_v42 = vadd.f32 %v6190_v27, %v6127_v62  ;;  %v6240_v38 = vadd.f32 %v6192_v52, %v6128_v53  ;;  %v6501_v7 = vpop.permute.xlu0 %6500 }
 0x9f8   : > { %v7318_v1 = vpop.f32.mrf.mxu1  ;;  %v6300_v61 = vpop.f32.mrf.mxu0  ;;  %v6241_v14 = vadd.f32 %v6232_v55, %v6129_v2  ;;  %v6504_v55 = vsel %vm625_vm8, %v6493_v59, %v6495_v13  ;;  %v6506_v24 = vsel %vm625_vm8, %v6499_v35, %v6501_v7 }
 0x9f9   : > { %v6349_v29 = vadd.f32 %v6300_v61, %v6237_v33 }
 0x9fa   : > { %v6341_v48 = vpop.f32.mrf.mxu1  ;;  %v6302_v12 = vpop.f32.mrf.mxu0 }
 0x9fb   : > { %v6350_v28 = vadd.f32 %v6341_v48, %v6238_v22  ;;  %v6351_v16 = vadd.f32 %v6302_v12, %v6239_v42 }
 0x9fc   : > { %v7323_v15 = vpop.f32.mrf.mxu1  ;;  %v6304_v32 = vpop.f32.mrf.mxu0 }
 0x9fd   : > { %v6352_v44 = vadd.f32 %v6304_v32, %v6240_v38 }
 0x9fe   : > { %v6344_v23 = vpop.f32.mrf.mxu1  ;;  %v6410_v46 = vpop.f32.mrf.mxu0 }
 0x9ff   : > { %v6460_v20 = vadd.f32 %v6410_v46, %v6348_v34  ;;  %v6353_v36 = vadd.f32 %v6344_v23, %v6241_v14 }
 0xa00   : > { %v7324_v45 = vpop.f32.mrf.mxu1  ;;  %v6412_v41 = vpop.f32.mrf.mxu0 }
 0xa01   : > { %v6478_v10 = vadd.f32 %v9072_v18, %v6460_v20  ;;  %v6461_v4 = vadd.f32 %v6412_v41, %v6349_v29 }
 0xa02   : > { %v6453_v5 = vpop.f32.mrf.mxu1  ;;  %v6414_v3 = vpop.f32.mrf.mxu0 }
 0xa03   : > { %v6513_v27 = vadd.f32 %v6503_v25, %v6478_v10  ;;  %v6479_v52 = vadd.f32 %v9072_v18, %v6461_v4  ;;  %v6462_v47 = vadd.f32 %v6453_v5, %v6350_v28  ;;  %v6463_v19 = vadd.f32 %v6414_v3, %v6351_v16 }
 0xa04   : > { %v7329_v43 = vpop.f32.mrf.mxu1  ;;  %v6416_v26 = vpop.f32.mrf.mxu0 }
 0xa05   : > { %6519 = vst [vmem:[%s9113_s16] sm:$0xff] %v6513_v27  ;;  %v6480_v63 = vadd.f32 %v9072_v18, %v6462_v47  ;;  %v6514_v49 = vadd.f32 %v6504_v55, %v6479_v52  ;;  %v6481_v1 = vadd.f32 %v9075_v39, %v6463_v19  ;;  %v6464_v61 = vadd.f32 %v6416_v26, %v6352_v44 }
 0xa06   : > { %v6456_v9 = vpop.f32.mrf.mxu1 }
 0xa07   : > { %v6515_v37 = vadd.f32 %v6495_v13, %v6480_v63  ;;  %6520 = vst [vmem:[%s9113_s16 + $0x8] sm:$0xff] %v6514_v49  ;;  %v6482_v59 = vadd.f32 %v9075_v39, %v6464_v61  ;;  %v6465_v54 = vadd.f32 %v6456_v9, %v6353_v36  ;;  %v6516_v17 = vadd.f32 %v6505_v11, %v6481_v1 }
 0xa08   : > { %v7330_v50 = vpop.f32.mrf.mxu1 }
 0xa09   : > { %6521 = vst.msk [vmem:[%s9113_s16 + $0x10] sm:$0xff] %vm9194_vm12, %v6515_v37  ;;  %6522 = vst [vmem:[%s9113_s16 + $0x18] sm:$0xff] %v6516_v17  ;;  %v6483_v18 = vadd.f32 %v9075_v39, %v6465_v54  ;;  %v6517_v48 = vadd.f32 %v6506_v24, %v6482_v59 }
 0xa0b   : > { %v6518_v12 = vadd.f32 %v6501_v7, %v6483_v18  ;;  %6523 = vst [vmem:[%s9113_s16 + $0x20] sm:$0xff] %v6517_v48 }
 0xa0d   : > { %6524 = vst.msk [vmem:[%s9113_s16 + $0x28] sm:$0xff] %vm9195_vm4, %v6518_v12 }
 0xa0e PF: > { %s23_s25 = sadd.s32 1, %s7716_s25  }
 0xa0f   : > { %p20_p4 = scmp.ge.s32.totalorder %s23_s25, 4  }
 0xa11   :  { %22 = sbr.rel (!%p20_p4) target bundleno = 1 (0x1), region = 110 }

</bundles_post_ra>
